<compile_context>
chip_gen: v7x
topology: tpu7x:2x2x1
jax: 0.10.0
libtpu: 0.0.40
codegen_flags: <defaults>
</compile_context>

<pallas_src>
import jax
import jax.numpy as jnp
from jax import lax
from jax.experimental import pallas as pl
from jax.experimental.pallas import tpu as pltpu


def _sigmoid(v):
    # Stable sigmoid via a single EUP tanh (identical function to
    # jax.nn.sigmoid); avoids the hand-rolled 1/(1+exp(-v)) divide and its
    # inf intermediate, and keeps the work off the VPU.
    return 0.5 * (jnp.tanh(0.5 * v) + 1.0)


def _band_lhs(img, ksize, cin):
    """Banded-matmul LHS for a `ksize x ksize` SAME conv.

    img: (H, W*cin) f32 with channel-minor flattened rows (lane index w*cin+ci).
    Returns (H, ksize * (W + ksize - 1) * cin) with column index
    kh*(Wp*cin) + w'*cin + ci, Wp = W + ksize - 1, w' indexing the zero-padded
    row.  Uses only zero-concat padding, static row-slab slices and lane
    concatenation (robust Mosaic ops) — no reshapes, no scratch, no masked
    gathers.
    """
    h, wl = img.shape
    p = (ksize - 1) // 2
    zrow = jnp.zeros((p, wl), img.dtype)
    padded = jnp.concatenate([zrow, img, zrow], axis=0)          # (H+2p, W*cin)
    zcol = jnp.zeros((h + 2 * p, p * cin), img.dtype)
    padded = jnp.concatenate([zcol, padded, zcol], axis=1)       # (H+2p, (W+2p)*cin)
    slabs = [padded[kh:kh + h, :] for kh in range(ksize)]        # row-shifted slabs
    return jnp.concatenate(slabs, axis=1)                        # (H, ksize*(W+2p)*cin)


def _band_weight(w_hwio, W):
    """Expand HWIO conv weights into a banded (Toeplitz) matmul RHS.

    Returns (KH*(W+KW-1)*Cin, W*Cout) with row order (kh, w', ci) matching
    `_band_lhs` columns and column order (w, co) matching the kernel's flat
    (H, W*Cout) activation layout.  Pure one-time parameter layout prep.
    """
    KH, KW, Cin, Cout = w_hwio.shape
    Wp = W + KW - 1
    wp = jnp.arange(Wp)[:, None]               # padded column w'
    wo = jnp.arange(W)[None, :]                # output column w
    kw = wp - wo                               # (Wp, W) tap index
    valid = (kw >= 0) & (kw < KW)
    kw_c = jnp.clip(kw, 0, KW - 1)
    blk = w_hwio[:, kw_c, :, :]                # (KH, Wp, W, Cin, Cout)
    blk = jnp.where(valid[None, :, :, None, None], blk, 0.0)
    blk = blk.transpose(0, 1, 3, 2, 4)         # (KH, Wp, Cin, W, Cout)
    return blk.reshape(KH * Wp * Cin, W * Cout)


def _reorder_zr_cols(wmat, W, Hd):
    # Column order (w, co in [0,2Hd)) -> [z block: (w, co<Hd)] then [r block].
    K = wmat.shape[0]
    return wmat.reshape(K, W, 2, Hd).transpose(0, 2, 1, 3).reshape(K, 2 * W * Hd)


def _make_kernel(H, W, C, Hd):
    WHd = W * Hd

    def kernel(par_ref, par_rep_ref, x_ref,
               wzr_p_ref, wzr_x_ref, bzr_ref,
               wh_r_ref, wh_x_ref, bh_ref, o_ref):
        par = par_ref[...]            # (H, W)      f32
        par_rep = par_rep_ref[...]    # (H, W*Hd)   f32  (par repeated over Hd lanes)
        x = x_ref[0]                  # (H, W*C)    f32  (lane-dense NHWC rows)

        # ---- conv_zr(cat([par, x])): two banded bf16 matmuls, N = 2*W*Hd ----
        lhs_p = _band_lhs(par, 9, 1).astype(jnp.bfloat16)      # (H, 9*(W+8))
        lhs_x9 = _band_lhs(x, 9, C).astype(jnp.bfloat16)       # (H, 9*(W+8)*C)
        zr = (jnp.dot(lhs_p, wzr_p_ref[...], preferred_element_type=jnp.float32)
              + jnp.dot(lhs_x9, wzr_x_ref[...], preferred_element_type=jnp.float32)
              + bzr_ref[...])                                   # (H, 2*W*Hd) f32
        z = _sigmoid(zr[:, :WHd])                               # (H, W*Hd)
        r = _sigmoid(zr[:, WHd:])                               # (H, W*Hd)

        # ---- conv_h(cat([r*par, x])): two banded bf16 matmuls, N = W*Hd ----
        rp = r * par_rep                                        # (H, W*Hd) f32
        lhs_r = _band_lhs(rp, 3, Hd).astype(jnp.bfloat16)       # (H, 3*(W+2)*Hd)
        lhs_x3 = _band_lhs(x, 3, C).astype(jnp.bfloat16)        # (H, 3*(W+2)*C)
        h = jnp.tanh(jnp.dot(lhs_r, wh_r_ref[...], preferred_element_type=jnp.float32)
                     + jnp.dot(lhs_x3, wh_x_ref[...], preferred_element_type=jnp.float32)
                     + bh_ref[...])                             # (H, W*Hd) f32

        # ---- GRU-style gate, lane-dense layout, dense (unmasked) store ----
        o = (1.0 - z) * par_rep + z * h
        o_ref[0] = o.astype(o_ref.dtype)

    return kernel


def flatten_gru_pallas(x_nhwc, par_hw, wzr, bzr, wh, bh):
    """x_nhwc: (B,H,W,C); par_hw: (H,W); wzr: (9,9,C+1,2*Hd) HWIO; wh: (3,3,Hd+C,Hd)."""
    B, H, W, C = x_nhwc.shape
    Hd = wh.shape[-1]

    # -------- input / parameter layout prep (pure plumbing, outside kernel) ------
    x_flat = x_nhwc.reshape(B, H, W * C)                        # lane-dense x rows
    par_rep = jnp.repeat(par_hw, Hd, axis=1)                    # (H, W*Hd)

    wzr_p = _reorder_zr_cols(_band_weight(wzr[:, :, 0:1, :], W), W, Hd).astype(jnp.bfloat16)
    wzr_x = _reorder_zr_cols(_band_weight(wzr[:, :, 1:, :], W), W, Hd).astype(jnp.bfloat16)
    wh_r = _band_weight(wh[:, :, :Hd, :], W).astype(jnp.bfloat16)
    wh_x = _band_weight(wh[:, :, Hd:, :], W).astype(jnp.bfloat16)
    bzr_rep = jnp.concatenate([jnp.tile(bzr[:Hd], W),
                               jnp.tile(bzr[Hd:], W)]).reshape(1, 2 * W * Hd)
    bh_rep = jnp.tile(bh, W).reshape(1, W * Hd)

    kernel = _make_kernel(H, W, C, Hd)
    kzp, kzx = wzr_p.shape[0], wzr_x.shape[0]
    khr, khx = wh_r.shape[0], wh_x.shape[0]

    out_flat = pl.pallas_call(
        kernel,
        out_shape=jax.ShapeDtypeStruct((B, H, W * Hd), jnp.float32),
        grid_spec=pltpu.PrefetchScalarGridSpec(
            num_scalar_prefetch=0,
            grid=(B,),
            in_specs=[
                pl.BlockSpec((H, W), lambda b: (0, 0)),                 # par
                pl.BlockSpec((H, W * Hd), lambda b: (0, 0)),            # par_rep
                pl.BlockSpec((1, H, W * C), lambda b: (b, 0, 0)),       # x (lane-dense)
                pl.BlockSpec((kzp, 2 * W * Hd), lambda b: (0, 0)),      # conv_zr par band
                pl.BlockSpec((kzx, 2 * W * Hd), lambda b: (0, 0)),      # conv_zr x band
                pl.BlockSpec((1, 2 * W * Hd), lambda b: (0, 0)),        # bzr (blocked z|r)
                pl.BlockSpec((khr, W * Hd), lambda b: (0, 0)),          # conv_h r*par band
                pl.BlockSpec((khx, W * Hd), lambda b: (0, 0)),          # conv_h x band
                pl.BlockSpec((1, W * Hd), lambda b: (0, 0)),            # bh
            ],
            out_specs=pl.BlockSpec((1, H, W * Hd), lambda b: (b, 0, 0)),
        ),
        compiler_params=pltpu.CompilerParams(
            dimension_semantics=("parallel",),   # one batch element per TC on 2-core chips
            vmem_limit_bytes=32 * 1024 * 1024,
        ),
    )(par_hw, par_rep, x_flat, wzr_p, wzr_x, bzr_rep, wh_r, wh_x, bh_rep)

    return out_flat.reshape(B, H, W, Hd)                        # NHWC


def flatten_gru_ref(x_nhwc, par_hw, wzr, bzr, wh, bh):
    """Pure-JAX f32 reference (NHWC), mirroring the PyTorch forward exactly."""
    B, H, W, C = x_nhwc.shape
    Hd = wh.shape[-1]
    par = par_hw[None, :, :, None]                              # (1,H,W,1)
    par_b = jnp.broadcast_to(par, (B, H, W, 1))
    dn = ("NHWC", "HWIO", "NHWC")

    xx = jnp.concatenate([par_b, x_nhwc], axis=-1)
    zr = lax.conv_general_dilated(xx, wzr, (1, 1), "SAME",
                                  dimension_numbers=dn) + bzr[None, None, None, :]
    z = jax.nn.sigmoid(zr[..., :Hd])
    r = jax.nn.sigmoid(zr[..., Hd:])

    x2 = jnp.concatenate([r * par, x_nhwc], axis=-1)
    h = jnp.tanh(lax.conv_general_dilated(x2, wh, (1, 1), "SAME",
                                          dimension_numbers=dn)
                 + bh[None, None, None, :])
    return (1.0 - z) * par + z * h


if __name__ == "__main__":
    B, C, S, Hd = 2, 4, 16, 32   # batch, num_channels, spatial, hidden

    key = jax.random.PRNGKey(0)
    kx, kp, kw1, kb1, kw2, kb2 = jax.random.split(key, 6)

    # Input in PyTorch NCHW convention, then moved to NHWC for the kernel.
    x_nchw = jax.random.normal(kx, (B, C, S, S), jnp.float32)
    x_nhwc = jnp.transpose(x_nchw, (0, 2, 3, 1))

    # Parameters (module __init__ shapes; par spatial scaled to S, see header).
    par = jax.random.normal(kp, (1, 1, S, S), jnp.float32)            # nn.Parameter
    par_hw = par[0, 0]
    wzr = 0.05 * jax.random.normal(kw1, (9, 9, C + 1, 2 * Hd), jnp.float32)
    bzr = 0.05 * jax.random.normal(kb1, (2 * Hd,), jnp.float32)
    wh = 0.05 * jax.random.normal(kw2, (3, 3, Hd + C, Hd), jnp.float32)
    bh = 0.05 * jax.random.normal(kb2, (Hd,), jnp.float32)

    out_nhwc = flatten_gru_pallas(x_nhwc, par_hw, wzr, bzr, wh, bh)
    out_nhwc = jax.block_until_ready(out_nhwc)
    out_nchw = jnp.transpose(out_nhwc, (0, 3, 1, 2))   # PyTorch-shaped (B, Hd, S, S)

    ref_nhwc = flatten_gru_ref(x_nhwc, par_hw, wzr, bzr, wh, bh)
    # bf16 MXU operands (f32 accumulation): tolerance reflects bf16 input rounding
    # (observed error ~1e-2); the f32 reference is untouched.
    if not jnp.allclose(out_nhwc, ref_nhwc, atol=5e-2, rtol=5e-2):
        err = float(jnp.max(jnp.abs(out_nhwc - ref_nhwc)))
        raise AssertionError(
            f"Pallas FlattenGRU does not match JAX reference (max abs err {err})")

    assert out_nchw.shape == (B, Hd, S, S)
    print("KERNEL_OK")
</pallas_src>

<mosaic_0001>
module attributes {stable_mosaic.version = 11 : i64} {
  func.func @kernel(%arg0: i32, %arg1: memref<16x16xf32, #tpu.memory_space<vmem>>, %arg2: memref<16x512xf32, #tpu.memory_space<vmem>>, %arg3: memref<1x16x64xf32, #tpu.memory_space<vmem>>, %arg4: memref<216x1024xbf16, #tpu.memory_space<vmem>>, %arg5: memref<864x1024xbf16, #tpu.memory_space<vmem>>, %arg6: memref<1x1024xf32, #tpu.memory_space<vmem>>, %arg7: memref<1728x512xbf16, #tpu.memory_space<vmem>>, %arg8: memref<216x512xbf16, #tpu.memory_space<vmem>>, %arg9: memref<1x512xf32, #tpu.memory_space<vmem>>, %arg10: memref<1x16x512xf32, #tpu.memory_space<vmem>>) attributes {dimension_semantics = [#tpu.dimension_semantics<parallel>], iteration_bounds = array<i64: 2>, scalar_prefetch = 0 : i64, scratch_operands = 0 : i64, tpu.core_type = #tpu.core_type<tc>, window_params = [{pipeline_mode = #tpu.pipeline_mode<synchronous>, transform_indices = @transform_0, window_bounds = array<i64: 16, 16>}, {pipeline_mode = #tpu.pipeline_mode<synchronous>, transform_indices = @transform_1, window_bounds = array<i64: 16, 512>}, {transform_indices = @transform_2, window_bounds = array<i64: 1, 16, 64>}, {pipeline_mode = #tpu.pipeline_mode<synchronous>, transform_indices = @transform_3, window_bounds = array<i64: 216, 1024>}, {pipeline_mode = #tpu.pipeline_mode<synchronous>, transform_indices = @transform_4, window_bounds = array<i64: 864, 1024>}, {pipeline_mode = #tpu.pipeline_mode<synchronous>, transform_indices = @transform_5, window_bounds = array<i64: 1, 1024>}, {pipeline_mode = #tpu.pipeline_mode<synchronous>, transform_indices = @transform_6, window_bounds = array<i64: 1728, 512>}, {pipeline_mode = #tpu.pipeline_mode<synchronous>, transform_indices = @transform_7, window_bounds = array<i64: 216, 512>}, {pipeline_mode = #tpu.pipeline_mode<synchronous>, transform_indices = @transform_8, window_bounds = array<i64: 1, 512>}, {transform_indices = @transform_9, window_bounds = array<i64: 1, 16, 512>}]} {
    %c0 = arith.constant 0 : index
    %c0_0 = arith.constant 0 : index
    %0 = vector.load %arg1[%c0, %c0_0] : memref<16x16xf32, #tpu.memory_space<vmem>>, vector<16x16xf32>
    %c0_1 = arith.constant 0 : index
    %c0_2 = arith.constant 0 : index
    %1 = vector.load %arg2[%c0_1, %c0_2] : memref<16x512xf32, #tpu.memory_space<vmem>>, vector<16x512xf32>
    %c0_3 = arith.constant 0 : index
    %c0_4 = arith.constant 0 : index
    %c0_5 = arith.constant 0 : index
    %2 = vector.load %arg3[%c0_3, %c0_4, %c0_5] : memref<1x16x64xf32, #tpu.memory_space<vmem>>, vector<1x16x64xf32>
    %3 = vector.shape_cast %2 : vector<1x16x64xf32> to vector<16x64xf32>
    %cst = arith.constant 0.000000e+00 : f32
    %4 = vector.broadcast %cst : f32 to vector<4x16xf32>
    %5 = tpu.concatenate %4, %0, %4 in 0 : vector<4x16xf32>, vector<16x16xf32>, vector<4x16xf32> -> vector<24x16xf32>
    %cst_6 = arith.constant 0.000000e+00 : f32
    %6 = vector.broadcast %cst_6 : f32 to vector<24x4xf32>
    %7 = tpu.concatenate %6, %5, %6 in 1 : vector<24x4xf32>, vector<24x16xf32>, vector<24x4xf32> -> vector<24x24xf32>
    %8 = vector.extract_strided_slice %7 {offsets = [0, 0], sizes = [16, 24], strides = [1, 1]} : vector<24x24xf32> to vector<16x24xf32>
    %9 = vector.extract_strided_slice %7 {offsets = [1, 0], sizes = [16, 24], strides = [1, 1]} : vector<24x24xf32> to vector<16x24xf32>
    %10 = vector.extract_strided_slice %7 {offsets = [2, 0], sizes = [16, 24], strides = [1, 1]} : vector<24x24xf32> to vector<16x24xf32>
    %11 = vector.extract_strided_slice %7 {offsets = [3, 0], sizes = [16, 24], strides = [1, 1]} : vector<24x24xf32> to vector<16x24xf32>
    %12 = vector.extract_strided_slice %7 {offsets = [4, 0], sizes = [16, 24], strides = [1, 1]} : vector<24x24xf32> to vector<16x24xf32>
    %13 = vector.extract_strided_slice %7 {offsets = [5, 0], sizes = [16, 24], strides = [1, 1]} : vector<24x24xf32> to vector<16x24xf32>
    %14 = vector.extract_strided_slice %7 {offsets = [6, 0], sizes = [16, 24], strides = [1, 1]} : vector<24x24xf32> to vector<16x24xf32>
    %15 = vector.extract_strided_slice %7 {offsets = [7, 0], sizes = [16, 24], strides = [1, 1]} : vector<24x24xf32> to vector<16x24xf32>
    %16 = vector.extract_strided_slice %7 {offsets = [8, 0], sizes = [16, 24], strides = [1, 1]} : vector<24x24xf32> to vector<16x24xf32>
    %17 = tpu.concatenate %8, %9, %10, %11, %12, %13, %14, %15, %16 in 1 : vector<16x24xf32>, vector<16x24xf32>, vector<16x24xf32>, vector<16x24xf32>, vector<16x24xf32>, vector<16x24xf32>, vector<16x24xf32>, vector<16x24xf32>, vector<16x24xf32> -> vector<16x216xf32>
    %18 = arith.truncf %17 : vector<16x216xf32> to vector<16x216xbf16>
    %cst_7 = arith.constant 0.000000e+00 : f32
    %19 = vector.broadcast %cst_7 : f32 to vector<4x64xf32>
    %20 = tpu.concatenate %19, %3, %19 in 0 : vector<4x64xf32>, vector<16x64xf32>, vector<4x64xf32> -> vector<24x64xf32>
    %cst_8 = arith.constant 0.000000e+00 : f32
    %21 = vector.broadcast %cst_8 : f32 to vector<24x16xf32>
    %22 = tpu.concatenate %21, %20, %21 in 1 : vector<24x16xf32>, vector<24x64xf32>, vector<24x16xf32> -> vector<24x96xf32>
    %23 = vector.extract_strided_slice %22 {offsets = [0, 0], sizes = [16, 96], strides = [1, 1]} : vector<24x96xf32> to vector<16x96xf32>
    %24 = vector.extract_strided_slice %22 {offsets = [1, 0], sizes = [16, 96], strides = [1, 1]} : vector<24x96xf32> to vector<16x96xf32>
    %25 = vector.extract_strided_slice %22 {offsets = [2, 0], sizes = [16, 96], strides = [1, 1]} : vector<24x96xf32> to vector<16x96xf32>
    %26 = vector.extract_strided_slice %22 {offsets = [3, 0], sizes = [16, 96], strides = [1, 1]} : vector<24x96xf32> to vector<16x96xf32>
    %27 = vector.extract_strided_slice %22 {offsets = [4, 0], sizes = [16, 96], strides = [1, 1]} : vector<24x96xf32> to vector<16x96xf32>
    %28 = vector.extract_strided_slice %22 {offsets = [5, 0], sizes = [16, 96], strides = [1, 1]} : vector<24x96xf32> to vector<16x96xf32>
    %29 = vector.extract_strided_slice %22 {offsets = [6, 0], sizes = [16, 96], strides = [1, 1]} : vector<24x96xf32> to vector<16x96xf32>
    %30 = vector.extract_strided_slice %22 {offsets = [7, 0], sizes = [16, 96], strides = [1, 1]} : vector<24x96xf32> to vector<16x96xf32>
    %31 = vector.extract_strided_slice %22 {offsets = [8, 0], sizes = [16, 96], strides = [1, 1]} : vector<24x96xf32> to vector<16x96xf32>
    %32 = tpu.concatenate %23, %24, %25, %26, %27, %28, %29, %30, %31 in 1 : vector<16x96xf32>, vector<16x96xf32>, vector<16x96xf32>, vector<16x96xf32>, vector<16x96xf32>, vector<16x96xf32>, vector<16x96xf32>, vector<16x96xf32>, vector<16x96xf32> -> vector<16x864xf32>
    %33 = arith.truncf %32 : vector<16x864xf32> to vector<16x864xbf16>
    %c0_9 = arith.constant 0 : index
    %c0_10 = arith.constant 0 : index
    %34 = vector.load %arg4[%c0_9, %c0_10] : memref<216x1024xbf16, #tpu.memory_space<vmem>>, vector<216x1024xbf16>
    %cst_11 = arith.constant dense<0.000000e+00> : vector<16x1024xf32>
    %35 = tpu.matmul %18, %34, %cst_11 {dimension_numbers = #tpu.dot_dimension_numbers<[1], [0], [0], [1], [0, 0, 1, 1], [], []>} : vector<16x216xbf16>, vector<216x1024xbf16>, vector<16x1024xf32> -> vector<16x1024xf32>
    %c0_12 = arith.constant 0 : index
    %c0_13 = arith.constant 0 : index
    %36 = vector.load %arg5[%c0_12, %c0_13] : memref<864x1024xbf16, #tpu.memory_space<vmem>>, vector<864x1024xbf16>
    %cst_14 = arith.constant dense<0.000000e+00> : vector<16x1024xf32>
    %37 = tpu.matmul %33, %36, %cst_14 {dimension_numbers = #tpu.dot_dimension_numbers<[1], [0], [0], [1], [0, 0, 1, 1], [], []>} : vector<16x864xbf16>, vector<864x1024xbf16>, vector<16x1024xf32> -> vector<16x1024xf32>
    %38 = arith.addf %35, %37 : vector<16x1024xf32>
    %c0_15 = arith.constant 0 : index
    %c0_16 = arith.constant 0 : index
    %39 = vector.load %arg6[%c0_15, %c0_16] : memref<1x1024xf32, #tpu.memory_space<vmem>>, vector<1x1024xf32>
    %40 = vector.broadcast %39 : vector<1x1024xf32> to vector<16x1024xf32>
    %41 = arith.addf %38, %40 : vector<16x1024xf32>
    %42 = vector.extract_strided_slice %41 {offsets = [0, 0], sizes = [16, 512], strides = [1, 1]} : vector<16x1024xf32> to vector<16x512xf32>
    %cst_17 = arith.constant 5.000000e-01 : f32
    %43 = vector.broadcast %cst_17 : f32 to vector<16x512xf32>
    %44 = arith.mulf %43, %42 : vector<16x512xf32>
    %45 = math.tanh %44 : vector<16x512xf32>
    %cst_18 = arith.constant 1.000000e+00 : f32
    %46 = vector.broadcast %cst_18 : f32 to vector<16x512xf32>
    %47 = arith.addf %45, %46 : vector<16x512xf32>
    %cst_19 = arith.constant 5.000000e-01 : f32
    %48 = vector.broadcast %cst_19 : f32 to vector<16x512xf32>
    %49 = arith.mulf %48, %47 : vector<16x512xf32>
    %50 = vector.extract_strided_slice %41 {offsets = [0, 512], sizes = [16, 512], strides = [1, 1]} : vector<16x1024xf32> to vector<16x512xf32>
    %cst_20 = arith.constant 5.000000e-01 : f32
    %51 = vector.broadcast %cst_20 : f32 to vector<16x512xf32>
    %52 = arith.mulf %51, %50 : vector<16x512xf32>
    %53 = math.tanh %52 : vector<16x512xf32>
    %cst_21 = arith.constant 1.000000e+00 : f32
    %54 = vector.broadcast %cst_21 : f32 to vector<16x512xf32>
    %55 = arith.addf %53, %54 : vector<16x512xf32>
    %cst_22 = arith.constant 5.000000e-01 : f32
    %56 = vector.broadcast %cst_22 : f32 to vector<16x512xf32>
    %57 = arith.mulf %56, %55 : vector<16x512xf32>
    %58 = arith.mulf %57, %1 : vector<16x512xf32>
    %cst_23 = arith.constant 0.000000e+00 : f32
    %59 = vector.broadcast %cst_23 : f32 to vector<1x512xf32>
    %60 = tpu.concatenate %59, %58, %59 in 0 : vector<1x512xf32>, vector<16x512xf32>, vector<1x512xf32> -> vector<18x512xf32>
    %cst_24 = arith.constant 0.000000e+00 : f32
    %61 = vector.broadcast %cst_24 : f32 to vector<18x32xf32>
    %62 = tpu.concatenate %61, %60, %61 in 1 : vector<18x32xf32>, vector<18x512xf32>, vector<18x32xf32> -> vector<18x576xf32>
    %63 = vector.extract_strided_slice %62 {offsets = [0, 0], sizes = [16, 576], strides = [1, 1]} : vector<18x576xf32> to vector<16x576xf32>
    %64 = vector.extract_strided_slice %62 {offsets = [1, 0], sizes = [16, 576], strides = [1, 1]} : vector<18x576xf32> to vector<16x576xf32>
    %65 = vector.extract_strided_slice %62 {offsets = [2, 0], sizes = [16, 576], strides = [1, 1]} : vector<18x576xf32> to vector<16x576xf32>
    %66 = tpu.concatenate %63, %64, %65 in 1 : vector<16x576xf32>, vector<16x576xf32>, vector<16x576xf32> -> vector<16x1728xf32>
    %67 = arith.truncf %66 : vector<16x1728xf32> to vector<16x1728xbf16>
    %cst_25 = arith.constant 0.000000e+00 : f32
    %68 = vector.broadcast %cst_25 : f32 to vector<1x64xf32>
    %69 = tpu.concatenate %68, %3, %68 in 0 : vector<1x64xf32>, vector<16x64xf32>, vector<1x64xf32> -> vector<18x64xf32>
    %cst_26 = arith.constant 0.000000e+00 : f32
    %70 = vector.broadcast %cst_26 : f32 to vector<18x4xf32>
    %71 = tpu.concatenate %70, %69, %70 in 1 : vector<18x4xf32>, vector<18x64xf32>, vector<18x4xf32> -> vector<18x72xf32>
    %72 = vector.extract_strided_slice %71 {offsets = [0, 0], sizes = [16, 72], strides = [1, 1]} : vector<18x72xf32> to vector<16x72xf32>
    %73 = vector.extract_strided_slice %71 {offsets = [1, 0], sizes = [16, 72], strides = [1, 1]} : vector<18x72xf32> to vector<16x72xf32>
    %74 = vector.extract_strided_slice %71 {offsets = [2, 0], sizes = [16, 72], strides = [1, 1]} : vector<18x72xf32> to vector<16x72xf32>
    %75 = tpu.concatenate %72, %73, %74 in 1 : vector<16x72xf32>, vector<16x72xf32>, vector<16x72xf32> -> vector<16x216xf32>
    %76 = arith.truncf %75 : vector<16x216xf32> to vector<16x216xbf16>
    %c0_27 = arith.constant 0 : index
    %c0_28 = arith.constant 0 : index
    %77 = vector.load %arg7[%c0_27, %c0_28] : memref<1728x512xbf16, #tpu.memory_space<vmem>>, vector<1728x512xbf16>
    %cst_29 = arith.constant dense<0.000000e+00> : vector<16x512xf32>
    %78 = tpu.matmul %67, %77, %cst_29 {dimension_numbers = #tpu.dot_dimension_numbers<[1], [0], [0], [1], [0, 0, 1, 1], [], []>} : vector<16x1728xbf16>, vector<1728x512xbf16>, vector<16x512xf32> -> vector<16x512xf32>
    %c0_30 = arith.constant 0 : index
    %c0_31 = arith.constant 0 : index
    %79 = vector.load %arg8[%c0_30, %c0_31] : memref<216x512xbf16, #tpu.memory_space<vmem>>, vector<216x512xbf16>
    %cst_32 = arith.constant dense<0.000000e+00> : vector<16x512xf32>
    %80 = tpu.matmul %76, %79, %cst_32 {dimension_numbers = #tpu.dot_dimension_numbers<[1], [0], [0], [1], [0, 0, 1, 1], [], []>} : vector<16x216xbf16>, vector<216x512xbf16>, vector<16x512xf32> -> vector<16x512xf32>
    %81 = arith.addf %78, %80 : vector<16x512xf32>
    %c0_33 = arith.constant 0 : index
    %c0_34 = arith.constant 0 : index
    %82 = vector.load %arg9[%c0_33, %c0_34] : memref<1x512xf32, #tpu.memory_space<vmem>>, vector<1x512xf32>
    %83 = vector.broadcast %82 : vector<1x512xf32> to vector<16x512xf32>
    %84 = arith.addf %81, %83 : vector<16x512xf32>
    %85 = math.tanh %84 : vector<16x512xf32>
    %cst_35 = arith.constant 1.000000e+00 : f32
    %86 = vector.broadcast %cst_35 : f32 to vector<16x512xf32>
    %87 = arith.subf %86, %49 : vector<16x512xf32>
    %88 = arith.mulf %87, %1 : vector<16x512xf32>
    %89 = arith.mulf %49, %85 : vector<16x512xf32>
    %90 = arith.addf %88, %89 : vector<16x512xf32>
    %c0_36 = arith.constant 0 : index
    %c0_37 = arith.constant 0 : index
    %c0_38 = arith.constant 0 : index
    %91 = vector.load %arg10[%c0_36, %c0_37, %c0_38] : memref<1x16x512xf32, #tpu.memory_space<vmem>>, vector<1x16x512xf32>
    %92 = vector.shape_cast %91 : vector<1x16x512xf32> to vector<16x512xf32>
    %93 = vector.shape_cast %90 : vector<16x512xf32> to vector<1x16x512xf32>
    tpu.vector_store %arg10[%c0_36, %c0_37, %c0_38], %93 {strides = array<i32>} : memref<1x16x512xf32, #tpu.memory_space<vmem>>, vector<1x16x512xf32>,
    return
  }
  func.func @transform_0(%arg0: i32) -> (i32, i32) {
    %c0_i32 = arith.constant 0 : i32
    %c0_i32_0 = arith.constant 0 : i32
    %c0_i32_1 = arith.constant 0 : i32
    return %c0_i32, %c0_i32_0 : i32, i32
  }
  func.func @transform_1(%arg0: i32) -> (i32, i32) {
    %c0_i32 = arith.constant 0 : i32
    %c0_i32_0 = arith.constant 0 : i32
    %c0_i32_1 = arith.constant 0 : i32
    return %c0_i32, %c0_i32_0 : i32, i32
  }
  func.func @transform_2(%arg0: i32) -> (i32, i32, i32) {
    %c0_i32 = arith.constant 0 : i32
    %c0_i32_0 = arith.constant 0 : i32
    %c0_i32_1 = arith.constant 0 : i32
    return %arg0, %c0_i32, %c0_i32_0 : i32, i32, i32
  }
  func.func @transform_3(%arg0: i32) -> (i32, i32) {
    %c0_i32 = arith.constant 0 : i32
    %c0_i32_0 = arith.constant 0 : i32
    %c0_i32_1 = arith.constant 0 : i32
    return %c0_i32, %c0_i32_0 : i32, i32
  }
  func.func @transform_4(%arg0: i32) -> (i32, i32) {
    %c0_i32 = arith.constant 0 : i32
    %c0_i32_0 = arith.constant 0 : i32
    %c0_i32_1 = arith.constant 0 : i32
    return %c0_i32, %c0_i32_0 : i32, i32
  }
  func.func @transform_5(%arg0: i32) -> (i32, i32) {
    %c0_i32 = arith.constant 0 : i32
    %c0_i32_0 = arith.constant 0 : i32
    %c0_i32_1 = arith.constant 0 : i32
    return %c0_i32, %c0_i32_0 : i32, i32
  }
  func.func @transform_6(%arg0: i32) -> (i32, i32) {
    %c0_i32 = arith.constant 0 : i32
    %c0_i32_0 = arith.constant 0 : i32
    %c0_i32_1 = arith.constant 0 : i32
    return %c0_i32, %c0_i32_0 : i32, i32
  }
  func.func @transform_7(%arg0: i32) -> (i32, i32) {
    %c0_i32 = arith.constant 0 : i32
    %c0_i32_0 = arith.constant 0 : i32
    %c0_i32_1 = arith.constant 0 : i32
    return %c0_i32, %c0_i32_0 : i32, i32
  }
  func.func @transform_8(%arg0: i32) -> (i32, i32) {
    %c0_i32 = arith.constant 0 : i32
    %c0_i32_0 = arith.constant 0 : i32
    %c0_i32_1 = arith.constant 0 : i32
    return %c0_i32, %c0_i32_0 : i32, i32
  }
  func.func @transform_9(%arg0: i32) -> (i32, i32, i32) {
    %c0_i32 = arith.constant 0 : i32
    %c0_i32_0 = arith.constant 0 : i32
    %c0_i32_1 = arith.constant 0 : i32
    return %arg0, %c0_i32, %c0_i32_0 : i32, i32, i32
  }
}

</mosaic_0001>

<bundles_post_ra>
// kernel: tpu_custom_call.1
= control target key start
LH: loop header
LB: loop body
LE: loop exit
PB: predicated region body
PF: predicated region fallthrough
CT: control target
= control target key end

     0   :  { %s12964_s0 = inlined_call_operand.hbm [shape: f32[16,16], index: 0, kind: input, shape index: {}]   ;;  %s12965_s1 = inlined_call_operand.hbm [shape: f32[16,512], index: 1, kind: input, shape index: {}]   ;;  %s12966_s2 = inlined_call_operand.hbm [shape: f32[2,16,64], index: 2, kind: input, shape index: {}]   ;;  %s12967_s3 = inlined_call_operand.hbm [shape: bf16[216,1024], index: 3, kind: input, shape index: {}]   ;;  %s12968_s4 = inlined_call_operand.hbm [shape: bf16[864,1024], index: 4, kind: input, shape index: {}]   ;;  %s12969_s5 = inlined_call_operand.hbm [shape: f32[1,1024], index: 5, kind: input, shape index: {}]   ;;  %s12970_s6 = inlined_call_operand.hbm [shape: bf16[1728,512], index: 6, kind: input, shape index: {}]   ;;  %s12971_s7 = inlined_call_operand.hbm [shape: bf16[216,512], index: 7, kind: input, shape index: {}]   ;;  %s12972_s8 = inlined_call_operand.hbm [shape: f32[1,512], index: 8, kind: input, shape index: {}]   ;;  %s12973_s9 = inlined_call_operand.hbm [shape: f32[2,16,512], index: 9, kind: output, shape index: {}]  }
   0x1   :  { %12983 = sst [smem:[#allocation26_spill]] %s12973_s9 }
   0x2   :  { %14 = vsyncpa [#allocation3], 0 }
   0x3   :  { %15 = vsyncpa [#allocation6], 0 }
   0x4   :  { %16 = vsyncpa [#allocation10], 0 }
   0x5   :  { %17 = vsyncpa [#allocation13], 0 }
   0x6   :  { %18 = vsyncpa [#allocation16], 0 }
   0x7   :  { %19 = vsyncpa [#allocation4], 0 }
   0x8   :  { %21 = vsyncpa [#allocation4 + $0x1], 0  ;;  %s11858_s30 = smov 0   ;;  %s11860_s10 = smov 0  }
   0x9   :  { %s11862_s11 = smov 0   ;;  %s11864_s12 = smov 0  }
   0xa LB: > { %s11780_s13 = smov [#allocation2]   ;;  %s11879_s15 = sadd.s32 4294967295, %s11778_s12   ;;  %s11778_s12 = sphi %s11864_s12, %s13020_s12   ;;  %s11774_s11 = sphi %s11862_s11, %s13019_s11   ;;  %s11770_s10 = sphi %s11860_s10, %s13018_s10   ;;  %s11766_s30 = sphi %s11858_s30, %s13017_s30  }
   0xb   : > { %s264_s14 = sshll.u32 %s11780_s13, 4  ;;  %p9140_p0 = scmp.ge.s32.totalorder %s11778_s12, 1  ;;  %s11884_s14 = int_to_ptr.vmem [resolvable:$true] %s264_s14 }
   0xc   : > { %p12976_p1 = scmp.eq.s32.totalorder %s11879_s15, 0  ;;  %p252_p2 = scmp.lt.s32.totalorder %s11778_s12, 3 }
   0xd   : > { %s11781_s17 = smov [#allocation5]   ;;  %s11782_s20 = smov [#allocation9]  }
   0xe   : > { %p11886_p3 = pnand %p9140_p0, %p252_p2  ;;  %s277_s18 = sshll.u32 %s11781_s17, 4  ;;  %s11899_s18 = int_to_ptr.vmem [resolvable:$true] %s277_s18 }
   0xf   : > { %s11901_s21 = sshll.u32 %s11782_s20, 4  ;;  %s11434_s24 = scalar_lea.hbm %s12964_s0, 256  ;;  %s304_s21 = int_to_ptr.vmem [resolvable:$true] %s11901_s21 }
  0x10   : > { %s12984_s16 = scalar_select %p11886_p3, 1, 0 }
  0x11   : > { %p10387_p5 = pneg %p11886_p3  ;;  %p11435_p7 = scmp.ne.s32.totalorder %s12964_s0, %s11434_s24 }
  0x12   : > { %p11441_p11 = scmp.lt.u32.totalorder %s11434_s24, %s12964_s0 }
  0x13   : > { %p11895_p6 = pnand %p10387_p5, %p12976_p1 }
  0x15   : > { %p11911_p8 = pneg %p11895_p6 }
  0x17   : > { %p11437_p9 = pnand %p11911_p8, %p11435_p7 }
  0x19   : > { %p11438_p10 = pneg %p11437_p9 }
  0x1b   : > { %p11443_p12 = pnand %p11441_p11, %p11438_p10 }
  0x1d   : > { %11446 = shalt.err (!%p11443_p12)
}
  0x1e   : > { %s11447_s13 = scalar_lea.vmem %s11884_s14, 256  ;;  %p11455_p5 = scmp.lt.s32.totalorder %s11884_s14, %s11884_s14 }
  0x1f   : > { %p11448_p13 = scmp.ne.s32.totalorder %s11884_s14, %s11447_s13  ;;  %p11456_p4 = scmp.lt.s32.totalorder %s11447_s13, %s11447_s13 }
  0x21   : > { %p11450_p0 = pnand %p11448_p13, %p11911_p8  ;;  %p11457_p7 = por %p11456_p4, %p11455_p5 }
  0x23   : > { %p11451_p2 = pneg %p11450_p0 }
  0x25   : > { %p11458_p9 = pnand %p11457_p7, %p11451_p2 }
  0x27   : > { %11461 = shalt.err (!%p11458_p9)
}
  0x28   : > { %s12975_s17 = smov 128   ;;  %s12978_s20 = smov 8  }
  0x29   : > { %10390 = dma.hbm_to_vmem [thread:$0]  (!%p11895_p6), %s12964_s0, 256, %s11884_s14, [#allocation3], %s12975_s17, %s12975_s17, %s12978_s20  }
  0x2a   : > { %s11462_s26 = scalar_lea.hbm %s12965_s1, 1024 }
  0x2b   : > { %p11463_p4 = scmp.ne.s32.totalorder %s12965_s1, %s11462_s26  ;;  %p11469_p12 = scmp.lt.u32.totalorder %s11462_s26, %s12965_s1 }
  0x2d   : > { %p11465_p10 = pnand %p11463_p4, %p11911_p8 }
  0x2f   : > { %p11466_p11 = pneg %p11465_p10 }
  0x31   : > { %p11471_p13 = pnand %p11469_p12, %p11466_p11 }
  0x33   : > { %11474 = shalt.err (!%p11471_p13)
}
  0x34   : > { %s11475_s14 = scalar_lea.vmem %s11899_s18, 1024  ;;  %p11483_p7 = scmp.lt.s32.totalorder %s11899_s18, %s11899_s18 }
  0x35   : > { %p11476_p0 = scmp.ne.s32.totalorder %s11899_s18, %s11475_s14  ;;  %p11484_p9 = scmp.lt.s32.totalorder %s11475_s14, %s11475_s14 }
  0x37   : > { %p11478_p2 = pnand %p11476_p0, %p11911_p8  ;;  %p11485_p4 = por %p11484_p9, %p11483_p7 }
  0x39   : > { %p11479_p5 = pneg %p11478_p2 }
  0x3b   : > { %p11486_p10 = pnand %p11485_p4, %p11479_p5 }
  0x3d   : > { %11489 = shalt.err (!%p11486_p10)
}
  0x3e   : > { %s12979_s22 = smov 512   ;;  %s12980_s9 = smov 32  }
  0x3f   : > { %10393 = dma.hbm_to_vmem [thread:$0]  (!%p11895_p6), %s12965_s1, 1024, %s11899_s18, [#allocation6], %s12979_s22, %s12979_s22, %s12980_s9  }
  0x40   : > { %s11490_s28 = scalar_lea.hbm %s12968_s4, 55296 }
  0x41   : > { %p11491_p11 = scmp.ne.s32.totalorder %s12968_s4, %s11490_s28  ;;  %p11497_p0 = scmp.lt.u32.totalorder %s11490_s28, %s12968_s4 }
  0x43   : > { %p11493_p12 = pnand %p11491_p11, %p11911_p8 }
  0x45   : > { %p11494_p13 = pneg %p11493_p12 }
  0x47   : > { %p11499_p2 = pnand %p11497_p0, %p11494_p13 }
  0x49   : > { %11502 = shalt.err (!%p11499_p2)
}
  0x4a   : > { %s11503_s23 = scalar_lea.vmem %s304_s21, 55296  ;;  %p11511_p4 = scmp.lt.s32.totalorder %s304_s21, %s304_s21 }
  0x4b   : > { %p11504_p5 = scmp.ne.s32.totalorder %s304_s21, %s11503_s23  ;;  %p11512_p10 = scmp.lt.s32.totalorder %s11503_s23, %s11503_s23 }
  0x4d   : > { %p11506_p7 = pnand %p11504_p5, %p11911_p8  ;;  %p11513_p1 = por %p11512_p10, %p11511_p4 }
  0x4f   : > { %p11507_p9 = pneg %p11506_p7 }
  0x51   : > { %p11514_p3 = pnand %p11513_p1, %p11507_p9 }
  0x53   : > { %11517 = shalt.err (!%p11514_p3)
}
  0x54   : > { %10399 = dma.hbm_to_vmem [thread:$0]  (!%p11895_p6), %s12968_s4, 55296, %s304_s21, [#allocation10], %s12979_s22, %s12979_s22, %s12980_s9  }
  0x55   : > { %s11787_s24 = smov [#allocation12]   ;;  %s11518_s29 = scalar_lea.hbm %s12970_s6, 55296 }
  0x56   : > { %s327_s25 = sshll.u32 %s11787_s24, 4  ;;  %p11519_p1 = scmp.ne.s32.totalorder %s12970_s6, %s11518_s29  ;;  %s328_s25 = int_to_ptr.vmem [resolvable:$true] %s327_s25 }
  0x57   : > { %p11525_p12 = scmp.lt.u32.totalorder %s11518_s29, %s12970_s6 }
  0x58   : > { %p11521_p3 = pnand %p11519_p1, %p11911_p8 }
  0x5a   : > { %p11522_p11 = pneg %p11521_p3 }
  0x5c   : > { %p11527_p13 = pnand %p11525_p12, %p11522_p11 }
  0x5e   : > { %11530 = shalt.err (!%p11527_p13)
}
  0x5f   : > { %s11531_s21 = scalar_lea.vmem %s328_s25, 55296  ;;  %p11539_p7 = scmp.lt.s32.totalorder %s328_s25, %s328_s25 }
  0x60   : > { %p11532_p0 = scmp.ne.s32.totalorder %s328_s25, %s11531_s21  ;;  %p11540_p9 = scmp.lt.s32.totalorder %s11531_s21, %s11531_s21 }
  0x62   : > { %p11534_p2 = pnand %p11532_p0, %p11911_p8  ;;  %p11541_p4 = por %p11540_p9, %p11539_p7 }
  0x64   : > { %p11535_p5 = pneg %p11534_p2 }
  0x66   : > { %p11542_p10 = pnand %p11541_p4, %p11535_p5 }
  0x68   : > { %11545 = shalt.err (!%p11542_p10)
}
  0x69   : > { %s12981_s18 = smov 256   ;;  %s11789_s17 = smov 16  }
  0x6a   : > { %10405 = dma.hbm_to_vmem [thread:$0]  (!%p11895_p6), %s12970_s6, 55296, %s328_s25, [#allocation13], %s12981_s18, %s12981_s18, %s11789_s17  }
  0x6b   : > { %s11790_s26 = smov [#allocation8]   ;;  %s11791_s29 = smov [#allocation11]  }
  0x6c   : > { %s290_s28 = sshll.u32 %s11790_s26, 4  ;;  %s317_s13 = sshll.u32 %s11791_s29, 4  ;;  %s291_s28 = int_to_ptr.vmem [resolvable:$true] %s290_s28  ;;  %s12004_s13 = int_to_ptr.vmem [resolvable:$true] %s317_s13 }
  0x6d   : > { %s11546_s21 = scalar_lea.hbm %s12967_s3, 13824 }
  0x6e   : > { %p11547_p1 = scmp.ne.s32.totalorder %s12967_s3, %s11546_s21  ;;  %p11553_p12 = scmp.lt.u32.totalorder %s11546_s21, %s12967_s3 }
  0x70   : > { %p11549_p3 = pnand %p11547_p1, %p11911_p8 }
  0x72   : > { %p11550_p11 = pneg %p11549_p3 }
  0x74   : > { %p11555_p13 = pnand %p11553_p12, %p11550_p11 }
  0x76   : > { %11558 = shalt.err (!%p11555_p13)
}
  0x77   : > { %s11559_s24 = scalar_lea.vmem %s291_s28, 13824  ;;  %p11567_p7 = scmp.lt.s32.totalorder %s291_s28, %s291_s28 }
  0x78   : > { %p11560_p0 = scmp.ne.s32.totalorder %s291_s28, %s11559_s24  ;;  %p11568_p9 = scmp.lt.s32.totalorder %s11559_s24, %s11559_s24 }
  0x7a   : > { %p11562_p2 = pnand %p11560_p0, %p11911_p8  ;;  %p11569_p4 = por %p11568_p9, %p11567_p7 }
  0x7c   : > { %p11563_p5 = pneg %p11562_p2 }
  0x7e   : > { %p11570_p10 = pnand %p11569_p4, %p11563_p5 }
  0x80   : > { %11573 = shalt.err (!%p11570_p10)
}
  0x81   : > { %s12987_s22 = smov 32   ;;  %s12988_s9 = smov 512  }
  0x82   : > { %10396 = dma.hbm_to_vmem [thread:$0]  (!%p11895_p6), %s12967_s3, 13824, %s291_s28, [#allocation6], %s12988_s9, %s12988_s9, %s12987_s22  }
  0x83   : > { %s11574_s21 = scalar_lea.hbm %s12969_s5, 128 }
  0x84   : > { %p11575_p1 = scmp.ne.s32.totalorder %s12969_s5, %s11574_s21  ;;  %p11581_p12 = scmp.lt.u32.totalorder %s11574_s21, %s12969_s5 }
  0x86   : > { %p11577_p3 = pnand %p11575_p1, %p11911_p8 }
  0x88   : > { %p11578_p11 = pneg %p11577_p3 }
  0x8a   : > { %p11583_p13 = pnand %p11581_p12, %p11578_p11 }
  0x8c   : > { %11586 = shalt.err (!%p11583_p13)
}
  0x8d   : > { %s11587_s28 = scalar_lea.vmem %s12004_s13, 128  ;;  %p11595_p7 = scmp.lt.s32.totalorder %s12004_s13, %s12004_s13 }
  0x8e   : > { %p11588_p0 = scmp.ne.s32.totalorder %s12004_s13, %s11587_s28  ;;  %p11596_p9 = scmp.lt.s32.totalorder %s11587_s28, %s11587_s28 }
  0x90   : > { %p11590_p2 = pnand %p11588_p0, %p11911_p8  ;;  %p11597_p4 = por %p11596_p9, %p11595_p7 }
  0x92   : > { %p11591_p5 = pneg %p11590_p2 }
  0x94   : > { %p11598_p10 = pnand %p11597_p4, %p11591_p5 }
  0x96   : > { %11601 = shalt.err (!%p11598_p10)
}
  0x97   : > { %10402 = dma.hbm_to_vmem [thread:$0]  (!%p11895_p6), %s12969_s5, 128, %s12004_s13, [#allocation10]  }
  0x98   : > { %s11792_s9 = smov [#allocation14]   ;;  %s11793_s29 = smov [#allocation15]  }
  0x99   : > { %s340_s26 = sshll.u32 %s11792_s9, 4  ;;  %s354_s14 = sshll.u32 %s11793_s29, 4  ;;  %s341_s26 = int_to_ptr.vmem [resolvable:$true] %s340_s26  ;;  %s12050_s14 = int_to_ptr.vmem [resolvable:$true] %s354_s14 }
  0x9a   : > { %s11602_s20 = scalar_lea.hbm %s12971_s7, 6912 }
  0x9b   : > { %p11603_p1 = scmp.ne.s32.totalorder %s12971_s7, %s11602_s20  ;;  %p11609_p12 = scmp.lt.u32.totalorder %s11602_s20, %s12971_s7 }
  0x9d   : > { %p11605_p3 = pnand %p11603_p1, %p11911_p8 }
  0x9f   : > { %p11606_p11 = pneg %p11605_p3 }
  0xa1   : > { %p11611_p13 = pnand %p11609_p12, %p11606_p11 }
  0xa3   : > { %11614 = shalt.err (!%p11611_p13)
}
  0xa4   : > { %s11615_s18 = scalar_lea.vmem %s341_s26, 6912  ;;  %p11623_p7 = scmp.lt.s32.totalorder %s341_s26, %s341_s26 }
  0xa5   : > { %p11616_p0 = scmp.ne.s32.totalorder %s341_s26, %s11615_s18  ;;  %p11624_p9 = scmp.lt.s32.totalorder %s11615_s18, %s11615_s18 }
  0xa7   : > { %p11618_p2 = pnand %p11616_p0, %p11911_p8  ;;  %p11625_p4 = por %p11624_p9, %p11623_p7 }
  0xa9   : > { %p11619_p5 = pneg %p11618_p2 }
  0xab   : > { %p11626_p10 = pnand %p11625_p4, %p11619_p5 }
  0xad   : > { %11629 = shalt.err (!%p11626_p10)
}
  0xae   : > { %s12989_s22 = smov 256   ;;  %s11630_s20 = scalar_lea.hbm %s12972_s8, 64 }
  0xaf   : > { %10408 = dma.hbm_to_vmem [thread:$0]  (!%p11895_p6), %s12971_s7, 6912, %s341_s26, [#allocation13], %s12989_s22, %s12989_s22, %s11789_s17  }
  0xb0   : > { %p11631_p1 = scmp.ne.s32.totalorder %s12972_s8, %s11630_s20  ;;  %p11637_p12 = scmp.lt.u32.totalorder %s11630_s20, %s12972_s8 }
  0xb2   : > { %p11633_p3 = pnand %p11631_p1, %p11911_p8 }
  0xb4   : > { %p11634_p11 = pneg %p11633_p3 }
  0xb6   : > { %p11639_p13 = pnand %p11637_p12, %p11634_p11 }
  0xb8   : > { %11642 = shalt.err (!%p11639_p13)
}
  0xb9   : > { %s11643_s17 = scalar_lea.vmem %s12050_s14, 64  ;;  %p11651_p7 = scmp.lt.s32.totalorder %s12050_s14, %s12050_s14 }
  0xba   : > { %p11644_p0 = scmp.ne.s32.totalorder %s12050_s14, %s11643_s17  ;;  %p11652_p9 = scmp.lt.s32.totalorder %s11643_s17, %s11643_s17 }
  0xbc   : > { %p11646_p2 = pnand %p11644_p0, %p11911_p8  ;;  %p11653_p4 = por %p11652_p9, %p11651_p7 }
  0xbe   : > { %p11647_p5 = pneg %p11646_p2 }
  0xc0   : > { %p11654_p10 = pnand %p11653_p4, %p11647_p5 }
  0xc2   : > { %11657 = shalt.err (!%p11654_p10)
}
  0xc3   : > { %10411 = dma.hbm_to_vmem [thread:$0]  (!%p11895_p6), %s12972_s8, 64, %s12050_s14, [#allocation16]  }
  0xc4   : > { %s9139_s19 = sadd.s32 4294967294, %s11778_s12   ;;  %s12098_s27 = sadd.s32 1, %s11778_s12  }
  0xc5   : > { %s73_s22 = ssub.s32 %s11778_s12, %s12098_s27  ;;  %s76_s9 = sadd.s32 1, %s11774_s11 }
  0xc6   : > { %p74_p8 = scmp.eq.s32.totalorder %s73_s22, 0  ;;  %p83_p1 = scmp.ne.s32.totalorder %s11774_s11, %s11770_s10 }
  0xc7   : > { %p84_p3 = scmp.eq.s32.totalorder %s11778_s12, 0  ;;  %p89_p11 = scmp.ne.s32.totalorder %s11770_s10, %s11766_s30 }
  0xc8   : > { %s12109_s29 = scalar_select %p74_p8, %s11774_s11, %s76_s9  }
  0xc9   : > { %p12111_p12 = por %p84_p3, %p83_p1  ;;  %p12991_p13 = scmp.eq.s32.totalorder %s11879_s15, 0 }
  0xca   : > { %p239_p0 = scmp.eq.s32.totalorder %s11879_s15, 1  ;;  %p245_p2 = scmp.eq.s32.totalorder %s9139_s19, 1 }
  0xcb   : > { %p12117_p6 = por %p12991_p13, %p89_p11  ;;  %p10428_p5 = scmp.lt.s32.totalorder %s11778_s12, 2 }
  0xcc   : > { %s365_s21 = sand.u32 1, %s11778_s12   ;;  %p12124_p7 = por %p239_p0, %p83_p1 }
  0xcd   : > { %p12128_p9 = por %p245_p2, %p89_p11  ;;  %s367_s24 = sand.u32 1, %s11774_s11  }
  0xce   : > { %s12993_s20 = scalar_select %p12124_p7, 1, 0 }
  0xcf   : > { %s12994_s25 = scalar_select %p12128_p9, 1, 0 }
  0xd0   : > { %s9150_s28 = sshll.u32 %s367_s24, 4  ;;  %s10229_s13 = sshll.u32 %s11778_s12, 8 }
  0xd1   : > { %s12137_s18 = scalar_lea.hbm %s12966_s2, %s10229_s13  ;;  %s369_s19 = scalar_lea.vmem [#allocation7], %s9150_s28 }
  0xd2   : > { %s376_s22 = sshll.u32 %s369_s19, 4  ;;  %p12141_p4 = pnand %p10428_p5, %p12111_p12  ;;  %s12145_s22 = int_to_ptr.vmem [resolvable:$true] %s376_s22 }
  0xd3   : > { %s12147_s24 = scalar_lea.sflag [#allocation3], %s365_s21  ;;  %s11658_s17 = scalar_lea.hbm %s12137_s18, 256 }
  0xd4   : > { %p11659_p10 = scmp.ne.s32.totalorder %s12137_s18, %s11658_s17  ;;  %p11660_p8 = pneg %p12141_p4 }
  0xd5   : > { %s11663_s13 = scalar_lea.hbm %s12966_s2, 512  ;;  %p11664_p11 = scmp.lt.u32.totalorder %s12137_s18, %s12966_s2 }
  0xd6   : > { %p11661_p1 = pnand %p11660_p8, %p11659_p10  ;;  %p11665_p12 = scmp.lt.u32.totalorder %s11663_s13, %s11658_s17 }
  0xd7   : > { %p11667_p0 = scmp.lt.u32.totalorder %s11658_s17, %s12137_s18 }
  0xd8   : > { %p11662_p3 = pneg %p11661_p1  ;;  %p11666_p13 = por %p11665_p12, %p11664_p11 }
  0xda   : > { %p11668_p2 = por %p11667_p0, %p11666_p13 }
  0xdc   : > { %p11669_p5 = pnand %p11668_p2, %p11662_p3 }
  0xde   : > { %11672 = shalt.err (!%p11669_p5)
}
  0xdf   : > { %s11673_s21 = scalar_lea.vmem %s12145_s22, 256  ;;  %s11794_s28 = smov [#allocation7]  }
  0xe0   : > { %p11674_p10 = scmp.ne.s32.totalorder %s12145_s22, %s11673_s21  ;;  %s11678_s23 = sshll.u32 %s11794_s28, 4  ;;  %s11679_s23 = int_to_ptr.vmem [resolvable:$false] %s11678_s23 }
  0xe1   : > { %s11680_s26 = scalar_lea.vmem %s11679_s23, 512  ;;  %p11681_p7 = scmp.lt.s32.totalorder %s12145_s22, %s11679_s23 }
  0xe2   : > { %p11676_p1 = pnand %p11674_p10, %p11660_p8  ;;  %p11682_p11 = scmp.lt.s32.totalorder %s11680_s26, %s11673_s21 }
  0xe4   : > { %p11677_p9 = pneg %p11676_p1  ;;  %p11683_p12 = por %p11682_p11, %p11681_p7 }
  0xe6   : > { %p11684_p13 = pnand %p11683_p12, %p11677_p9 }
  0xe8   : > { %11687 = shalt.err (!%p11684_p13)
}
  0xe9   : > { %s12996_s17 = smov 8   ;;  %s12997_s13 = smov 128  }
  0xea   : > { %10415 = dma.hbm_to_vmem [thread:$0]  (!%p12141_p4), %s12137_s18, 256, %s12145_s22, %s12147_s24, %s12997_s13, %s12997_s13, %s12996_s17  }
  0xeb   : > { %p12998_p8 = scmp.ne.s32.totalorder %s12984_s16, 0 }
  0xec   : > { %p12999_p3 = scmp.eq.s32.totalorder (!%p12998_p8), %s11879_s15, 0 }
  0xed   : > { %388 = sbr.rel (%p12998_p8) target bundleno = 2046 (0x7fe), region = 56 }
  0xf4   : > { %11733 = dma.done.wait (%p12999_p3), [#allocation3], 256   ;;  %p13000_p0 = pmov %p12999_p3 }
  0xf6   : > { %11735 = vsyncadd (%p13000_p0), [#allocation3], 4294967040  ;;  %p13001_p7 = pmov %p13000_p0 }
  0xf7   : > { %p13002_p9 = pmov %p13000_p0 }
  0xf8   : > { %11737 = dma.done.wait (%p13001_p7), [#allocation6], 1024  }
  0xf9   : > { %11739 = vsyncadd (%p13002_p9), [#allocation6], 4294966272  ;;  %s398_s9 = sand.u32 1, %s11879_s15   ;;  %s12190_s18 = sand.u32 1, %s11770_s10  }
  0xfa   : > { %s9156_s16 = sshll.u32 %s12190_s18, 4  ;;  %s399_s22 = scalar_lea.sflag [#allocation3], %s398_s9 }
  0xfb   : > { %s12193_s24 = scalar_lea.vmem [#allocation7], %s9156_s16 }
  0xfc   : > { %11741 = dma.done.wait (%p12117_p6), %s399_s22, 256  }
  0xfd   : > { %11743 = vsyncadd (%p12117_p6), %s399_s22, 4294967040  ;;  %p13003_p4 = pmov %p13000_p0 }
  0xfe   : > { %p13004_p2 = pmov %p13000_p0 }
  0xff   : > { %11745 = dma.done.wait (%p13003_p4), [#allocation6], 13824  }
 0x100   : > { %11747 = vsyncadd (%p13004_p2), [#allocation6], 4294953472  ;;  %p13005_p5 = pmov %p13000_p0 }
 0x101   : > { %p13006_p10 = pmov %p13000_p0 }
 0x102   : > { %11749 = dma.done.wait (%p13005_p5), [#allocation10], 55424  }
 0x103   : > { %11751 = vsyncadd (%p13006_p10), [#allocation10], 4294911872  ;;  %p13007_p1 = pmov %p13000_p0 }
 0x104   : > { %p13008_p11 = pmov %p13000_p0 }
 0x105   : > { %11753 = dma.done.wait (%p13007_p1), [#allocation13], 62208  }
 0x106   : > { %11755 = vsyncadd (%p13008_p11), [#allocation13], 4294905088  ;;  %p13009_p6 = pmov %p13000_p0 }
 0x107   : > { %p13010_p12 = pmov %p13000_p0 }
 0x108   : > { %11757 = dma.done.wait (%p13009_p6), [#allocation16], 64  }
 0x109   : > { %11759 = vsyncadd (%p13010_p12), [#allocation16], 4294967232  ;;  %v472_v0 = vld [vmem:[%s12193_s24] sm:$0xff]  ;;  %v473_v1 = vld [vmem:[%s12193_s24 + $0x8] sm:$0xff]  ;;  %vm476_vm0 = vcmask 1043456   ;;  %s11795_s14 = smov 16  }
 0x10a   : > { %v623_v2 = vrot.slane %v472_v0, 4  ;;  %v624_v3 = vrot.slane %v473_v1, 4  ;;  %v852_v8 = vld [vmem:[#allocation9] sm:$0xff]  ;;  %v853_v10 = vld [vmem:[#allocation9 + $0x8] sm:$0xff]  ;;  %vm610_vm1 = vcmask 130048   ;;  %vm644_vm2 = vcmask 654336  }
 0x10b   : > { %v856_v9 = vld [vmem:[#allocation9 + $0x20] sm:$0xff]  ;;  %v857_v12 = vld [vmem:[#allocation9 + $0x28] sm:$0xff]  ;;  %vm553_vm3 = vcmask 1042432   ;;  %vm506_vm4 = vcmask 1046528   ;;  %vm565_vm5 = vcmask 1041408   ;;  %vm518_vm6 = vcmask 1045504  }
 0x10c   : > { %v625_v4 = vsel %vm476_vm0, %v623_v2, %v624_v3  ;;  %v628_v5 = vsel %vm476_vm0, 0.0, %v623_v2  ;;  %v629_v7 = vsel %vm476_vm0, %v624_v3, 0.0  ;;  %v9165_v11 = vcombine.high %v852_v8, %v856_v9  ;;  %v860_v14 = vld [vmem:[#allocation9 + $0x40] sm:$0xff]  ;;  %v861_v19 = vld [vmem:[#allocation9 + $0x48] sm:$0xff]  ;;  %s11796_s19 = smov 96   ;;  %s11797_s21 = smov 64  }
 0x10d   : > { %v10496_v6 = vpack.i.bf16 %v625_v4, %v628_v5  ;;  %v9164_v13 = vcombine.low %v852_v8, %v856_v9  ;;  %v864_v15 = vld [vmem:[#allocation9 + $0x60] sm:$0xff]  ;;  %v9167_v16 = vcombine.high %v853_v10, %v857_v12  ;;  %v9166_v17 = vcombine.low %v853_v10, %v857_v12  ;;  %v865_v20 = vld [vmem:[#allocation9 + $0x68] sm:$0xff]  ;;  %s11798_s28 = smov 32   ;;  %s11799_s23 = smov 4  }
 0x10e   : > { %v9173_v18 = vcombine.high %v860_v14, %v864_v15  ;;  %v868_v21 = vld [vmem:[#allocation9 + $0x80] sm:$0xff]  ;;  %3447 = vmatprep.subr.bf16.mxu0 %v9165_v11  ;;  %v9175_v22 = vcombine.high %v861_v19, %v865_v20  ;;  %v869_v24 = vld [vmem:[#allocation9 + $0x88] sm:$0xff]  ;;  %v9172_v26 = vcombine.low %v860_v14, %v864_v15  ;;  %v9174_v27 = vcombine.low %v861_v19, %v865_v20  ;;  %s11800_s26 = smov 24   ;;  %s11801_s17 = smov 120  }
 0x10f   : > { %10497 = vrot.lane.b32.xlu0 %v10496_v6, %s11795_s14  ;;  %v872_v23 = vld [vmem:[#allocation9 + $0xa0] sm:$0xff]  ;;  %v873_v25 = vld [vmem:[#allocation9 + $0xa8] sm:$0xff]  ;;  %3619 = vmatprep.subr.bf16.mxu1 %v9167_v16  ;;  %vm530_vm7 = vcmask 1044480   ;;  %vm577_vm8 = vcmask 1040384   ;;  %vm604_vm9 = vcmask 785408   ;;  %vm616_vm10 = vcmask 523264  }
 0x110   : > { %3448 = vmatpush1.bf16.msra.mxu0 %v9164_v13  ;;  %3620 = vmatpush1.bf16.msra.mxu1 %v9166_v17  ;;  %v9181_v28 = vcombine.high %v868_v21, %v872_v23  ;;  %v9183_v29 = vcombine.high %v869_v24, %v873_v25  ;;  %v876_v30 = vld [vmem:[#allocation9 + $0xc0] sm:$0xff]  ;;  %v877_v32 = vld [vmem:[#allocation9 + $0xc8] sm:$0xff]  ;;  %v9180_v34 = vcombine.low %v868_v21, %v872_v23  ;;  %vm728_vm11 = vcmask 261120   ;;  %s11802_s13 = smov 72   ;;  %s11803_s9 = smov 48  }
 0x111   : > { %3449 = vmatprep.subr.bf16.mxu0 %v9173_v18  ;;  %3621 = vmatprep.subr.bf16.mxu1 %v9175_v22  ;;  %v880_v31 = vld [vmem:[#allocation9 + $0xe0] sm:$0xff]  ;;  %v881_v33 = vld [vmem:[#allocation9 + $0xe8] sm:$0xff]  ;;  %v9182_v35 = vcombine.low %v869_v24, %v873_v25  ;;  %vm495_vm12 = vcmask 31744   ;;  %vm499_vm13 = vcmask 162816   ;;  %s11805_s16 = smov 40   ;;  %vm613_vm14 = vcmask 326656  }
 0x112   : > { %v9189_v36 = vcombine.high %v876_v30, %v880_v31  ;;  %v9191_v37 = vcombine.high %v877_v32, %v881_v33  ;;  %v884_v38 = vld [vmem:[#allocation9 + $0x100] sm:$0xff]  ;;  %v885_v40 = vld [vmem:[#allocation9 + $0x108] sm:$0xff]  ;;  %v9188_v42 = vcombine.low %v876_v30, %v880_v31  ;;  %v9190_v43 = vcombine.low %v877_v32, %v881_v33  ;;  %s9163_s22 = sshll.u32 %s12190_s18, 6  ;;  %p13014_p8 = scmp.ne.s32.totalorder %s12993_s20, 0 }
 0x113   : > { %636 = vrot.lane.b32.xlu0 %v629_v7, %s11795_s14  ;;  %v888_v39 = vld [vmem:[#allocation9 + $0x120] sm:$0xff]  ;;  %v889_v41 = vld [vmem:[#allocation9 + $0x128] sm:$0xff]  ;;  %vm4675_vm15 = vcmask 719872  }
 0x114   : > { %3450 = vmatpush1.bf16.msra.mxu0 %v9172_v26  ;;  %3622 = vmatpush1.bf16.msra.mxu1 %v9174_v27  ;;  %v9197_v44 = vcombine.high %v884_v38, %v888_v39  ;;  %v9199_v45 = vcombine.high %v885_v40, %v889_v41  ;;  %v892_v46 = vld [vmem:[#allocation9 + $0x140] sm:$0xff]  ;;  %v893_v48 = vld [vmem:[#allocation9 + $0x148] sm:$0xff]  ;;  %v9196_v50 = vcombine.low %v884_v38, %v888_v39 }
 0x115   : > { %3451 = vmatprep.subr.bf16.mxu0 %v9181_v28  ;;  %3623 = vmatprep.subr.bf16.mxu1 %v9183_v29  ;;  %v896_v47 = vld [vmem:[#allocation9 + $0x160] sm:$0xff]  ;;  %v897_v49 = vld [vmem:[#allocation9 + $0x168] sm:$0xff]  ;;  %v9198_v51 = vcombine.low %v885_v40, %v889_v41 }
 0x116   : > { %v9205_v52 = vcombine.high %v892_v46, %v896_v47  ;;  %v900_v53 = vld [vmem:[#allocation9 + $0x180] sm:$0xff]  ;;  %v9207_v55 = vcombine.high %v893_v48, %v897_v49  ;;  %v901_v56 = vld [vmem:[#allocation9 + $0x188] sm:$0xff]  ;;  %v9204_v58 = vcombine.low %v892_v46, %v896_v47  ;;  %v9206_v61 = vcombine.low %v893_v48, %v897_v49 }
 0x117   : > { %v904_v54 = vld [vmem:[#allocation9 + $0x1a0] sm:$0xff]  ;;  %v905_v57 = vld [vmem:[#allocation9 + $0x1a8] sm:$0xff] }
 0x118   : > { %3452 = vmatpush1.bf16.msra.mxu0 %v9180_v34  ;;  %3624 = vmatpush1.bf16.msra.mxu1 %v9182_v35  ;;  %v908_v59 = vld [vmem:[#allocation9 + $0x1c0] sm:$0xff]  ;;  %v9213_v62 = vcombine.high %v900_v53, %v904_v54  ;;  %v909_v63 = vld [vmem:[#allocation9 + $0x1c8] sm:$0xff]  ;;  %v9215_v1 = vcombine.high %v901_v56, %v905_v57  ;;  %v9212_v2 = vcombine.low %v900_v53, %v904_v54 }
 0x119   : > { %3453 = vmatprep.subr.bf16.mxu0 %v9189_v36  ;;  %3625 = vmatprep.subr.bf16.mxu1 %v9191_v37  ;;  %v912_v60 = vld [vmem:[#allocation9 + $0x1e0] sm:$0xff]  ;;  %v913_v0 = vld [vmem:[#allocation9 + $0x1e8] sm:$0xff]  ;;  %v9214_v5 = vcombine.low %v901_v56, %v905_v57 }
 0x11a   : > { %v916_v3 = vld [vmem:[#allocation9 + $0x200] sm:$0xff]  ;;  %v9221_v6 = vcombine.high %v908_v59, %v912_v60  ;;  %v917_v7 = vld [vmem:[#allocation9 + $0x208] sm:$0xff]  ;;  %v9223_v9 = vcombine.high %v909_v63, %v913_v0  ;;  %v9220_v10 = vcombine.low %v908_v59, %v912_v60  ;;  %v9222_v13 = vcombine.low %v909_v63, %v913_v0 }
 0x11b   : > { %v920_v4 = vld [vmem:[#allocation9 + $0x220] sm:$0xff]  ;;  %v921_v8 = vld [vmem:[#allocation9 + $0x228] sm:$0xff] }
 0x11c   : > { %3454 = vmatpush1.bf16.msra.mxu0 %v9188_v42  ;;  %3626 = vmatpush1.bf16.msra.mxu1 %v9190_v43  ;;  %v924_v11 = vld [vmem:[#allocation9 + $0x240] sm:$0xff]  ;;  %v9229_v14 = vcombine.high %v916_v3, %v920_v4  ;;  %v925_v15 = vld [vmem:[#allocation9 + $0x248] sm:$0xff]  ;;  %v9231_v17 = vcombine.high %v917_v7, %v921_v8  ;;  %v9228_v18 = vcombine.low %v916_v3, %v920_v4 }
 0x11d   : > { %3455 = vmatprep.subr.bf16.mxu0 %v9197_v44  ;;  %3627 = vmatprep.subr.bf16.mxu1 %v9199_v45  ;;  %v928_v12 = vld [vmem:[#allocation9 + $0x260] sm:$0xff]  ;;  %v929_v16 = vld [vmem:[#allocation9 + $0x268] sm:$0xff]  ;;  %v9230_v21 = vcombine.low %v917_v7, %v921_v8 }
 0x11e   : > { %v932_v19 = vld [vmem:[#allocation9 + $0x280] sm:$0xff]  ;;  %v9237_v22 = vcombine.high %v924_v11, %v928_v12  ;;  %v933_v23 = vld [vmem:[#allocation9 + $0x288] sm:$0xff]  ;;  %v9239_v25 = vcombine.high %v925_v15, %v929_v16  ;;  %v9236_v26 = vcombine.low %v924_v11, %v928_v12  ;;  %v9238_v29 = vcombine.low %v925_v15, %v929_v16 }
 0x11f   : > { %v936_v20 = vld [vmem:[#allocation9 + $0x2a0] sm:$0xff]  ;;  %v937_v24 = vld [vmem:[#allocation9 + $0x2a8] sm:$0xff] }
 0x120   : > { %3456 = vmatpush1.bf16.msra.mxu0 %v9196_v50  ;;  %3628 = vmatpush1.bf16.msra.mxu1 %v9198_v51  ;;  %v940_v27 = vld [vmem:[#allocation9 + $0x2c0] sm:$0xff]  ;;  %v9245_v30 = vcombine.high %v932_v19, %v936_v20  ;;  %v941_v31 = vld [vmem:[#allocation9 + $0x2c8] sm:$0xff]  ;;  %v9247_v33 = vcombine.high %v933_v23, %v937_v24  ;;  %v9244_v34 = vcombine.low %v932_v19, %v936_v20 }
 0x121   : > { %3457 = vmatprep.subr.bf16.mxu0 %v9205_v52  ;;  %3629 = vmatprep.subr.bf16.mxu1 %v9207_v55  ;;  %v944_v28 = vld [vmem:[#allocation9 + $0x2e0] sm:$0xff]  ;;  %v945_v32 = vld [vmem:[#allocation9 + $0x2e8] sm:$0xff]  ;;  %v9246_v37 = vcombine.low %v933_v23, %v937_v24 }
 0x122   : > { %v948_v35 = vld [vmem:[#allocation9 + $0x300] sm:$0xff]  ;;  %v9253_v38 = vcombine.high %v940_v27, %v944_v28  ;;  %v949_v39 = vld [vmem:[#allocation9 + $0x308] sm:$0xff]  ;;  %v9255_v41 = vcombine.high %v941_v31, %v945_v32  ;;  %v9252_v42 = vcombine.low %v940_v27, %v944_v28  ;;  %v9254_v45 = vcombine.low %v941_v31, %v945_v32 }
 0x123   : > { %v952_v36 = vld [vmem:[#allocation9 + $0x320] sm:$0xff]  ;;  %v953_v40 = vld [vmem:[#allocation9 + $0x328] sm:$0xff] }
 0x124   : > { %3458 = vmatpush1.bf16.msra.mxu0 %v9204_v58  ;;  %3630 = vmatpush1.bf16.msra.mxu1 %v9206_v61  ;;  %v956_v43 = vld [vmem:[#allocation9 + $0x340] sm:$0xff]  ;;  %v9261_v46 = vcombine.high %v948_v35, %v952_v36  ;;  %v957_v47 = vld [vmem:[#allocation9 + $0x348] sm:$0xff]  ;;  %v9263_v49 = vcombine.high %v949_v39, %v953_v40  ;;  %v9260_v50 = vcombine.low %v948_v35, %v952_v36 }
 0x125   : > { %3459 = vmatprep.subr.bf16.mxu0 %v9213_v62  ;;  %3631 = vmatprep.subr.bf16.mxu1 %v9215_v1  ;;  %v960_v44 = vld [vmem:[#allocation9 + $0x360] sm:$0xff]  ;;  %v961_v48 = vld [vmem:[#allocation9 + $0x368] sm:$0xff]  ;;  %v9262_v51 = vcombine.low %v949_v39, %v953_v40 }
 0x126   : > { %v9269_v52 = vcombine.high %v956_v43, %v960_v44  ;;  %v9271_v53 = vcombine.high %v957_v47, %v961_v48  ;;  %v9268_v54 = vcombine.low %v956_v43, %v960_v44  ;;  %v9270_v55 = vcombine.low %v957_v47, %v961_v48  ;;  %v964_v59 = vld [vmem:[#allocation9 + $0x380] sm:$0xff]  ;;  %v965_v61 = vld [vmem:[#allocation9 + $0x388] sm:$0xff] }
 0x127   : > { %v968_v60 = vld [vmem:[#allocation9 + $0x3a0] sm:$0xff]  ;;  %v969_v1 = vld [vmem:[#allocation9 + $0x3a8] sm:$0xff] }
 0x128   : > { %3460 = vmatpush1.bf16.msra.mxu0 %v9212_v2  ;;  %3632 = vmatpush1.bf16.msra.mxu1 %v9214_v5  ;;  %v9277_v0 = vcombine.high %v964_v59, %v968_v60  ;;  %v9276_v2 = vcombine.low %v964_v59, %v968_v60  ;;  %v9278_v7 = vcombine.low %v965_v61, %v969_v1  ;;  %v972_v28 = vld [vmem:[#allocation9 + $0x3c0] sm:$0xff]  ;;  %v12263_v43 = vld [vmem:[#allocation9 + $0x408] sm:$0xff] }
 0x129   : > { %3461 = vmatprep.subr.bf16.mxu0 %v9221_v6  ;;  %3633 = vmatprep.subr.bf16.mxu1 %v9223_v9  ;;  %v9279_v6 = vcombine.high %v965_v61, %v969_v1  ;;  %v12265_v44 = vld [vmem:[#allocation9 + $0x428] sm:$0xff] }
 0x12c   : > { %3462 = vmatpush1.bf16.msra.mxu0 %v9220_v10  ;;  %3634 = vmatpush1.bf16.msra.mxu1 %v9222_v13 }
 0x12d   : > { %3463 = vmatprep.subr.bf16.mxu0 %v9229_v14  ;;  %3635 = vmatprep.subr.bf16.mxu1 %v9231_v17 }
 0x130   : > { %3464 = vmatpush1.bf16.msra.mxu0 %v9228_v18  ;;  %3636 = vmatpush1.bf16.msra.mxu1 %v9230_v21 }
 0x131   : > { %3465 = vmatprep.subr.bf16.mxu0 %v9237_v22  ;;  %3637 = vmatprep.subr.bf16.mxu1 %v9239_v25 }
 0x134   : > { %3466 = vmatpush1.bf16.msra.mxu0 %v9236_v26  ;;  %3638 = vmatpush1.bf16.msra.mxu1 %v9238_v29  ;;  %v976_v29 = vld [vmem:[#allocation9 + $0x3e0] sm:$0xff] }
 0x135   : > { %3467 = vmatprep.subr.bf16.mxu0 %v9245_v30  ;;  %3639 = vmatprep.subr.bf16.mxu1 %v9247_v33  ;;  %v973_v30 = vld [vmem:[#allocation9 + $0x3c8] sm:$0xff]  ;;  %v9285_v47 = vcombine.high %v972_v28, %v976_v29 }
 0x138   : > { %3468 = vmatpush1.bf16.msra.mxu0 %v9244_v34  ;;  %3640 = vmatpush1.bf16.msra.mxu1 %v9246_v37  ;;  %v977_v34 = vld [vmem:[#allocation9 + $0x3e8] sm:$0xff]  ;;  %v12257_v37 = vld [vmem:[#allocation9 + $0x400] sm:$0xff] }
 0x139   : > { %3469 = vmatprep.subr.bf16.mxu0 %v9253_v38  ;;  %3641 = vmatprep.subr.bf16.mxu1 %v9255_v41  ;;  %v9287_v48 = vcombine.high %v973_v30, %v977_v34 }
 0x13c   : > { %3470 = vmatpush1.bf16.msra.mxu0 %v9252_v42  ;;  %3642 = vmatpush1.bf16.msra.mxu1 %v9254_v45  ;;  %v12261_v42 = vld [vmem:[#allocation9 + $0x420] sm:$0xff] }
 0x13d   : > { %3471 = vmatprep.subr.bf16.mxu0 %v9261_v46  ;;  %3643 = vmatprep.subr.bf16.mxu1 %v9263_v49 }
 0x140   : > { %3472 = vmatpush1.bf16.msra.mxu0 %v9260_v50  ;;  %3644 = vmatpush1.bf16.msra.mxu1 %v9262_v51  ;;  %v9284_v51 = vcombine.low %v972_v28, %v976_v29  ;;  %v988_v28 = vld [vmem:[#allocation9 + $0x440] sm:$0xff] }
 0x141   : > { %3473 = vmatprep.subr.bf16.mxu0 %v9269_v52  ;;  %3645 = vmatprep.subr.bf16.mxu1 %v9271_v53  ;;  %v9286_v52 = vcombine.low %v973_v30, %v977_v34  ;;  %v989_v34 = vld [vmem:[#allocation9 + $0x448] sm:$0xff] }
 0x144   : > { %3474 = vmatpush1.bf16.msra.mxu0 %v9268_v54  ;;  %3646 = vmatpush1.bf16.msra.mxu1 %v9270_v55  ;;  %v9292_v54 = vcombine.low %v12257_v37, %v12261_v42  ;;  %v9293_v55 = vcombine.high %v12257_v37, %v12261_v42 }
 0x145   : > { %3475 = vmatprep.subr.bf16.mxu0 %v9277_v0  ;;  %3647 = vmatprep.subr.bf16.mxu1 %v9279_v6 }
 0x148   : > { %3476 = vmatpush1.bf16.msra.mxu0 %v9276_v2  ;;  %3648 = vmatpush1.bf16.msra.mxu1 %v9278_v7 }
 0x149   : > { %3477 = vmatprep.subr.bf16.mxu0 %v9285_v47  ;;  %3649 = vmatprep.subr.bf16.mxu1 %v9287_v48  ;;  %v996_v47 = vld [vmem:[#allocation9 + $0x480] sm:$0xff] }
 0x14c   : > { %3478 = vmatpush1.bf16.msra.mxu0 %v9284_v51  ;;  %3650 = vmatpush1.bf16.msra.mxu1 %v9286_v52  ;;  %v997_v51 = vld [vmem:[#allocation9 + $0x488] sm:$0xff] }
 0x14d   : > { %3490 = vmatprep.subr.bf16.mxu0 %v9293_v55  ;;  %v1001_v52 = vld [vmem:[#allocation9 + $0x4a8] sm:$0xff] }
 0x14e   : > { %v9310_v42 = vcombine.low %v997_v51, %v1001_v52 }
 0x181   : > { %v10498_v56 = vpop.permute.xlu0 %10497 }
 0x182   : > { %v10500_v57 = vunpack.i.h.bf16 %v10498_v56  ;;  %v10499_v58 = vunpack.i.l.bf16 %v10498_v56  ;;  %v9294_v56 = vcombine.low %v12263_v43, %v12265_v44 }
 0x184   : > { %v642_v62 = vsel %vm610_vm1, 0.0, %v10500_v57  ;;  %v641_v63 = vsel %vm610_vm1, 0.0, %v10499_v58  ;;  %v9295_v58 = vcombine.high %v12263_v43, %v12265_v44 }
 0x185   : > { %v637_v3 = vpop.permute.xlu0 %636  ;;  %v12225_v4 = vsel %vm644_vm2, %v641_v63, 0.0  ;;  %v12228_v5 = vsel %vm644_vm2, %v642_v62, 0.0  ;;  %v462_v62 = vld [vmem:[#allocation2] sm:$0xff]  ;;  %v463_v63 = vld [vmem:[#allocation2 + $0x8] sm:$0xff] }
 0x186   : > { %v643_v8 = vsel %vm610_vm1, 0.0, %v637_v3  ;;  %v691_v9 = vrot.slane %v12225_v4, 5  ;;  %v692_v10 = vrot.slane %v12228_v5, 5  ;;  %v651_v11 = vrot.slane %v12225_v4, 1  ;;  %3662 = vmatprep.subr.bf16.mxu1 %v9295_v58 }
 0x187   : > { %v12235_v12 = vsel %vm644_vm2, %v643_v8, 0.0  ;;  %v652_v13 = vrot.slane %v12228_v5, 1  ;;  %v702_v16 = vrot.slane %v12225_v4, 6  ;;  %v703_v20 = vrot.slane %v12228_v5, 6 }
 0x188   : > { %v694_v14 = vrot.slane %v12235_v12, 5  ;;  %v654_v15 = vrot.slane %v12235_v12, 1  ;;  %v705_v17 = vrot.slane %v12235_v12, 6  ;;  %v693_v18 = vsel %vm553_vm3, %v691_v9, %v692_v10 }
 0x189   : > { %v653_v19 = vsel %vm506_vm4, %v651_v11, %v652_v13  ;;  %v662_v21 = vrot.slane %v12225_v4, 2  ;;  %v663_v24 = vrot.slane %v12228_v5, 2  ;;  %v665_v25 = vrot.slane %v12235_v12, 2 }
 0x18a   : > { %v695_v22 = vsel %vm553_vm3, %v692_v10, %v694_v14  ;;  %v655_v23 = vsel %vm506_vm4, %v652_v13, %v654_v15  ;;  %v706_v31 = vsel %vm565_vm5, %v703_v20, %v705_v17  ;;  %v676_v33 = vrot.slane %v12235_v12, 3 }
 0x18b   : > { %v10511_v26 = vpack.i.bf16 %v695_v22, %v693_v18  ;;  %v10501_v27 = vpack.i.bf16 %v655_v23, %v653_v19  ;;  %v666_v32 = vsel %vm518_vm6, %v663_v24, %v665_v25  ;;  %v673_v35 = vrot.slane %v12225_v4, 3 }
 0x18c   : > { %v674_v36 = vrot.slane %v12228_v5, 3  ;;  %v704_v38 = vsel %vm565_vm5, %v702_v16, %v703_v20  ;;  %v664_v39 = vsel %vm518_vm6, %v662_v21, %v663_v24  ;;  %v716_v46 = vrot.slane %v12235_v12, 7 }
 0x18d   : > { %10512 = vrot.lane.b32.xlu0 %v10511_v26, %s11796_s19  ;;  %10502 = vrot.lane.b32.xlu1 %v10501_v27, %s11796_s19  ;;  %v10521_v40 = vpack.i.bf16 %v706_v31, %v704_v38  ;;  %v10506_v41 = vpack.i.bf16 %v666_v32, %v664_v39  ;;  %v713_v50 = vrot.slane %v12225_v4, 7  ;;  %v714_v53 = vrot.slane %v12228_v5, 7 }
 0x18e   : > { %v677_v45 = vsel %vm530_vm7, %v674_v36, %v676_v33  ;;  %v675_v49 = vsel %vm530_vm7, %v673_v35, %v674_v36  ;;  %v477_v0 = vrot.slane %v462_v62, 4  ;;  %v478_v1 = vrot.slane %v463_v63, 4  ;;  %v992_v33 = vld [vmem:[#allocation9 + $0x460] sm:$0xff]  ;;  %v993_v35 = vld [vmem:[#allocation9 + $0x468] sm:$0xff] }
 0x18f   : > { %v10516_v57 = vpack.i.bf16 %v677_v45, %v675_v49  ;;  %v717_v59 = vsel %vm577_vm8, %v714_v53, %v716_v46  ;;  %v715_v60 = vsel %vm577_vm8, %v713_v50, %v714_v53  ;;  %v687_v8 = vrot.slane %v12235_v12, 4  ;;  %v1000_v50 = vld [vmem:[#allocation9 + $0x4a0] sm:$0xff] }
 0x190   : > { %v10526_v61 = vpack.i.bf16 %v717_v59, %v715_v60  ;;  %v479_v2 = vsel %vm476_vm0, %v477_v0, %v478_v1  ;;  %v482_v3 = vsel %vm476_vm0, 0.0, %v477_v0  ;;  %v483_v6 = vsel %vm476_vm0, %v478_v1, 0.0  ;;  %v1004_v63 = vld [vmem:[#allocation9 + $0x4c0] sm:$0xff]  ;;  %v1005_v1 = vld [vmem:[#allocation9 + $0x4c8] sm:$0xff] }
 0x191   : > { %10522 = vrot.lane.b32.xlu0 %v10521_v40, %s11797_s21  ;;  %10507 = vrot.lane.b32.xlu1 %v10506_v41, %s11797_s21  ;;  %v10531_v7 = vpack.i.bf16 %v479_v2, %v482_v3  ;;  %v685_v11 = vrot.slane %v12228_v5, 4  ;;  %v684_v13 = vrot.slane %v12225_v4, 4  ;;  %v9301_v48 = vcombine.high %v988_v28, %v992_v33  ;;  %v1008_v0 = vld [vmem:[#allocation9 + $0x4e0] sm:$0xff]  ;;  %v1009_v2 = vld [vmem:[#allocation9 + $0x4e8] sm:$0xff] }
 0x192   : > { %v9303_v49 = vcombine.high %v989_v34, %v993_v35  ;;  %v9300_v59 = vcombine.low %v988_v28, %v992_v33  ;;  %v9302_v60 = vcombine.low %v989_v34, %v993_v35  ;;  %v9311_v62 = vcombine.high %v997_v51, %v1001_v52  ;;  %v1013_v3 = vld [vmem:[#allocation9 + $0x508] sm:$0xff] }
 0x193   : > { %v688_v16 = vsel %vm476_vm0, %v685_v11, %v687_v8  ;;  %v686_v25 = vsel %vm476_vm0, %v684_v13, %v685_v11  ;;  %v9308_v37 = vcombine.low %v996_v47, %v1000_v50  ;;  %v9317_v43 = vcombine.high %v1004_v63, %v1008_v0  ;;  %v1020_v11 = vld [vmem:[#allocation9 + $0x540] sm:$0xff]  ;;  %v1037_v33 = vld [vmem:[#allocation9 + $0x5c8] sm:$0xff] }
 0x194   : > { %v9319_v44 = vcombine.high %v1005_v1, %v1009_v2  ;;  %v9318_v8 = vcombine.low %v1005_v1, %v1009_v2  ;;  %v1024_v13 = vld [vmem:[#allocation9 + $0x560] sm:$0xff]  ;;  %v1041_v34 = vld [vmem:[#allocation9 + $0x5e8] sm:$0xff]  ;;  %vm595_vm2 = vcmask 195584  }
 0x195   : > { %10517 = vrot.lane.b32.xlu1 %v10516_v57, %s11798_s28  ;;  %10532 = vrot.lane.b32.xlu0 %v10531_v7, %s11799_s23  ;;  %v9316_v7 = vcombine.low %v1004_v63, %v1008_v0  ;;  %v9350_v51 = vcombine.low %v1037_v33, %v1041_v34 }
 0x199   : > { %10527 = vrot.lane.b32.xlu1 %v10526_v61, %s11798_s28  ;;  %v9309_v61 = vcombine.high %v996_v47, %v1000_v50  ;;  %v1048_v47 = vld [vmem:[#allocation9 + $0x620] sm:$0xff] }
 0x19d   : > { %490 = vrot.lane.b32.xlu1 %v483_v6, %s11799_s23  ;;  %v1017_v6 = vld [vmem:[#allocation9 + $0x528] sm:$0xff] }
 0x1ff   : > { %v10513_v9 = vpop.permute.xlu0 %10512  ;;  %v10503_v10 = vpop.permute.xlu1 %10502 }
 0x200   : > { %v10505_v14 = vunpack.i.h.bf16 %v10503_v10  ;;  %v10504_v15 = vunpack.i.l.bf16 %v10503_v10  ;;  %v10515_v17 = vunpack.i.h.bf16 %v10513_v9  ;;  %v10514_v18 = vunpack.i.l.bf16 %v10513_v9 }
 0x201   : > { %v9327_v10 = vcombine.high %v1013_v3, %v1017_v6 }
 0x202   : > { %v725_v26 = vsel %vm604_vm9, %v12228_v5, %v10505_v14  ;;  %v724_v27 = vsel %vm604_vm9, %v12225_v4, %v10504_v15  ;;  %v732_v36 = vsel %vm604_vm9, %v688_v16, %v10515_v17  ;;  %v731_v4 = vsel %vm604_vm9, %v686_v25, %v10514_v18  ;;  %v1029_v25 = vld [vmem:[#allocation9 + $0x588] sm:$0xff] }
 0x203   : > { %v12295_v19 = vpop.permute.xlu0 %10522  ;;  %v10508_v20 = vpop.permute.xlu1 %10507  ;;  %v12318_v41 = vpack.c.bf16 %v725_v26, %v724_v27  ;;  %v12322_v53 = vpack.c.bf16 %v732_v36, %v731_v4  ;;  %v1033_v26 = vld [vmem:[#allocation9 + $0x5a8] sm:$0xff]  ;;  %v9332_v27 = vcombine.low %v1020_v11, %v1024_v13 }
 0x204   : > { %v10525_v21 = vunpack.i.h.bf16 %v12295_v19  ;;  %v10524_v22 = vunpack.i.l.bf16 %v12295_v19  ;;  %v10510_v23 = vunpack.i.h.bf16 %v10508_v20  ;;  %v10509_v24 = vunpack.i.l.bf16 %v10508_v20  ;;  %v1125_v19 = vld [vmem:[#allocation9 + $0x888] sm:$0xff] }
 0x205   : > { %v9342_v36 = vcombine.low %v1029_v25, %v1033_v26 }
 0x206   : > { %v733_v29 = vsel %vm616_vm10, %v10514_v18, %v10524_v22  ;;  %v734_v30 = vsel %vm616_vm10, %v10515_v17, %v10525_v21  ;;  %v726_v31 = vsel %vm616_vm10, %v10504_v15, %v10509_v24  ;;  %v727_v32 = vsel %vm616_vm10, %v10505_v14, %v10510_v23  ;;  %v1021_v14 = vld [vmem:[#allocation9 + $0x548] sm:$0xff] }
 0x207   : > { %v12314_v38 = vpack.c.bf16 %v734_v30, %v733_v29  ;;  %v12316_v39 = vpack.c.bf16 %v727_v32, %v726_v31  ;;  %v10518_v40 = vpop.permute.xlu1 %10517  ;;  %v1025_v15 = vld [vmem:[#allocation9 + $0x568] sm:$0xff]  ;;  %v9326_v17 = vcombine.low %v1013_v3, %v1017_v6  ;;  %v9333_v18 = vcombine.high %v1020_v11, %v1024_v13  ;;  %v1036_v31 = vld [vmem:[#allocation9 + $0x5c0] sm:$0xff]  ;;  %v10533_v2 = vpop.permute.xlu0 %10532 }
 0x208   : > { %v10520_v45 = vunpack.i.h.bf16 %v10518_v40  ;;  %v10519_v46 = vunpack.i.l.bf16 %v10518_v40  ;;  %v9335_v20 = vcombine.high %v1021_v14, %v1025_v15  ;;  %v9334_v28 = vcombine.low %v1021_v14, %v1025_v15  ;;  %v1040_v32 = vld [vmem:[#allocation9 + $0x5e0] sm:$0xff]  ;;  %v1061_v3 = vld [vmem:[#allocation9 + $0x688] sm:$0xff] }
 0x209   : > { %3479 = vmatprep.mubr.bf16.mxu0 %v12316_v39  ;;  %3651 = vmatprep.mubr.bf16.mxu1 %v12316_v39  ;;  %v9343_v30 = vcombine.high %v1029_v25, %v1033_v26  ;;  %v9349_v4 = vcombine.high %v1036_v31, %v1040_v32  ;;  %v9351_v40 = vcombine.high %v1037_v33, %v1041_v34  ;;  %v1065_v6 = vld [vmem:[#allocation9 + $0x6a8] sm:$0xff] }
 0x20a   : > { %v729_v55 = vsel %vm728_vm11, %v10509_v24, %v10519_v46  ;;  %v730_v57 = vsel %vm728_vm11, %v10510_v23, %v10520_v45  ;;  %3480 = vmatmul.mubr.bf16.vlgmr.msra.gmra.mrb[0].mxu0 %v12318_v41  ;;  %3652 = vmatmul.mubr.bf16.vlgmr.msra.gmra.mrb[0].mxu1 %v12318_v41  ;;  %v1028_v23 = vld [vmem:[#allocation9 + $0x580] sm:$0xff]  ;;  %v9348_v50 = vcombine.low %v1036_v31, %v1040_v32  ;;  %v1069_v25 = vld [vmem:[#allocation9 + $0x6c8] sm:$0xff] }
 0x20b   : > { %v12328_v58 = vpack.c.bf16 %v730_v57, %v729_v55  ;;  %3491 = vmatpush1.bf16.msra.mxu0 %v9292_v54  ;;  %3663 = vmatpush1.bf16.msra.mxu1 %v9294_v56  ;;  %v1012_v54 = vld [vmem:[#allocation9 + $0x500] sm:$0xff]  ;;  %v12338_v46 = vpop.permute.xlu1 %10527  ;;  %v1073_v26 = vld [vmem:[#allocation9 + $0x6e8] sm:$0xff] }
 0x20c   : > { %3522 = vmatprep.mubr.bf16.mxu0 %v12322_v53  ;;  %3694 = vmatprep.mubr.bf16.mxu1 %v12322_v53  ;;  %v1016_v56 = vld [vmem:[#allocation9 + $0x520] sm:$0xff]  ;;  %v9383_v34 = vcombine.high %v1069_v25, %v1073_v26 }
 0x20d   : > { %3492 = vmatprep.subr.bf16.mxu0 %v9301_v48  ;;  %3664 = vmatprep.subr.bf16.mxu1 %v9303_v49  ;;  %v9325_v9 = vcombine.high %v1012_v54, %v1016_v56  ;;  %v9324_v16 = vcombine.low %v1012_v54, %v1016_v56  ;;  %v1032_v24 = vld [vmem:[#allocation9 + $0x5a0] sm:$0xff]  ;;  %v1045_v48 = vld [vmem:[#allocation9 + $0x608] sm:$0xff]  ;;  %v10535_v54 = vunpack.i.h.bf16 %v10533_v2  ;;  %v10534_v56 = vunpack.i.l.bf16 %v10533_v2 }
 0x20e   : > { %v9341_v29 = vcombine.high %v1028_v23, %v1032_v24  ;;  %v9340_v35 = vcombine.low %v1028_v23, %v1032_v24  ;;  %v1044_v45 = vld [vmem:[#allocation9 + $0x600] sm:$0xff]  ;;  %v1049_v49 = vld [vmem:[#allocation9 + $0x628] sm:$0xff] }
 0x20f   : > { %3493 = vmatpush1.bf16.msra.mxu0 %v9300_v59  ;;  %3665 = vmatpush1.bf16.msra.mxu1 %v9302_v60  ;;  %v9357_v52 = vcombine.high %v1044_v45, %v1048_v47  ;;  %v9359_v55 = vcombine.high %v1045_v48, %v1049_v49  ;;  %v1052_v57 = vld [vmem:[#allocation9 + $0x640] sm:$0xff]  ;;  %v1053_v60 = vld [vmem:[#allocation9 + $0x648] sm:$0xff]  ;;  %v9356_v0 = vcombine.low %v1044_v45, %v1048_v47 }
 0x210   : > { %3494 = vmatprep.subr.bf16.mxu0 %v9309_v61  ;;  %3666 = vmatprep.subr.bf16.mxu1 %v9311_v62  ;;  %v1056_v59 = vld [vmem:[#allocation9 + $0x660] sm:$0xff]  ;;  %v1057_v61 = vld [vmem:[#allocation9 + $0x668] sm:$0xff]  ;;  %v491_v62 = vpop.permute.xlu1 %490  ;;  %v9358_v1 = vcombine.low %v1045_v48, %v1049_v49  ;;  %v9382_v49 = vcombine.low %v1069_v25, %v1073_v26 }
 0x211   : > { %v498_v63 = vsel %vm495_vm12, 0.0, %v491_v62  ;;  %v9366_v11 = vcombine.low %v1053_v60, %v1057_v61  ;;  %v1076_v32 = vld [vmem:[#allocation9 + $0x700] sm:$0xff]  ;;  %v1089_v2 = vld [vmem:[#allocation9 + $0x768] sm:$0xff] }
 0x213   : > { %3495 = vmatpush1.bf16.msra.mxu0 %v9308_v37  ;;  %3667 = vmatpush1.bf16.msra.mxu1 %v9310_v42  ;;  %v9365_v37 = vcombine.high %v1052_v57, %v1056_v59  ;;  %v9367_v42 = vcombine.high %v1053_v60, %v1057_v61 }
 0x214   : > { %3496 = vmatprep.subr.bf16.mxu0 %v9317_v43  ;;  %3668 = vmatprep.subr.bf16.mxu1 %v9319_v44  ;;  %v1060_v43 = vld [vmem:[#allocation9 + $0x680] sm:$0xff] }
 0x215   : > { %v1064_v44 = vld [vmem:[#allocation9 + $0x6a0] sm:$0xff] }
 0x216   : > { %v9373_v13 = vcombine.high %v1060_v43, %v1064_v44 }
 0x217   : > { %3497 = vmatpush1.bf16.msra.mxu0 %v9316_v7  ;;  %3669 = vmatpush1.bf16.msra.mxu1 %v9318_v8  ;;  %v12342_v7 = vsel %vm499_vm13, %v498_v63, 0.0  ;;  %v9364_v8 = vcombine.low %v1052_v57, %v1056_v59  ;;  %v1084_v59 = vld [vmem:[#allocation9 + $0x740] sm:$0xff] }
 0x218   : > { %3498 = vmatprep.subr.bf16.mxu0 %v9325_v9  ;;  %3670 = vmatprep.subr.bf16.mxu1 %v9327_v10  ;;  %v497_v9 = vsel %vm495_vm12, 0.0, %v10535_v54  ;;  %v496_v10 = vsel %vm495_vm12, 0.0, %v10534_v56  ;;  %v510_v24 = vrot.slane %v12342_v7, 1  ;;  %v557_v47 = vrot.slane %v12342_v7, 5 }
 0x219   : > { %v12347_v14 = vsel %vm499_vm13, %v496_v10, 0.0  ;;  %v12350_v15 = vsel %vm499_vm13, %v497_v9, 0.0  ;;  %v534_v62 = vrot.slane %v12342_v7, 3 }
 0x21a   : > { %v508_v23 = vrot.slane %v12350_v15, 1  ;;  %v555_v45 = vrot.slane %v12350_v15, 5  ;;  %v531_v60 = vrot.slane %v12347_v14, 3  ;;  %v532_v61 = vrot.slane %v12350_v15, 3 }
 0x21b   : > { %3499 = vmatpush1.bf16.msra.mxu0 %v9324_v16  ;;  %3671 = vmatpush1.bf16.msra.mxu1 %v9326_v17  ;;  %v9375_v16 = vcombine.high %v1061_v3, %v1065_v6  ;;  %v1068_v17 = vld [vmem:[#allocation9 + $0x6c0] sm:$0xff]  ;;  %v519_v63 = vrot.slane %v12347_v14, 2 }
 0x21c   : > { %3500 = vmatprep.subr.bf16.mxu0 %v9333_v18  ;;  %3672 = vmatprep.subr.bf16.mxu1 %v9335_v20  ;;  %v1072_v18 = vld [vmem:[#allocation9 + $0x6e0] sm:$0xff]  ;;  %v507_v20 = vrot.slane %v12347_v14, 1  ;;  %v533_v54 = vsel %vm530_vm7, %v531_v60, %v532_v61  ;;  %v535_v56 = vsel %vm530_vm7, %v532_v61, %v534_v62  ;;  %vm607_vm7 = vcmask 982016  }
 0x21d   : > { %v9381_v31 = vcombine.high %v1068_v17, %v1072_v18  ;;  %v9380_v48 = vcombine.low %v1068_v17, %v1072_v18  ;;  %v1096_v17 = vld [vmem:[#allocation9 + $0x7a0] sm:$0xff]  ;;  %v1093_v18 = vld [vmem:[#allocation9 + $0x788] sm:$0xff] }
 0x21e   : > { %v1116_v61 = vld [vmem:[#allocation9 + $0x840] sm:$0xff] }
 0x21f   : > { %3501 = vmatpush1.bf16.msra.mxu0 %v9332_v27  ;;  %3673 = vmatpush1.bf16.msra.mxu1 %v9334_v28  ;;  %v9372_v27 = vcombine.low %v1060_v43, %v1064_v44  ;;  %v509_v28 = vsel %vm506_vm4, %v507_v20, %v508_v23  ;;  %v1097_v20 = vld [vmem:[#allocation9 + $0x7a8] sm:$0xff] }
 0x220   : > { %3502 = vmatprep.subr.bf16.mxu0 %v9341_v29  ;;  %3674 = vmatprep.subr.bf16.mxu1 %v9343_v30  ;;  %v511_v29 = vsel %vm506_vm4, %v508_v23, %v510_v24  ;;  %v9374_v30 = vcombine.low %v1061_v3, %v1065_v6  ;;  %v10556_v3 = vpack.i.bf16 %v535_v56, %v533_v54  ;;  %v543_v23 = vrot.slane %v12350_v15, 4  ;;  %v1124_v54 = vld [vmem:[#allocation9 + $0x880] sm:$0xff] }
 0x221   : > { %v10536_v33 = vpack.i.bf16 %v511_v29, %v509_v28  ;;  %v545_v24 = vrot.slane %v12342_v7, 4  ;;  %v1128_v56 = vld [vmem:[#allocation9 + $0x8a0] sm:$0xff] }
 0x223   : > { %3503 = vmatpush1.bf16.msra.mxu0 %v9340_v35  ;;  %3675 = vmatpush1.bf16.msra.mxu1 %v9342_v36  ;;  %v1080_v35 = vld [vmem:[#allocation9 + $0x720] sm:$0xff]  ;;  %v1077_v36 = vld [vmem:[#allocation9 + $0x708] sm:$0xff]  ;;  %v546_v28 = vsel %vm476_vm0, %v543_v23, %v545_v24 }
 0x224   : > { %3504 = vmatprep.subr.bf16.mxu0 %v9349_v4  ;;  %3676 = vmatprep.subr.bf16.mxu1 %v9351_v40  ;;  %v1081_v4 = vld [vmem:[#allocation9 + $0x728] sm:$0xff]  ;;  %v554_v40 = vrot.slane %v12347_v14, 5  ;;  %v9388_v43 = vcombine.low %v1076_v32, %v1080_v35  ;;  %v1144_v24 = vld [vmem:[#allocation9 + $0x920] sm:$0xff] }
 0x225   : > { %10537 = vrot.lane.b32.xlu0 %v10536_v33, %s11800_s26  ;;  %v9390_v44 = vcombine.low %v1077_v36, %v1081_v4  ;;  %v1104_v33 = vld [vmem:[#allocation9 + $0x7e0] sm:$0xff] }
 0x227   : > { %3505 = vmatpush1.bf16.msra.mxu0 %v9348_v50  ;;  %3677 = vmatpush1.bf16.msra.mxu1 %v9350_v51  ;;  %v556_v50 = vsel %vm553_vm3, %v554_v40, %v555_v45  ;;  %v558_v51 = vsel %vm553_vm3, %v555_v45, %v557_v47  ;;  %v1108_v47 = vld [vmem:[#allocation9 + $0x800] sm:$0xff]  ;;  %vm598_vm3 = vcmask 392192  }
 0x228   : > { %3506 = vmatprep.subr.bf16.mxu0 %v9357_v52  ;;  %3678 = vmatprep.subr.bf16.mxu1 %v9359_v55  ;;  %v9389_v52 = vcombine.high %v1076_v32, %v1080_v35  ;;  %v9391_v55 = vcombine.high %v1077_v36, %v1081_v4  ;;  %v10546_v57 = vpack.i.bf16 %v558_v51, %v556_v50  ;;  %v1105_v35 = vld [vmem:[#allocation9 + $0x7e8] sm:$0xff]  ;;  %v10530_v51 = vunpack.i.h.bf16 %v12338_v46 }
 0x229   : > { %v9406_v4 = vcombine.low %v1093_v18, %v1097_v20  ;;  %v1113_v50 = vld [vmem:[#allocation9 + $0x828] sm:$0xff] }
 0x22a   : > { %10547 = vrot.lane.b32.xlu0 %v10546_v57, %s11801_s17  ;;  %v736_v62 = vsel %vm728_vm11, %v10525_v21, %v10530_v51  ;;  %v1129_v21 = vld [vmem:[#allocation9 + $0x8a8] sm:$0xff]  ;;  %s8977_s17 = scalar_lea.sflag [#allocation4], %s12190_s18 }
 0x22b   : > { %3507 = vmatpush1.bf16.msra.mxu0 %v9356_v0  ;;  %3679 = vmatpush1.bf16.msra.mxu1 %v9358_v1  ;;  %v1088_v0 = vld [vmem:[#allocation9 + $0x760] sm:$0xff]  ;;  %v1085_v1 = vld [vmem:[#allocation9 + $0x748] sm:$0xff] }
 0x22c   : > { %3508 = vmatprep.subr.bf16.mxu0 %v9365_v37  ;;  %3680 = vmatprep.subr.bf16.mxu1 %v9367_v42  ;;  %v520_v37 = vrot.slane %v12350_v15, 2  ;;  %v522_v42 = vrot.slane %v12342_v7, 2  ;;  %v9397_v9 = vcombine.high %v1084_v59, %v1088_v0  ;;  %v9399_v10 = vcombine.high %v1085_v1, %v1089_v2 }
 0x22d   : > { %v9396_v25 = vcombine.low %v1084_v59, %v1088_v0  ;;  %v9398_v26 = vcombine.low %v1085_v1, %v1089_v2  ;;  %v1120_v0 = vld [vmem:[#allocation9 + $0x860] sm:$0xff]  ;;  %v1117_v1 = vld [vmem:[#allocation9 + $0x848] sm:$0xff] }
 0x22e   : > { %v521_v6 = vsel %vm518_vm6, %v519_v63, %v520_v37  ;;  %10557 = vrot.lane.b32.xlu0 %v10556_v3, %s11802_s13 }
 0x22f   : > { %3509 = vmatpush1.bf16.msra.mxu0 %v9364_v8  ;;  %3681 = vmatpush1.bf16.msra.mxu1 %v9366_v11  ;;  %v523_v8 = vsel %vm518_vm6, %v520_v37, %v522_v42  ;;  %v1092_v11 = vld [vmem:[#allocation9 + $0x780] sm:$0xff] }
 0x230   : > { %3510 = vmatprep.subr.bf16.mxu0 %v9373_v13  ;;  %3682 = vmatprep.subr.bf16.mxu1 %v9375_v16  ;;  %v10541_v13 = vpack.i.bf16 %v523_v8, %v521_v6  ;;  %v542_v16 = vrot.slane %v12347_v14, 4  ;;  %v9405_v29 = vcombine.high %v1092_v11, %v1096_v17  ;;  %v9404_v36 = vcombine.low %v1092_v11, %v1096_v17  ;;  %v1133_v11 = vld [vmem:[#allocation9 + $0x8c8] sm:$0xff] }
 0x231   : > { %v9437_v6 = vcombine.high %v1124_v54, %v1128_v56  ;;  %v9439_v8 = vcombine.high %v1125_v19, %v1129_v21  ;;  %v9438_v17 = vcombine.low %v1125_v19, %v1129_v21  ;;  %v1180_v21 = vld [vmem:[#allocation9 + $0xa40] sm:$0xff] }
 0x232   : > { %10542 = vrot.lane.b32.xlu1 %v10541_v13, %s11803_s9  ;;  %v1137_v13 = vld [vmem:[#allocation9 + $0x8e8] sm:$0xff]  ;;  %s11806_s9 = smov [#allocation17]  }
 0x233   : > { %3511 = vmatpush1.bf16.msra.mxu0 %v9372_v27  ;;  %3683 = vmatpush1.bf16.msra.mxu1 %v9374_v30  ;;  %v544_v27 = vsel %vm476_vm0, %v542_v16, %v543_v23  ;;  %v9407_v30 = vcombine.high %v1093_v18, %v1097_v20  ;;  %v9436_v16 = vcombine.low %v1124_v54, %v1128_v56  ;;  %v1140_v23 = vld [vmem:[#allocation9 + $0x900] sm:$0xff] }
 0x234   : > { %3512 = vmatprep.subr.bf16.mxu0 %v9381_v31  ;;  %3684 = vmatprep.subr.bf16.mxu1 %v9383_v34  ;;  %v1100_v31 = vld [vmem:[#allocation9 + $0x7c0] sm:$0xff]  ;;  %v10566_v32 = vpack.i.bf16 %v546_v28, %v544_v27  ;;  %v1101_v34 = vld [vmem:[#allocation9 + $0x7c8] sm:$0xff]  ;;  %v9447_v20 = vcombine.high %v1133_v11, %v1137_v13  ;;  %v9446_v28 = vcombine.low %v1133_v11, %v1137_v13 }
 0x235   : > { %v9413_v40 = vcombine.high %v1100_v31, %v1104_v33  ;;  %v9415_v45 = vcombine.high %v1101_v34, %v1105_v35  ;;  %v9414_v57 = vcombine.low %v1101_v34, %v1105_v35  ;;  %v1153_v34 = vld [vmem:[#allocation9 + $0x968] sm:$0xff]  ;;  %v9452_v35 = vcombine.low %v1140_v23, %v1144_v24  ;;  %v1188_v13 = vld [vmem:[#allocation9 + $0xa80] sm:$0xff] }
 0x236   : > { %10567 = vrot.lane.b32.xlu0 %v10566_v32, %s11796_s19  ;;  %v1152_v32 = vld [vmem:[#allocation9 + $0x960] sm:$0xff] }
 0x237   : > { %3513 = vmatpush1.bf16.msra.mxu0 %v9380_v48  ;;  %3685 = vmatpush1.bf16.msra.mxu1 %v9382_v49  ;;  %v1112_v48 = vld [vmem:[#allocation9 + $0x820] sm:$0xff]  ;;  %v1109_v49 = vld [vmem:[#allocation9 + $0x808] sm:$0xff] }
 0x238   : > { %3514 = vmatprep.subr.bf16.mxu0 %v9389_v52  ;;  %3686 = vmatprep.subr.bf16.mxu1 %v9391_v55  ;;  %v10529_v52 = vunpack.i.l.bf16 %v12338_v46  ;;  %v9412_v55 = vcombine.low %v1100_v31, %v1104_v33  ;;  %v9421_v59 = vcombine.high %v1108_v47, %v1112_v48  ;;  %v9423_v60 = vcombine.high %v1109_v49, %v1113_v50  ;;  %v1121_v46 = vld [vmem:[#allocation9 + $0x868] sm:$0xff]  ;;  %v1148_v31 = vld [vmem:[#allocation9 + $0x940] sm:$0xff] }
 0x239   : > { %v9420_v2 = vcombine.low %v1108_v47, %v1112_v48  ;;  %v9422_v37 = vcombine.low %v1109_v49, %v1113_v50  ;;  %v9430_v3 = vcombine.low %v1117_v1, %v1121_v46  ;;  %v1149_v33 = vld [vmem:[#allocation9 + $0x948] sm:$0xff]  ;;  %v1160_v47 = vld [vmem:[#allocation9 + $0x9a0] sm:$0xff]  ;;  %v9460_v50 = vcombine.low %v1148_v31, %v1152_v32 }
 0x23a   : > { %v735_v63 = vsel %vm728_vm11, %v10524_v22, %v10529_v52  ;;  %v9428_v22 = vcombine.low %v1116_v61, %v1120_v0  ;;  %v1157_v48 = vld [vmem:[#allocation9 + $0x988] sm:$0xff]  ;;  %v9462_v51 = vcombine.low %v1149_v33, %v1153_v34 }
 0x23b   : > { %3515 = vmatpush1.bf16.msra.mxu0 %v9388_v43  ;;  %3687 = vmatpush1.bf16.msra.mxu1 %v9390_v44  ;;  %v12387_v42 = vpack.c.bf16 %v736_v62, %v735_v63  ;;  %v9429_v43 = vcombine.high %v1116_v61, %v1120_v0  ;;  %v9431_v44 = vcombine.high %v1117_v1, %v1121_v46  ;;  %v1161_v49 = vld [vmem:[#allocation9 + $0x9a8] sm:$0xff]  ;;  %v1172_v46 = vld [vmem:[#allocation9 + $0xa00] sm:$0xff] }
 0x23c   : > { %3516 = vmatprep.subr.bf16.mxu0 %v9397_v9  ;;  %3688 = vmatprep.subr.bf16.mxu1 %v9399_v10  ;;  %v1132_v9 = vld [vmem:[#allocation9 + $0x8c0] sm:$0xff]  ;;  %v1169_v61 = vld [vmem:[#allocation9 + $0x9e8] sm:$0xff]  ;;  %v9470_v63 = vcombine.low %v1157_v48, %v1161_v49 }
 0x23d   : > { %v1136_v10 = vld [vmem:[#allocation9 + $0x8e0] sm:$0xff] }
 0x23e   : > { %v9445_v18 = vcombine.high %v1132_v9, %v1136_v10  ;;  %v9444_v27 = vcombine.low %v1132_v9, %v1136_v10 }
 0x23f   : > { %3517 = vmatpush1.bf16.msra.mxu0 %v9396_v25  ;;  %3689 = vmatpush1.bf16.msra.mxu1 %v9398_v26  ;;  %v1141_v25 = vld [vmem:[#allocation9 + $0x908] sm:$0xff] }
 0x240   : > { %3518 = vmatprep.subr.bf16.mxu0 %v9405_v29  ;;  %3690 = vmatprep.subr.bf16.mxu1 %v9407_v30  ;;  %v1145_v26 = vld [vmem:[#allocation9 + $0x928] sm:$0xff]  ;;  %v9453_v29 = vcombine.high %v1140_v23, %v1144_v24 }
 0x241   : > { %v9455_v30 = vcombine.high %v1141_v25, %v1145_v26 }
 0x243   : > { %3519 = vmatpush1.bf16.msra.mxu0 %v9404_v36  ;;  %3691 = vmatpush1.bf16.msra.mxu1 %v9406_v4  ;;  %v9454_v36 = vcombine.low %v1141_v25, %v1145_v26  ;;  %v9461_v4 = vcombine.high %v1148_v31, %v1152_v32  ;;  %v1196_v26 = vld [vmem:[#allocation9 + $0xac0] sm:$0xff] }
 0x244   : > { %3520 = vmatprep.subr.bf16.mxu0 %v9413_v40  ;;  %3692 = vmatprep.subr.bf16.mxu1 %v9415_v45  ;;  %v9463_v40 = vcombine.high %v1149_v33, %v1153_v34  ;;  %v1156_v45 = vld [vmem:[#allocation9 + $0x980] sm:$0xff] }
 0x245   : > { %v9469_v52 = vcombine.high %v1156_v45, %v1160_v47  ;;  %v9468_v62 = vcombine.low %v1156_v45, %v1160_v47  ;;  %v1204_v34 = vld [vmem:[#allocation9 + $0xb00] sm:$0xff] }
 0x247   : > { %3521 = vmatpush1.bf16.msra.mxu0 %v9412_v55  ;;  %3693 = vmatpush1.bf16.msra.mxu1 %v9414_v57  ;;  %v9471_v55 = vcombine.high %v1157_v48, %v1161_v49  ;;  %v1164_v57 = vld [vmem:[#allocation9 + $0x9c0] sm:$0xff] }
 0x248   : > { %3533 = vmatprep.subr.bf16.mxu0 %v9421_v59  ;;  %3705 = vmatprep.subr.bf16.mxu1 %v9423_v60  ;;  %v1168_v59 = vld [vmem:[#allocation9 + $0x9e0] sm:$0xff]  ;;  %v1165_v60 = vld [vmem:[#allocation9 + $0x9c8] sm:$0xff] }
 0x249   : > { %v9477_v0 = vcombine.high %v1164_v57, %v1168_v59  ;;  %v9479_v1 = vcombine.high %v1165_v60, %v1169_v61  ;;  %v9478_v54 = vcombine.low %v1165_v60, %v1169_v61  ;;  %v1212_v49 = vld [vmem:[#allocation9 + $0xb40] sm:$0xff] }
 0x24a   : > { %3523 = vmatmul.mubr.bf16.vlgmr.msra.gmra.mrb[0].mxu0 %v12328_v58  ;;  %3695 = vmatmul.mubr.bf16.vlgmr.msra.gmra.mrb[0].mxu1 %v12328_v58  ;;  %v1220_v61 = vld [vmem:[#allocation9 + $0xb80] sm:$0xff] }
 0x24b   : > { %3534 = vmatpush1.bf16.msra.mxu0 %v9420_v2  ;;  %3565 = vmatprep.mubr.bf16.mxu0 %v12387_v42  ;;  %v1176_v2 = vld [vmem:[#allocation9 + $0xa20] sm:$0xff] }
 0x24c   : > { %3706 = vmatpush1.bf16.msra.mxu1 %v9422_v37  ;;  %3737 = vmatprep.mubr.bf16.mxu1 %v12387_v42  ;;  %v1173_v37 = vld [vmem:[#allocation9 + $0xa08] sm:$0xff]  ;;  %v9485_v56 = vcombine.high %v1172_v46, %v1176_v2 }
 0x24d   : > { %3535 = vmatprep.subr.bf16.mxu0 %v9429_v43  ;;  %3707 = vmatprep.subr.bf16.mxu1 %v9431_v44  ;;  %v1177_v43 = vld [vmem:[#allocation9 + $0xa28] sm:$0xff]  ;;  %v9476_v44 = vcombine.low %v1164_v57, %v1168_v59 }
 0x24e   : > { %v9487_v19 = vcombine.high %v1173_v37, %v1177_v43  ;;  %v9486_v9 = vcombine.low %v1173_v37, %v1177_v43  ;;  %v1228_v43 = vld [vmem:[#allocation9 + $0xbc0] sm:$0xff] }
 0x24f   : > { %3536 = vmatpush1.bf16.msra.mxu0 %v9428_v22  ;;  %v1184_v22 = vld [vmem:[#allocation9 + $0xa60] sm:$0xff] }
 0x250   : > { %3708 = vmatpush1.bf16.msra.mxu1 %v9430_v3  ;;  %3537 = vmatprep.subr.bf16.mxu0 %v9437_v6  ;;  %v1181_v3 = vld [vmem:[#allocation9 + $0xa48] sm:$0xff]  ;;  %v9493_v10 = vcombine.high %v1180_v21, %v1184_v22 }
 0x251   : > { %3709 = vmatprep.subr.bf16.mxu1 %v9439_v8  ;;  %v1185_v6 = vld [vmem:[#allocation9 + $0xa68] sm:$0xff]  ;;  %v9484_v8 = vcombine.low %v1172_v46, %v1176_v2 }
 0x252   : > { %v9495_v11 = vcombine.high %v1181_v3, %v1185_v6  ;;  %v9494_v23 = vcombine.low %v1181_v3, %v1185_v6  ;;  %v1236_v6 = vld [vmem:[#allocation9 + $0xc00] sm:$0xff] }
 0x253   : > { %3538 = vmatpush1.bf16.msra.mxu0 %v9436_v16  ;;  %v1192_v16 = vld [vmem:[#allocation9 + $0xaa0] sm:$0xff] }
 0x254   : > { %3710 = vmatpush1.bf16.msra.mxu1 %v9438_v17  ;;  %3539 = vmatprep.subr.bf16.mxu0 %v9445_v18  ;;  %v1189_v17 = vld [vmem:[#allocation9 + $0xa88] sm:$0xff]  ;;  %v9501_v24 = vcombine.high %v1188_v13, %v1192_v16 }
 0x255   : > { %3711 = vmatprep.subr.bf16.mxu1 %v9447_v20  ;;  %v1193_v18 = vld [vmem:[#allocation9 + $0xaa8] sm:$0xff]  ;;  %v9492_v20 = vcombine.low %v1180_v21, %v1184_v22 }
 0x256   : > { %v9503_v25 = vcombine.high %v1189_v17, %v1193_v18  ;;  %v9502_v31 = vcombine.low %v1189_v17, %v1193_v18  ;;  %v1244_v18 = vld [vmem:[#allocation9 + $0xc40] sm:$0xff] }
 0x257   : > { %3540 = vmatpush1.bf16.msra.mxu0 %v9444_v27  ;;  %v1200_v27 = vld [vmem:[#allocation9 + $0xae0] sm:$0xff] }
 0x258   : > { %3712 = vmatpush1.bf16.msra.mxu1 %v9446_v28  ;;  %3541 = vmatprep.subr.bf16.mxu0 %v9453_v29  ;;  %v1197_v28 = vld [vmem:[#allocation9 + $0xac8] sm:$0xff]  ;;  %v9509_v32 = vcombine.high %v1196_v26, %v1200_v27 }
 0x259   : > { %3713 = vmatprep.subr.bf16.mxu1 %v9455_v30  ;;  %v1201_v29 = vld [vmem:[#allocation9 + $0xae8] sm:$0xff]  ;;  %v9500_v30 = vcombine.low %v1188_v13, %v1192_v16 }
 0x25a   : > { %v9511_v33 = vcombine.high %v1197_v28, %v1201_v29  ;;  %v9510_v45 = vcombine.low %v1197_v28, %v1201_v29  ;;  %v1252_v29 = vld [vmem:[#allocation9 + $0xc80] sm:$0xff] }
 0x25b   : > { %3542 = vmatpush1.bf16.msra.mxu0 %v9452_v35  ;;  %v1208_v35 = vld [vmem:[#allocation9 + $0xb20] sm:$0xff] }
 0x25c   : > { %3714 = vmatpush1.bf16.msra.mxu1 %v9454_v36  ;;  %3543 = vmatprep.subr.bf16.mxu0 %v9461_v4  ;;  %v1205_v36 = vld [vmem:[#allocation9 + $0xb08] sm:$0xff]  ;;  %v9517_v47 = vcombine.high %v1204_v34, %v1208_v35 }
 0x25d   : > { %3715 = vmatprep.subr.bf16.mxu1 %v9463_v40  ;;  %v1209_v4 = vld [vmem:[#allocation9 + $0xb28] sm:$0xff]  ;;  %v9508_v40 = vcombine.low %v1196_v26, %v1200_v27 }
 0x25e   : > { %v9519_v48 = vcombine.high %v1205_v36, %v1209_v4  ;;  %v9518_v57 = vcombine.low %v1205_v36, %v1209_v4  ;;  %v1260_v4 = vld [vmem:[#allocation9 + $0xcc0] sm:$0xff] }
 0x25f   : > { %3544 = vmatpush1.bf16.msra.mxu0 %v9460_v50  ;;  %v1216_v50 = vld [vmem:[#allocation9 + $0xb60] sm:$0xff] }
 0x260   : > { %3716 = vmatpush1.bf16.msra.mxu1 %v9462_v51  ;;  %3545 = vmatprep.subr.bf16.mxu0 %v9469_v52  ;;  %v1213_v51 = vld [vmem:[#allocation9 + $0xb48] sm:$0xff]  ;;  %v9525_v59 = vcombine.high %v1212_v49, %v1216_v50 }
 0x261   : > { %3717 = vmatprep.subr.bf16.mxu1 %v9471_v55  ;;  %v1217_v52 = vld [vmem:[#allocation9 + $0xb68] sm:$0xff]  ;;  %v9516_v55 = vcombine.low %v1204_v34, %v1208_v35 }
 0x262   : > { %v9527_v60 = vcombine.high %v1213_v51, %v1217_v52  ;;  %v9526_v46 = vcombine.low %v1213_v51, %v1217_v52 }
 0x263   : > { %3546 = vmatpush1.bf16.msra.mxu0 %v9468_v62  ;;  %v1224_v62 = vld [vmem:[#allocation9 + $0xba0] sm:$0xff] }
 0x264   : > { %3718 = vmatpush1.bf16.msra.mxu1 %v9470_v63  ;;  %3547 = vmatprep.subr.bf16.mxu0 %v9477_v0  ;;  %v1221_v63 = vld [vmem:[#allocation9 + $0xb88] sm:$0xff]  ;;  %v9533_v2 = vcombine.high %v1220_v61, %v1224_v62 }
 0x265   : > { %3719 = vmatprep.subr.bf16.mxu1 %v9479_v1  ;;  %v1225_v0 = vld [vmem:[#allocation9 + $0xba8] sm:$0xff]  ;;  %v9524_v1 = vcombine.low %v1212_v49, %v1216_v50 }
 0x266   : > { %v9535_v37 = vcombine.high %v1221_v63, %v1225_v0  ;;  %v9534_v21 = vcombine.low %v1221_v63, %v1225_v0 }
 0x267   : > { %3548 = vmatpush1.bf16.msra.mxu0 %v9476_v44  ;;  %v1232_v44 = vld [vmem:[#allocation9 + $0xbe0] sm:$0xff] }
 0x268   : > { %3720 = vmatpush1.bf16.msra.mxu1 %v9478_v54  ;;  %3549 = vmatprep.subr.bf16.mxu0 %v9485_v56  ;;  %v1229_v54 = vld [vmem:[#allocation9 + $0xbc8] sm:$0xff]  ;;  %v9541_v22 = vcombine.high %v1228_v43, %v1232_v44 }
 0x269   : > { %3721 = vmatprep.subr.bf16.mxu1 %v9487_v19  ;;  %v1233_v56 = vld [vmem:[#allocation9 + $0xbe8] sm:$0xff]  ;;  %v9532_v19 = vcombine.low %v1220_v61, %v1224_v62 }
 0x26a   : > { %v9543_v3 = vcombine.high %v1229_v54, %v1233_v56  ;;  %v9542_v13 = vcombine.low %v1229_v54, %v1233_v56 }
 0x26b   : > { %3550 = vmatpush1.bf16.msra.mxu0 %v9484_v8  ;;  %v1240_v8 = vld [vmem:[#allocation9 + $0xc20] sm:$0xff] }
 0x26c   : > { %3722 = vmatpush1.bf16.msra.mxu1 %v9486_v9  ;;  %3551 = vmatprep.subr.bf16.mxu0 %v9493_v10  ;;  %v1237_v9 = vld [vmem:[#allocation9 + $0xc08] sm:$0xff]  ;;  %v9549_v16 = vcombine.high %v1236_v6, %v1240_v8 }
 0x26d   : > { %3723 = vmatprep.subr.bf16.mxu1 %v9495_v11  ;;  %v1241_v10 = vld [vmem:[#allocation9 + $0xc28] sm:$0xff]  ;;  %v9540_v11 = vcombine.low %v1228_v43, %v1232_v44 }
 0x26e   : > { %v9551_v17 = vcombine.high %v1237_v9, %v1241_v10  ;;  %v9550_v26 = vcombine.low %v1237_v9, %v1241_v10 }
 0x26f   : > { %3552 = vmatpush1.bf16.msra.mxu0 %v9492_v20  ;;  %v1248_v20 = vld [vmem:[#allocation9 + $0xc60] sm:$0xff] }
 0x270   : > { %3724 = vmatpush1.bf16.msra.mxu1 %v9494_v23  ;;  %3553 = vmatprep.subr.bf16.mxu0 %v9501_v24  ;;  %v1245_v23 = vld [vmem:[#allocation9 + $0xc48] sm:$0xff]  ;;  %v9557_v27 = vcombine.high %v1244_v18, %v1248_v20 }
 0x271   : > { %3725 = vmatprep.subr.bf16.mxu1 %v9503_v25  ;;  %v1249_v24 = vld [vmem:[#allocation9 + $0xc68] sm:$0xff]  ;;  %v9548_v25 = vcombine.low %v1236_v6, %v1240_v8 }
 0x272   : > { %v9559_v28 = vcombine.high %v1245_v23, %v1249_v24  ;;  %v9558_v34 = vcombine.low %v1245_v23, %v1249_v24 }
 0x273   : > { %3554 = vmatpush1.bf16.msra.mxu0 %v9500_v30  ;;  %v1256_v30 = vld [vmem:[#allocation9 + $0xca0] sm:$0xff] }
 0x274   : > { %3726 = vmatpush1.bf16.msra.mxu1 %v9502_v31  ;;  %3555 = vmatprep.subr.bf16.mxu0 %v9509_v32  ;;  %v1253_v31 = vld [vmem:[#allocation9 + $0xc88] sm:$0xff]  ;;  %v9565_v35 = vcombine.high %v1252_v29, %v1256_v30  ;;  %v9564_v49 = vcombine.low %v1252_v29, %v1256_v30  ;;  %v875_v29 = vld [vmem:[#allocation9 + $0xb8] sm:$0xff] }
 0x275   : > { %3727 = vmatprep.subr.bf16.mxu1 %v9511_v33  ;;  %v1257_v32 = vld [vmem:[#allocation9 + $0xca8] sm:$0xff]  ;;  %v9556_v33 = vcombine.low %v1244_v18, %v1248_v20  ;;  %v867_v18 = vld [vmem:[#allocation9 + $0x78] sm:$0xff]  ;;  %v12399_v20 = vpack.c.bf16 %v12235_v12, %v12228_v5 }
 0x276   : > { %v9567_v36 = vcombine.high %v1253_v31, %v1257_v32  ;;  %v9566_v50 = vcombine.low %v1253_v31, %v1257_v32  ;;  %v878_v32 = vld [vmem:[#allocation9 + $0xd0] sm:$0xff] }
 0x277   : > { %3556 = vmatpush1.bf16.msra.mxu0 %v9508_v40  ;;  %v1264_v40 = vld [vmem:[#allocation9 + $0xce0] sm:$0xff] }
 0x278   : > { %3728 = vmatpush1.bf16.msra.mxu1 %v9510_v45  ;;  %3557 = vmatprep.subr.bf16.mxu0 %v9517_v47  ;;  %v11804_v45 = vmov 0   ;;  %v1261_v47 = vld [vmem:[#allocation9 + $0xcc8] sm:$0xff]  ;;  %v9573_v51 = vcombine.high %v1260_v4, %v1264_v40  ;;  %v9572_v61 = vcombine.low %v1260_v4, %v1264_v40  ;;  %v879_v4 = vld [vmem:[#allocation9 + $0xd8] sm:$0xff] }
 0x279   : > { %3729 = vmatprep.subr.bf16.mxu1 %v9519_v48  ;;  %v1265_v48 = vld [vmem:[#allocation9 + $0xce8] sm:$0xff]  ;;  %v883_v40 = vld [vmem:[#allocation9 + $0xf8] sm:$0xff] }
 0x27a   : > { %v9575_v52 = vcombine.high %v1261_v47, %v1265_v48  ;;  %v9574_v62 = vcombine.low %v1261_v47, %v1265_v48 }
 0x27b   : > { %3558 = vmatpush1.bf16.msra.mxu0 %v9516_v55  ;;  %v1268_v55 = vld [vmem:[#allocation9 + $0xd00] sm:$0xff] }
 0x27c   : > { %3730 = vmatpush1.bf16.msra.mxu1 %v9518_v57  ;;  %3559 = vmatprep.subr.bf16.mxu0 %v9525_v59  ;;  %v1272_v57 = vld [vmem:[#allocation9 + $0xd20] sm:$0xff]  ;;  %v1269_v59 = vld [vmem:[#allocation9 + $0xd08] sm:$0xff] }
 0x27d   : > { %3731 = vmatprep.subr.bf16.mxu1 %v9527_v60  ;;  %v1273_v60 = vld [vmem:[#allocation9 + $0xd28] sm:$0xff]  ;;  %v9581_v63 = vcombine.high %v1268_v55, %v1272_v57  ;;  %v9580_v43 = vcombine.low %v1268_v55, %v1272_v57  ;;  %v9195_v55 = vcombine.high %v879_v4, %v883_v40  ;;  %v886_v57 = vld [vmem:[#allocation9 + $0x110] sm:$0xff] }
 0x27e   : > { %v9583_v0 = vcombine.high %v1269_v59, %v1273_v60  ;;  %v9582_v44 = vcombine.low %v1269_v59, %v1273_v60  ;;  %v890_v59 = vld [vmem:[#allocation9 + $0x130] sm:$0xff]  ;;  %v579_v60 = vrot.slane %v12350_v15, 7 }
 0x27f   : > { %3560 = vmatpush1.bf16.msra.mxu0 %v9524_v1  ;;  %v1276_v1 = vld [vmem:[#allocation9 + $0xd40] sm:$0xff] }
 0x280   : > { %3732 = vmatpush1.bf16.msra.mxu1 %v9526_v46  ;;  %3561 = vmatprep.subr.bf16.mxu0 %v9533_v2  ;;  %v1280_v46 = vld [vmem:[#allocation9 + $0xd60] sm:$0xff]  ;;  %v1277_v2 = vld [vmem:[#allocation9 + $0xd48] sm:$0xff] }
 0x281   : > { %3733 = vmatprep.subr.bf16.mxu1 %v9535_v37  ;;  %v1281_v37 = vld [vmem:[#allocation9 + $0xd68] sm:$0xff]  ;;  %v9589_v54 = vcombine.high %v1276_v1, %v1280_v46  ;;  %v9588_v6 = vcombine.low %v1276_v1, %v1280_v46 }
 0x282   : > { %v9591_v56 = vcombine.high %v1277_v2, %v1281_v37  ;;  %v9590_v8 = vcombine.low %v1277_v2, %v1281_v37  ;;  %v9194_v2 = vcombine.low %v879_v4, %v883_v40  ;;  %v9201_v37 = vcombine.high %v886_v57, %v890_v59  ;;  %v926_v40 = vld [vmem:[#allocation9 + $0x250] sm:$0xff] }
 0x283   : > { %3562 = vmatpush1.bf16.msra.mxu0 %v9532_v19  ;;  %v854_v19 = vld [vmem:[#allocation9 + $0x10] sm:$0xff] }
 0x284   : > { %3734 = vmatpush1.bf16.msra.mxu1 %v9534_v21  ;;  %3563 = vmatprep.subr.bf16.mxu0 %v9541_v22  ;;  %v858_v21 = vld [vmem:[#allocation9 + $0x30] sm:$0xff]  ;;  %v855_v22 = vld [vmem:[#allocation9 + $0x18] sm:$0xff] }
 0x285   : > { %3735 = vmatprep.subr.bf16.mxu1 %v9543_v3  ;;  %v859_v3 = vld [vmem:[#allocation9 + $0x38] sm:$0xff]  ;;  %v9169_v9 = vcombine.high %v854_v19, %v858_v21 }
 0x286   : > { %v9171_v10 = vcombine.high %v855_v22, %v859_v3  ;;  %v9170_v23 = vcombine.low %v855_v22, %v859_v3  ;;  %v10571_v22 = vpack.i.bf16 %v12342_v7, %v12350_v15  ;;  %v9200_v3 = vcombine.low %v886_v57, %v890_v59  ;;  %v938_v57 = vld [vmem:[#allocation9 + $0x2b0] sm:$0xff]  ;;  %v935_v59 = vld [vmem:[#allocation9 + $0x298] sm:$0xff] }
 0x287   : > { %3564 = vmatpush1.bf16.msra.mxu0 %v9540_v11  ;;  %v862_v11 = vld [vmem:[#allocation9 + $0x50] sm:$0xff] }
 0x288   : > { %3736 = vmatpush1.bf16.msra.mxu1 %v9542_v13  ;;  %3576 = vmatprep.subr.bf16.mxu0 %v9549_v16  ;;  %v866_v13 = vld [vmem:[#allocation9 + $0x70] sm:$0xff]  ;;  %v9168_v16 = vcombine.low %v854_v19, %v858_v21  ;;  %v895_v19 = vld [vmem:[#allocation9 + $0x158] sm:$0xff] }
 0x289   : > { %3748 = vmatprep.subr.bf16.mxu1 %v9551_v17  ;;  %v863_v17 = vld [vmem:[#allocation9 + $0x58] sm:$0xff]  ;;  %v9177_v24 = vcombine.high %v862_v11, %v866_v13  ;;  %v9176_v30 = vcombine.low %v862_v11, %v866_v13  ;;  %v906_v11 = vld [vmem:[#allocation9 + $0x1b0] sm:$0xff] }
 0x28a   : > { %3566 = vmatmul.mubr.bf16.vlgmr.msra.gmra.mrb[0].mxu0 %v12314_v38  ;;  %v9178_v5 = vcombine.low %v863_v17, %v867_v18  ;;  %v899_v21 = vld [vmem:[#allocation9 + $0x178] sm:$0xff] }
 0x28b   : > { %3738 = vmatmul.mubr.bf16.vlgmr.msra.gmra.mrb[0].mxu1 %v12314_v38  ;;  %3577 = vmatpush1.bf16.msra.mxu0 %v9548_v25  ;;  %v870_v25 = vld [vmem:[#allocation9 + $0x90] sm:$0xff]  ;;  %v903_v13 = vld [vmem:[#allocation9 + $0x198] sm:$0xff] }
 0x28c   : > { %3749 = vmatpush1.bf16.msra.mxu1 %v9550_v26  ;;  %3578 = vmatprep.subr.bf16.mxu0 %v9557_v27  ;;  %v874_v26 = vld [vmem:[#allocation9 + $0xb0] sm:$0xff]  ;;  %v9179_v27 = vcombine.high %v863_v17, %v867_v18  ;;  %v9210_v18 = vcombine.low %v895_v19, %v899_v21 }
 0x28d   : > { %3750 = vmatprep.subr.bf16.mxu1 %v9559_v28  ;;  %3608 = vmatprep.mubr.bf16.mxu0 %v11804_v45  ;;  %v871_v28 = vld [vmem:[#allocation9 + $0x98] sm:$0xff]  ;;  %v9185_v12 = vcombine.high %v870_v25, %v874_v26  ;;  %v9184_v47 = vcombine.low %v870_v25, %v874_v26  ;;  %v914_v25 = vld [vmem:[#allocation9 + $0x1f0] sm:$0xff] }
 0x28e   : > { %3780 = vmatprep.mubr.bf16.mxu1 %v11804_v45  ;;  %v9187_v31 = vcombine.high %v871_v28, %v875_v29  ;;  %v911_v26 = vld [vmem:[#allocation9 + $0x1d8] sm:$0xff] }
 0x28f   : > { %3579 = vmatpush1.bf16.msra.mxu0 %v9556_v33  ;;  %v882_v33 = vld [vmem:[#allocation9 + $0xf0] sm:$0xff] }
 0x290   : > { %3751 = vmatpush1.bf16.msra.mxu1 %v9558_v34  ;;  %3580 = vmatprep.subr.bf16.mxu0 %v9565_v35  ;;  %v566_v34 = vrot.slane %v12347_v14, 6  ;;  %v567_v35 = vrot.slane %v12350_v15, 6 }
 0x291   : > { %3752 = vmatprep.subr.bf16.mxu1 %v9567_v36  ;;  %v569_v36 = vrot.slane %v12342_v7, 6 }
 0x292   : > { %v568_v48 = vsel %vm565_vm5, %v566_v34, %v567_v35 }
 0x293   : > { %3581 = vmatpush1.bf16.msra.mxu0 %v9564_v49  ;;  %v570_v49 = vsel %vm565_vm5, %v567_v35, %v569_v36  ;;  %vm601_vm5 = vcmask 588800  }
 0x294   : > { %3753 = vmatpush1.bf16.msra.mxu1 %v9566_v50  ;;  %3582 = vmatprep.subr.bf16.mxu0 %v9573_v51  ;;  %v9193_v50 = vcombine.high %v878_v32, %v882_v33  ;;  %v10551_v51 = vpack.i.bf16 %v570_v49, %v568_v48  ;;  %v927_v48 = vld [vmem:[#allocation9 + $0x258] sm:$0xff] }
 0x295   : > { %3754 = vmatprep.subr.bf16.mxu1 %v9575_v52  ;;  %v578_v52 = vrot.slane %v12347_v14, 7  ;;  %v931_v49 = vld [vmem:[#allocation9 + $0x278] sm:$0xff] }
 0x296   : > { %10552 = vrot.lane.b32.xlu1 %v10551_v51, %s11795_s14 }
 0x297   : > { %3583 = vmatpush1.bf16.msra.mxu0 %v9572_v61  ;;  %v581_v61 = vrot.slane %v12342_v7, 7  ;;  %v580_v1 = vsel %vm577_vm8, %v578_v52, %v579_v60  ;;  %v9243_v52 = vcombine.high %v927_v48, %v931_v49 }
 0x298   : > { %3755 = vmatpush1.bf16.msra.mxu1 %v9574_v62  ;;  %3584 = vmatprep.subr.bf16.mxu0 %v9581_v63  ;;  %v887_v62 = vld [vmem:[#allocation9 + $0x118] sm:$0xff] }
 0x299   : > { %3756 = vmatprep.subr.bf16.mxu1 %v9583_v0  ;;  %v891_v63 = vld [vmem:[#allocation9 + $0x138] sm:$0xff]  ;;  %v9192_v0 = vcombine.low %v878_v32, %v882_v33  ;;  %v582_v46 = vsel %vm577_vm8, %v579_v60, %v581_v61 }
 0x29a   : > { %v919_v32 = vld [vmem:[#allocation9 + $0x218] sm:$0xff] }
 0x29b   : > { %3585 = vmatpush1.bf16.msra.mxu0 %v9580_v43  ;;  %v10561_v43 = vpack.i.bf16 %v582_v46, %v580_v1  ;;  %v923_v33 = vld [vmem:[#allocation9 + $0x238] sm:$0xff]  ;;  %v942_v1 = vld [vmem:[#allocation9 + $0x2d0] sm:$0xff] }
 0x29c   : > { %3757 = vmatpush1.bf16.msra.mxu1 %v9582_v44  ;;  %3586 = vmatprep.subr.bf16.mxu0 %v9589_v54  ;;  %v9203_v44 = vcombine.high %v887_v62, %v891_v63  ;;  %v894_v54 = vld [vmem:[#allocation9 + $0x150] sm:$0xff]  ;;  %v9235_v4 = vcombine.high %v919_v32, %v923_v33  ;;  %v939_v60 = vld [vmem:[#allocation9 + $0x2b8] sm:$0xff] }
 0x29d   : > { %3758 = vmatprep.subr.bf16.mxu1 %v9591_v56  ;;  %v898_v56 = vld [vmem:[#allocation9 + $0x170] sm:$0xff]  ;;  %10562 = vrot.lane.b32.xlu1 %v10561_v43, %s11805_s16  ;;  %s11692_s16 = sshll.u32 %s11806_s9, 4  ;;  %s11693_s16 = int_to_ptr.vmem [resolvable:$false] %s11692_s16 }
 0x29e   : > { %v9208_v17 = vcombine.low %v894_v54, %v898_v56  ;;  %v946_v46 = vld [vmem:[#allocation9 + $0x2f0] sm:$0xff] }
 0x29f   : > { %3587 = vmatpush1.bf16.msra.mxu0 %v9588_v6  ;;  %v9202_v6 = vcombine.low %v887_v62, %v891_v63  ;;  %v9242_v62 = vcombine.low %v927_v48, %v931_v49  ;;  %v986_v48 = vld [vmem:[#allocation9 + $0x430] sm:$0xff]  ;;  %v983_v49 = vld [vmem:[#allocation9 + $0x418] sm:$0xff] }
 0x2a0   : > { %3759 = vmatpush1.bf16.msra.mxu1 %v9590_v8  ;;  %3791 = vmatprep.subr.bf16.mxu0 %v9169_v9  ;;  %v9209_v8 = vcombine.high %v894_v54, %v898_v56  ;;  %v9211_v9 = vcombine.high %v895_v19, %v899_v21  ;;  %v9257_v54 = vcombine.high %v942_v1, %v946_v46  ;;  %v950_v19 = vld [vmem:[#allocation9 + $0x310] sm:$0xff] }
 0x2a1   : > { %3963 = vmatprep.subr.bf16.mxu1 %v9171_v10  ;;  %v902_v10 = vld [vmem:[#allocation9 + $0x190] sm:$0xff]  ;;  %10572 = vrot.lane.b32.xlu1 %v10571_v22, %s11797_s21  ;;  %v951_v22 = vld [vmem:[#allocation9 + $0x318] sm:$0xff] }
 0x2a2   : > { %9596 = vmatmul.mubr.msk.bf16.vlgmr.msra.gmra.mrb[0].mxu0 %vm604_vm9, %v12399_v20  ;;  %v9217_v7 = vcombine.high %v902_v10, %v906_v11  ;;  %v954_v21 = vld [vmem:[#allocation9 + $0x330] sm:$0xff] }
 0x2a3   : > { %9597 = vmatmul.mubr.msk.bf16.vlgmr.msra.gmra.mrb[0].mxu1 %vm604_vm9, %v12399_v20  ;;  %3792 = vmatpush1.bf16.msra.mxu0 %v9168_v16  ;;  %v907_v16 = vld [vmem:[#allocation9 + $0x1b8] sm:$0xff] }
 0x2a4   : > { %3823 = vmatprep.mubr.bf16.mxu0 %v12316_v39  ;;  %3964 = vmatpush1.bf16.msra.mxu1 %v9170_v23  ;;  %v9219_v23 = vcombine.high %v903_v13, %v907_v16 }
 0x2a5   : > { %3995 = vmatprep.mubr.bf16.mxu1 %v12316_v39  ;;  %3793 = vmatprep.subr.bf16.mxu0 %v9177_v24  ;;  %v9186_v39 = vcombine.low %v871_v28, %v875_v29  ;;  %v910_v24 = vld [vmem:[#allocation9 + $0x1d0] sm:$0xff]  ;;  %v9216_v28 = vcombine.low %v902_v10, %v906_v11  ;;  %v9218_v29 = vcombine.low %v903_v13, %v907_v16  ;;  %v959_v16 = vld [vmem:[#allocation9 + $0x358] sm:$0xff] }
 0x2a6   : > { %3965 = vmatprep.subr.bf16.mxu1 %v9179_v27  ;;  %v915_v27 = vld [vmem:[#allocation9 + $0x1f8] sm:$0xff]  ;;  %v9224_v34 = vcombine.low %v910_v24, %v914_v25  ;;  %v958_v11 = vld [vmem:[#allocation9 + $0x350] sm:$0xff] }
 0x2a7   : > { %3794 = vmatpush1.bf16.msra.mxu0 %v9176_v30  ;;  %v9225_v30 = vcombine.high %v910_v24, %v914_v25  ;;  %v9226_v35 = vcombine.low %v911_v26, %v915_v27  ;;  %v962_v13 = vld [vmem:[#allocation9 + $0x370] sm:$0xff] }
 0x2a8   : > { %3966 = vmatpush1.bf16.msra.mxu1 %v9178_v5  ;;  %3795 = vmatprep.subr.bf16.mxu0 %v9185_v12  ;;  %v9227_v5 = vcombine.high %v911_v26, %v915_v27  ;;  %v918_v12 = vld [vmem:[#allocation9 + $0x210] sm:$0xff]  ;;  %v967_v27 = vld [vmem:[#allocation9 + $0x398] sm:$0xff] }
 0x2a9   : > { %3967 = vmatprep.subr.bf16.mxu1 %v9187_v31  ;;  %v922_v31 = vld [vmem:[#allocation9 + $0x230] sm:$0xff] }
 0x2aa   : > { %v9233_v36 = vcombine.high %v918_v12, %v922_v31  ;;  %v966_v25 = vld [vmem:[#allocation9 + $0x390] sm:$0xff] }
 0x2ab   : > { %3796 = vmatpush1.bf16.msra.mxu0 %v9184_v47  ;;  %v930_v47 = vld [vmem:[#allocation9 + $0x270] sm:$0xff] }
 0x2ac   : > { %3968 = vmatpush1.bf16.msra.mxu1 %v9186_v39  ;;  %3797 = vmatprep.subr.bf16.mxu0 %v9193_v50  ;;  %v9232_v39 = vcombine.low %v918_v12, %v922_v31  ;;  %v9234_v50 = vcombine.low %v919_v32, %v923_v33  ;;  %v9241_v51 = vcombine.high %v926_v40, %v930_v47  ;;  %v970_v26 = vld [vmem:[#allocation9 + $0x3b0] sm:$0xff]  ;;  %v975_v33 = vld [vmem:[#allocation9 + $0x3d8] sm:$0xff] }
 0x2ad   : > { %3969 = vmatprep.subr.bf16.mxu1 %v9195_v55  ;;  %v934_v55 = vld [vmem:[#allocation9 + $0x290] sm:$0xff]  ;;  %v9240_v61 = vcombine.low %v926_v40, %v930_v47 }
 0x2ae   : > { %v9249_v63 = vcombine.high %v934_v55, %v938_v57  ;;  %v9248_v43 = vcombine.low %v934_v55, %v938_v57  ;;  %v974_v31 = vld [vmem:[#allocation9 + $0x3d0] sm:$0xff] }
 0x2af   : > { %3798 = vmatpush1.bf16.msra.mxu0 %v9192_v0  ;;  %v9251_v0 = vcombine.high %v935_v59, %v939_v60  ;;  %v978_v32 = vld [vmem:[#allocation9 + $0x3f0] sm:$0xff] }
 0x2b0   : > { %3970 = vmatpush1.bf16.msra.mxu1 %v9194_v2  ;;  %3799 = vmatprep.subr.bf16.mxu0 %v9201_v37  ;;  %v943_v2 = vld [vmem:[#allocation9 + $0x2d8] sm:$0xff]  ;;  %v982_v47 = vld [vmem:[#allocation9 + $0x410] sm:$0xff] }
 0x2b1   : > { %3971 = vmatprep.subr.bf16.mxu1 %v9203_v44  ;;  %v947_v37 = vld [vmem:[#allocation9 + $0x2f8] sm:$0xff]  ;;  %v9250_v44 = vcombine.low %v935_v59, %v939_v60  ;;  %v990_v57 = vld [vmem:[#allocation9 + $0x450] sm:$0xff]  ;;  %v9296_v60 = vcombine.low %v982_v47, %v986_v48 }
 0x2b2   : > { %v9259_v56 = vcombine.high %v943_v2, %v947_v37  ;;  %v994_v59 = vld [vmem:[#allocation9 + $0x470] sm:$0xff] }
 0x2b3   : > { %3800 = vmatpush1.bf16.msra.mxu0 %v9200_v3  ;;  %v955_v3 = vld [vmem:[#allocation9 + $0x338] sm:$0xff] }
 0x2b4   : > { %3972 = vmatpush1.bf16.msra.mxu1 %v9202_v6  ;;  %3801 = vmatprep.subr.bf16.mxu0 %v9209_v8  ;;  %v9256_v6 = vcombine.low %v942_v1, %v946_v46  ;;  %v9258_v8 = vcombine.low %v943_v2, %v947_v37  ;;  %v9267_v10 = vcombine.high %v951_v22, %v955_v3  ;;  %v998_v1 = vld [vmem:[#allocation9 + $0x490] sm:$0xff]  ;;  %v999_v37 = vld [vmem:[#allocation9 + $0x498] sm:$0xff] }
 0x2b5   : > { %3973 = vmatprep.subr.bf16.mxu1 %v9211_v9  ;;  %v9265_v9 = vcombine.high %v950_v19, %v954_v21  ;;  %v1002_v46 = vld [vmem:[#allocation9 + $0x4b0] sm:$0xff] }
 0x2b7   : > { %3802 = vmatpush1.bf16.msra.mxu0 %v9208_v17  ;;  %v963_v17 = vld [vmem:[#allocation9 + $0x378] sm:$0xff] }
 0x2b8   : > { %3974 = vmatpush1.bf16.msra.mxu1 %v9210_v18  ;;  %3803 = vmatprep.subr.bf16.mxu0 %v9217_v7  ;;  %v9264_v18 = vcombine.low %v950_v19, %v954_v21  ;;  %v9266_v7 = vcombine.low %v951_v22, %v955_v3  ;;  %v9275_v24 = vcombine.high %v959_v16, %v963_v17  ;;  %v1006_v21 = vld [vmem:[#allocation9 + $0x4d0] sm:$0xff]  ;;  %v1007_v3 = vld [vmem:[#allocation9 + $0x4d8] sm:$0xff] }
 0x2b9   : > { %3975 = vmatprep.subr.bf16.mxu1 %v9219_v23  ;;  %v9273_v23 = vcombine.high %v958_v11, %v962_v13  ;;  %v1010_v22 = vld [vmem:[#allocation9 + $0x4f0] sm:$0xff] }
 0x2bb   : > { %3804 = vmatpush1.bf16.msra.mxu0 %v9216_v28  ;;  %v971_v28 = vld [vmem:[#allocation9 + $0x3b8] sm:$0xff] }
 0x2bc   : > { %3976 = vmatpush1.bf16.msra.mxu1 %v9218_v29  ;;  %3805 = vmatprep.subr.bf16.mxu0 %v9225_v30  ;;  %v9272_v29 = vcombine.low %v958_v11, %v962_v13  ;;  %v9274_v30 = vcombine.low %v959_v16, %v963_v17  ;;  %v9283_v12 = vcombine.high %v967_v27, %v971_v28  ;;  %v1014_v11 = vld [vmem:[#allocation9 + $0x510] sm:$0xff]  ;;  %v1015_v16 = vld [vmem:[#allocation9 + $0x518] sm:$0xff] }
 0x2bd   : > { %3977 = vmatprep.subr.bf16.mxu1 %v9227_v5  ;;  %v9281_v5 = vcombine.high %v966_v25, %v970_v26  ;;  %v1018_v13 = vld [vmem:[#allocation9 + $0x530] sm:$0xff]  ;;  %v1019_v17 = vld [vmem:[#allocation9 + $0x538] sm:$0xff] }
 0x2bf   : > { %3806 = vmatpush1.bf16.msra.mxu0 %v9224_v34  ;;  %v979_v34 = vld [vmem:[#allocation9 + $0x3f8] sm:$0xff] }
 0x2c0   : > { %3978 = vmatpush1.bf16.msra.mxu1 %v9226_v35  ;;  %3807 = vmatprep.subr.bf16.mxu0 %v9233_v36  ;;  %v9280_v35 = vcombine.low %v966_v25, %v970_v26  ;;  %v9282_v36 = vcombine.low %v967_v27, %v971_v28  ;;  %v9291_v40 = vcombine.high %v975_v33, %v979_v34  ;;  %v1026_v25 = vld [vmem:[#allocation9 + $0x570] sm:$0xff]  ;;  %v1023_v26 = vld [vmem:[#allocation9 + $0x558] sm:$0xff] }
 0x2c1   : > { %3979 = vmatprep.subr.bf16.mxu1 %v9235_v4  ;;  %v9289_v4 = vcombine.high %v974_v31, %v978_v32  ;;  %v1027_v27 = vld [vmem:[#allocation9 + $0x578] sm:$0xff]  ;;  %v9328_v28 = vcombine.low %v1014_v11, %v1018_v13 }
 0x2c3   : > { %3808 = vmatpush1.bf16.msra.mxu0 %v9232_v39  ;;  %v987_v39 = vld [vmem:[#allocation9 + $0x438] sm:$0xff] }
 0x2c4   : > { %3980 = vmatpush1.bf16.msra.mxu1 %v9234_v50  ;;  %3809 = vmatprep.subr.bf16.mxu0 %v9241_v51  ;;  %v9288_v50 = vcombine.low %v974_v31, %v978_v32  ;;  %v9290_v51 = vcombine.low %v975_v33, %v979_v34  ;;  %v9299_v55 = vcombine.high %v983_v49, %v987_v39  ;;  %v1034_v31 = vld [vmem:[#allocation9 + $0x5b0] sm:$0xff]  ;;  %v1031_v32 = vld [vmem:[#allocation9 + $0x598] sm:$0xff] }
 0x2c5   : > { %3981 = vmatprep.subr.bf16.mxu1 %v9243_v52  ;;  %v9297_v52 = vcombine.high %v982_v47, %v986_v48  ;;  %v1035_v33 = vld [vmem:[#allocation9 + $0x5b8] sm:$0xff]  ;;  %v1042_v47 = vld [vmem:[#allocation9 + $0x5f0] sm:$0xff] }
 0x2c6   : > { %v1039_v48 = vld [vmem:[#allocation9 + $0x5d8] sm:$0xff] }
 0x2c7   : > { %3810 = vmatpush1.bf16.msra.mxu0 %v9240_v61  ;;  %v991_v61 = vld [vmem:[#allocation9 + $0x458] sm:$0xff] }
 0x2c8   : > { %3982 = vmatpush1.bf16.msra.mxu1 %v9242_v62  ;;  %3811 = vmatprep.subr.bf16.mxu0 %v9249_v63  ;;  %v995_v62 = vld [vmem:[#allocation9 + $0x478] sm:$0xff]  ;;  %v9298_v63 = vcombine.low %v983_v49, %v987_v39 }
 0x2c9   : > { %3983 = vmatprep.subr.bf16.mxu1 %v9251_v0  ;;  %v9305_v0 = vcombine.high %v990_v57, %v994_v59  ;;  %v9307_v2 = vcombine.high %v991_v61, %v995_v62  ;;  %v1043_v49 = vld [vmem:[#allocation9 + $0x5f8] sm:$0xff] }
 0x2cb   : > { %3812 = vmatpush1.bf16.msra.mxu0 %v9248_v43  ;;  %v1003_v43 = vld [vmem:[#allocation9 + $0x4b8] sm:$0xff] }
 0x2cc   : > { %3984 = vmatpush1.bf16.msra.mxu1 %v9250_v44  ;;  %3813 = vmatprep.subr.bf16.mxu0 %v9257_v54  ;;  %v9304_v44 = vcombine.low %v990_v57, %v994_v59  ;;  %v9306_v54 = vcombine.low %v991_v61, %v995_v62  ;;  %v9315_v19 = vcombine.high %v999_v37, %v1003_v43  ;;  %v1050_v57 = vld [vmem:[#allocation9 + $0x630] sm:$0xff]  ;;  %v1047_v59 = vld [vmem:[#allocation9 + $0x618] sm:$0xff] }
 0x2cd   : > { %3985 = vmatprep.subr.bf16.mxu1 %v9259_v56  ;;  %v9313_v56 = vcombine.high %v998_v1, %v1002_v46  ;;  %v9354_v62 = vcombine.low %v1039_v48, %v1043_v49 }
 0x2cf   : > { %3814 = vmatpush1.bf16.msra.mxu0 %v9256_v6  ;;  %v1011_v6 = vld [vmem:[#allocation9 + $0x4f8] sm:$0xff] }
 0x2d0   : > { %3986 = vmatpush1.bf16.msra.mxu1 %v9258_v8  ;;  %3815 = vmatprep.subr.bf16.mxu0 %v9265_v9  ;;  %v9312_v8 = vcombine.low %v998_v1, %v1002_v46  ;;  %v9321_v9 = vcombine.high %v1006_v21, %v1010_v22  ;;  %v1054_v1 = vld [vmem:[#allocation9 + $0x650] sm:$0xff] }
 0x2d1   : > { %3987 = vmatprep.subr.bf16.mxu1 %v9267_v10  ;;  %v9323_v10 = vcombine.high %v1007_v3, %v1011_v6  ;;  %v1058_v46 = vld [vmem:[#allocation9 + $0x670] sm:$0xff] }
 0x2d3   : > { %3816 = vmatpush1.bf16.msra.mxu0 %v9264_v18  ;;  %v9322_v18 = vcombine.low %v1007_v3, %v1011_v6  ;;  %v1067_v3 = vld [vmem:[#allocation9 + $0x6b8] sm:$0xff]  ;;  %v9368_v6 = vcombine.low %v1054_v1, %v1058_v46 }
 0x2d4   : > { %3988 = vmatpush1.bf16.msra.mxu1 %v9266_v7  ;;  %3817 = vmatprep.subr.bf16.mxu0 %v9273_v23  ;;  %v9329_v7 = vcombine.high %v1014_v11, %v1018_v13  ;;  %v9331_v23 = vcombine.high %v1015_v16, %v1019_v17  ;;  %v1074_v11 = vld [vmem:[#allocation9 + $0x6f0] sm:$0xff]  ;;  %v1071_v13 = vld [vmem:[#allocation9 + $0x6d8] sm:$0xff] }
 0x2d5   : > { %3989 = vmatprep.subr.bf16.mxu1 %v9275_v24  ;;  %v1022_v24 = vld [vmem:[#allocation9 + $0x550] sm:$0xff] }
 0x2d6   : > { %v9336_v34 = vcombine.low %v1022_v24, %v1026_v25 }
 0x2d7   : > { %3818 = vmatpush1.bf16.msra.mxu0 %v9272_v29  ;;  %v9330_v29 = vcombine.low %v1015_v16, %v1019_v17  ;;  %v1075_v16 = vld [vmem:[#allocation9 + $0x6f8] sm:$0xff] }
 0x2d8   : > { %3990 = vmatpush1.bf16.msra.mxu1 %v9274_v30  ;;  %3819 = vmatprep.subr.bf16.mxu0 %v9281_v5  ;;  %v9337_v30 = vcombine.high %v1022_v24, %v1026_v25  ;;  %v9339_v5 = vcombine.high %v1023_v26, %v1027_v27  ;;  %v1082_v24 = vld [vmem:[#allocation9 + $0x730] sm:$0xff]  ;;  %v1079_v25 = vld [vmem:[#allocation9 + $0x718] sm:$0xff] }
 0x2d9   : > { %3991 = vmatprep.subr.bf16.mxu1 %v9283_v12  ;;  %v1030_v12 = vld [vmem:[#allocation9 + $0x590] sm:$0xff] }
 0x2da   : > { %v9344_v39 = vcombine.low %v1030_v12, %v1034_v31 }
 0x2db   : > { %3820 = vmatpush1.bf16.msra.mxu0 %v9280_v35  ;;  %v9338_v35 = vcombine.low %v1023_v26, %v1027_v27  ;;  %v1083_v26 = vld [vmem:[#allocation9 + $0x738] sm:$0xff] }
 0x2dc   : > { %3992 = vmatpush1.bf16.msra.mxu1 %v9282_v36  ;;  %3821 = vmatprep.subr.bf16.mxu0 %v9289_v4  ;;  %v9345_v36 = vcombine.high %v1030_v12, %v1034_v31  ;;  %v9347_v4 = vcombine.high %v1031_v32, %v1035_v33  ;;  %v1090_v12 = vld [vmem:[#allocation9 + $0x770] sm:$0xff]  ;;  %v1087_v31 = vld [vmem:[#allocation9 + $0x758] sm:$0xff] }
 0x2dd   : > { %3993 = vmatprep.subr.bf16.mxu1 %v9291_v40  ;;  %v1038_v40 = vld [vmem:[#allocation9 + $0x5d0] sm:$0xff] }
 0x2de   : > { %v9352_v61 = vcombine.low %v1038_v40, %v1042_v47 }
 0x2df   : > { %3822 = vmatpush1.bf16.msra.mxu0 %v9288_v50  ;;  %v9346_v50 = vcombine.low %v1031_v32, %v1035_v33  ;;  %v1091_v32 = vld [vmem:[#allocation9 + $0x778] sm:$0xff] }
 0x2e0   : > { %3994 = vmatpush1.bf16.msra.mxu1 %v9290_v51  ;;  %3834 = vmatprep.subr.bf16.mxu0 %v9297_v52  ;;  %v9353_v51 = vcombine.high %v1038_v40, %v1042_v47  ;;  %v9355_v52 = vcombine.high %v1039_v48, %v1043_v49  ;;  %v1098_v40 = vld [vmem:[#allocation9 + $0x7b0] sm:$0xff]  ;;  %v1095_v47 = vld [vmem:[#allocation9 + $0x798] sm:$0xff] }
 0x2e1   : > { %4006 = vmatprep.subr.bf16.mxu1 %v9299_v55  ;;  %v1046_v55 = vld [vmem:[#allocation9 + $0x610] sm:$0xff]  ;;  %v1099_v48 = vld [vmem:[#allocation9 + $0x7b8] sm:$0xff] }
 0x2e2   : > { %3824 = vmatmul.mubr.bf16.vlgmr.msra.gmra.mrb[4].mxu0 %v12318_v41 }
 0x2e3   : > { %3996 = vmatmul.mubr.bf16.vlgmr.msra.gmra.mrb[4].mxu1 %v12318_v41  ;;  %3835 = vmatpush1.bf16.msra.mxu0 %v9296_v60  ;;  %v9314_v41 = vcombine.low %v999_v37, %v1003_v43  ;;  %v1051_v60 = vld [vmem:[#allocation9 + $0x638] sm:$0xff]  ;;  %v9360_v43 = vcombine.low %v1046_v55, %v1050_v57 }
 0x2e4   : > { %3866 = vmatprep.mubr.bf16.mxu0 %v12322_v53  ;;  %4007 = vmatpush1.bf16.msra.mxu1 %v9298_v63  ;;  %v9361_v63 = vcombine.high %v1046_v55, %v1050_v57  ;;  %v1059_v37 = vld [vmem:[#allocation9 + $0x678] sm:$0xff]  ;;  %v1106_v55 = vld [vmem:[#allocation9 + $0x7f0] sm:$0xff] }
 0x2e5   : > { %4038 = vmatprep.mubr.bf16.mxu1 %v12322_v53  ;;  %3836 = vmatprep.subr.bf16.mxu0 %v9305_v0  ;;  %v9320_v53 = vcombine.low %v1006_v21, %v1010_v22  ;;  %v9363_v0 = vcombine.high %v1047_v59, %v1051_v60  ;;  %v1066_v21 = vld [vmem:[#allocation9 + $0x6b0] sm:$0xff]  ;;  %v1063_v22 = vld [vmem:[#allocation9 + $0x698] sm:$0xff] }
 0x2e6   : > { %4008 = vmatprep.subr.bf16.mxu1 %v9307_v2  ;;  %v1055_v2 = vld [vmem:[#allocation9 + $0x658] sm:$0xff] }
 0x2e7   : > { %3837 = vmatpush1.bf16.msra.mxu0 %v9304_v44  ;;  %v9362_v44 = vcombine.low %v1047_v59, %v1051_v60  ;;  %v1103_v57 = vld [vmem:[#allocation9 + $0x7d8] sm:$0xff] }
 0x2e8   : > { %4009 = vmatpush1.bf16.msra.mxu1 %v9306_v54  ;;  %3838 = vmatprep.subr.bf16.mxu0 %v9313_v56  ;;  %v9369_v54 = vcombine.high %v1054_v1, %v1058_v46  ;;  %v9371_v56 = vcombine.high %v1055_v2, %v1059_v37  ;;  %v1107_v59 = vld [vmem:[#allocation9 + $0x7f8] sm:$0xff]  ;;  %v1114_v1 = vld [vmem:[#allocation9 + $0x830] sm:$0xff] }
 0x2e9   : > { %4010 = vmatprep.subr.bf16.mxu1 %v9315_v19  ;;  %v1062_v19 = vld [vmem:[#allocation9 + $0x690] sm:$0xff]  ;;  %v1111_v46 = vld [vmem:[#allocation9 + $0x818] sm:$0xff] }
 0x2ea   : > { %v9376_v17 = vcombine.low %v1062_v19, %v1066_v21 }
 0x2eb   : > { %3839 = vmatpush1.bf16.msra.mxu0 %v9312_v8  ;;  %v9370_v8 = vcombine.low %v1055_v2, %v1059_v37  ;;  %v1115_v2 = vld [vmem:[#allocation9 + $0x838] sm:$0xff] }
 0x2ec   : > { %4011 = vmatpush1.bf16.msra.mxu1 %v9314_v41  ;;  %3840 = vmatprep.subr.bf16.mxu0 %v9321_v9  ;;  %v9377_v41 = vcombine.high %v1062_v19, %v1066_v21  ;;  %v9379_v9 = vcombine.high %v1063_v22, %v1067_v3  ;;  %v1122_v19 = vld [vmem:[#allocation9 + $0x870] sm:$0xff] }
 0x2ed   : > { %4012 = vmatprep.subr.bf16.mxu1 %v9323_v10  ;;  %v1070_v10 = vld [vmem:[#allocation9 + $0x6d0] sm:$0xff] }
 0x2ee   : > { %v9384_v27 = vcombine.low %v1070_v10, %v1074_v11 }
 0x2ef   : > { %3841 = vmatpush1.bf16.msra.mxu0 %v9320_v53  ;;  %v9378_v53 = vcombine.low %v1063_v22, %v1067_v3  ;;  %v1119_v22 = vld [vmem:[#allocation9 + $0x858] sm:$0xff] }
 0x2f0   : > { %4013 = vmatpush1.bf16.msra.mxu1 %v9322_v18  ;;  %3842 = vmatprep.subr.bf16.mxu0 %v9329_v7  ;;  %v9385_v18 = vcombine.high %v1070_v10, %v1074_v11  ;;  %v9387_v7 = vcombine.high %v1071_v13, %v1075_v16  ;;  %v1123_v3 = vld [vmem:[#allocation9 + $0x878] sm:$0xff] }
 0x2f1   : > { %4014 = vmatprep.subr.bf16.mxu1 %v9331_v23  ;;  %v1078_v23 = vld [vmem:[#allocation9 + $0x710] sm:$0xff]  ;;  %v9435_v10 = vcombine.high %v1119_v22, %v1123_v3  ;;  %v1127_v11 = vld [vmem:[#allocation9 + $0x898] sm:$0xff] }
 0x2f2   : > { %v9392_v33 = vcombine.low %v1078_v23, %v1082_v24 }
 0x2f3   : > { %3843 = vmatpush1.bf16.msra.mxu0 %v9328_v28  ;;  %v9386_v28 = vcombine.low %v1071_v13, %v1075_v16  ;;  %v1131_v13 = vld [vmem:[#allocation9 + $0x8b8] sm:$0xff] }
 0x2f4   : > { %4015 = vmatpush1.bf16.msra.mxu1 %v9330_v29  ;;  %3844 = vmatprep.subr.bf16.mxu0 %v9337_v30  ;;  %v9393_v29 = vcombine.high %v1078_v23, %v1082_v24  ;;  %v9395_v30 = vcombine.high %v1079_v25, %v1083_v26  ;;  %v1138_v23 = vld [vmem:[#allocation9 + $0x8f0] sm:$0xff]  ;;  %v1135_v24 = vld [vmem:[#allocation9 + $0x8d8] sm:$0xff] }
 0x2f5   : > { %4016 = vmatprep.subr.bf16.mxu1 %v9339_v5  ;;  %v1086_v5 = vld [vmem:[#allocation9 + $0x750] sm:$0xff] }
 0x2f6   : > { %v9400_v49 = vcombine.low %v1086_v5, %v1090_v12 }
 0x2f7   : > { %3845 = vmatpush1.bf16.msra.mxu0 %v9336_v34  ;;  %v9394_v34 = vcombine.low %v1079_v25, %v1083_v26  ;;  %v1139_v25 = vld [vmem:[#allocation9 + $0x8f8] sm:$0xff] }
 0x2f8   : > { %4017 = vmatpush1.bf16.msra.mxu1 %v9338_v35  ;;  %3846 = vmatprep.subr.bf16.mxu0 %v9345_v36  ;;  %v9401_v35 = vcombine.high %v1086_v5, %v1090_v12  ;;  %v9403_v36 = vcombine.high %v1087_v31, %v1091_v32  ;;  %v1143_v5 = vld [vmem:[#allocation9 + $0x918] sm:$0xff] }
 0x2f9   : > { %4018 = vmatprep.subr.bf16.mxu1 %v9347_v4  ;;  %v1094_v4 = vld [vmem:[#allocation9 + $0x790] sm:$0xff]  ;;  %v1147_v12 = vld [vmem:[#allocation9 + $0x938] sm:$0xff] }
 0x2fa   : > { %v9408_v60 = vcombine.low %v1094_v4, %v1098_v40 }
 0x2fb   : > { %3847 = vmatpush1.bf16.msra.mxu0 %v9344_v39  ;;  %v9402_v39 = vcombine.low %v1087_v31, %v1091_v32  ;;  %v9450_v31 = vcombine.low %v1135_v24, %v1139_v25 }
 0x2fc   : > { %4019 = vmatpush1.bf16.msra.mxu1 %v9346_v50  ;;  %3848 = vmatprep.subr.bf16.mxu0 %v9353_v51  ;;  %v9409_v50 = vcombine.high %v1094_v4, %v1098_v40  ;;  %v9411_v51 = vcombine.high %v1095_v47, %v1099_v48  ;;  %v1155_v4 = vld [vmem:[#allocation9 + $0x978] sm:$0xff] }
 0x2fd   : > { %4020 = vmatprep.subr.bf16.mxu1 %v9355_v52  ;;  %v1102_v52 = vld [vmem:[#allocation9 + $0x7d0] sm:$0xff] }
 0x2fe   : > { %v9416_v37 = vcombine.low %v1102_v52, %v1106_v55 }
 0x2ff   : > { %3849 = vmatpush1.bf16.msra.mxu0 %v9352_v61  ;;  %v9410_v61 = vcombine.low %v1095_v47, %v1099_v48  ;;  %v9458_v47 = vcombine.low %v1143_v5, %v1147_v12 }
 0x300   : > { %4021 = vmatpush1.bf16.msra.mxu1 %v9354_v62  ;;  %3850 = vmatprep.subr.bf16.mxu0 %v9361_v63  ;;  %v9417_v62 = vcombine.high %v1102_v52, %v1106_v55  ;;  %v9419_v63 = vcombine.high %v1103_v57, %v1107_v59  ;;  %v1163_v52 = vld [vmem:[#allocation9 + $0x9b8] sm:$0xff] }
 0x301   : > { %4022 = vmatprep.subr.bf16.mxu1 %v9363_v0  ;;  %v1110_v0 = vld [vmem:[#allocation9 + $0x810] sm:$0xff] }
 0x302   : > { %v9424_v21 = vcombine.low %v1110_v0, %v1114_v1 }
 0x303   : > { %3851 = vmatpush1.bf16.msra.mxu0 %v9360_v43  ;;  %v9418_v43 = vcombine.low %v1103_v57, %v1107_v59 }
 0x304   : > { %4023 = vmatpush1.bf16.msra.mxu1 %v9362_v44  ;;  %3852 = vmatprep.subr.bf16.mxu0 %v9369_v54  ;;  %v9425_v44 = vcombine.high %v1110_v0, %v1114_v1  ;;  %v9427_v54 = vcombine.high %v1111_v46, %v1115_v2  ;;  %v1171_v0 = vld [vmem:[#allocation9 + $0x9f8] sm:$0xff] }
 0x305   : > { %4024 = vmatprep.subr.bf16.mxu1 %v9371_v56  ;;  %v1118_v56 = vld [vmem:[#allocation9 + $0x850] sm:$0xff] }
 0x306   : > { %v9432_v16 = vcombine.low %v1118_v56, %v1122_v19 }
 0x307   : > { %3853 = vmatpush1.bf16.msra.mxu0 %v9368_v6  ;;  %v9426_v6 = vcombine.low %v1111_v46, %v1115_v2 }
 0x308   : > { %4025 = vmatpush1.bf16.msra.mxu1 %v9370_v8  ;;  %3854 = vmatprep.subr.bf16.mxu0 %v9377_v41  ;;  %v9433_v8 = vcombine.high %v1118_v56, %v1122_v19  ;;  %v1126_v41 = vld [vmem:[#allocation9 + $0x890] sm:$0xff]  ;;  %v1179_v56 = vld [vmem:[#allocation9 + $0xa38] sm:$0xff] }
 0x309   : > { %4026 = vmatprep.subr.bf16.mxu1 %v9379_v9  ;;  %v1130_v9 = vld [vmem:[#allocation9 + $0x8b0] sm:$0xff] }
 0x30a   : > { %v9440_v26 = vcombine.low %v1126_v41, %v1130_v9 }
 0x30b   : > { %3855 = vmatpush1.bf16.msra.mxu0 %v9376_v17  ;;  %v9434_v17 = vcombine.low %v1119_v22, %v1123_v3 }
 0x30c   : > { %4027 = vmatpush1.bf16.msra.mxu1 %v9378_v53  ;;  %3856 = vmatprep.subr.bf16.mxu0 %v9385_v18  ;;  %v9441_v53 = vcombine.high %v1126_v41, %v1130_v9  ;;  %v9443_v18 = vcombine.high %v1127_v11, %v1131_v13  ;;  %v1183_v41 = vld [vmem:[#allocation9 + $0xa58] sm:$0xff] }
 0x30d   : > { %4028 = vmatprep.subr.bf16.mxu1 %v9387_v7  ;;  %v1134_v7 = vld [vmem:[#allocation9 + $0x8d0] sm:$0xff]  ;;  %v1187_v9 = vld [vmem:[#allocation9 + $0xa78] sm:$0xff] }
 0x30f   : > { %3857 = vmatpush1.bf16.msra.mxu0 %v9384_v27  ;;  %v9449_v27 = vcombine.high %v1134_v7, %v1138_v23 }
 0x310   : > { %4029 = vmatpush1.bf16.msra.mxu1 %v9386_v28  ;;  %3858 = vmatprep.subr.bf16.mxu0 %v9393_v29  ;;  %v9451_v28 = vcombine.high %v1135_v24, %v1139_v25  ;;  %v1142_v29 = vld [vmem:[#allocation9 + $0x910] sm:$0xff]  ;;  %v9498_v24 = vcombine.low %v1183_v41, %v1187_v9 }
 0x311   : > { %4030 = vmatprep.subr.bf16.mxu1 %v9395_v30  ;;  %v1146_v30 = vld [vmem:[#allocation9 + $0x930] sm:$0xff] }
 0x312   : > { %v9457_v32 = vcombine.high %v1142_v29, %v1146_v30  ;;  %v9456_v40 = vcombine.low %v1142_v29, %v1146_v30  ;;  %v1203_v29 = vld [vmem:[#allocation9 + $0xaf8] sm:$0xff] }
 0x313   : > { %3859 = vmatpush1.bf16.msra.mxu0 %v9392_v33  ;;  %v9459_v33 = vcombine.high %v1143_v5, %v1147_v12 }
 0x314   : > { %4031 = vmatpush1.bf16.msra.mxu1 %v9394_v34  ;;  %3860 = vmatprep.subr.bf16.mxu0 %v9401_v35  ;;  %v1150_v34 = vld [vmem:[#allocation9 + $0x950] sm:$0xff] }
 0x315   : > { %4032 = vmatprep.subr.bf16.mxu1 %v9403_v36  ;;  %v1154_v35 = vld [vmem:[#allocation9 + $0x970] sm:$0xff]  ;;  %v1151_v36 = vld [vmem:[#allocation9 + $0x958] sm:$0xff] }
 0x316   : > { %v9465_v48 = vcombine.high %v1150_v34, %v1154_v35  ;;  %v9464_v55 = vcombine.low %v1150_v34, %v1154_v35  ;;  %v9466_v57 = vcombine.low %v1151_v36, %v1155_v4  ;;  %v1211_v34 = vld [vmem:[#allocation9 + $0xb38] sm:$0xff] }
 0x317   : > { %3861 = vmatpush1.bf16.msra.mxu0 %v9400_v49  ;;  %v9467_v49 = vcombine.high %v1151_v36, %v1155_v4 }
 0x318   : > { %4033 = vmatpush1.bf16.msra.mxu1 %v9402_v39  ;;  %3862 = vmatprep.subr.bf16.mxu0 %v9409_v50  ;;  %v1158_v39 = vld [vmem:[#allocation9 + $0x990] sm:$0xff] }
 0x319   : > { %4034 = vmatprep.subr.bf16.mxu1 %v9411_v51  ;;  %v1162_v50 = vld [vmem:[#allocation9 + $0x9b0] sm:$0xff]  ;;  %v1159_v51 = vld [vmem:[#allocation9 + $0x998] sm:$0xff] }
 0x31a   : > { %v9473_v59 = vcombine.high %v1158_v39, %v1162_v50  ;;  %v9472_v1 = vcombine.low %v1158_v39, %v1162_v50  ;;  %v9474_v46 = vcombine.low %v1159_v51, %v1163_v52  ;;  %v1219_v39 = vld [vmem:[#allocation9 + $0xb78] sm:$0xff] }
 0x31b   : > { %3863 = vmatpush1.bf16.msra.mxu0 %v9408_v60  ;;  %v9475_v60 = vcombine.high %v1159_v51, %v1163_v52 }
 0x31c   : > { %4035 = vmatpush1.bf16.msra.mxu1 %v9410_v61  ;;  %3864 = vmatprep.subr.bf16.mxu0 %v9417_v62  ;;  %v1166_v61 = vld [vmem:[#allocation9 + $0x9d0] sm:$0xff] }
 0x31d   : > { %4036 = vmatprep.subr.bf16.mxu1 %v9419_v63  ;;  %v1170_v62 = vld [vmem:[#allocation9 + $0x9f0] sm:$0xff]  ;;  %v1167_v63 = vld [vmem:[#allocation9 + $0x9d8] sm:$0xff] }
 0x31e   : > { %v9481_v2 = vcombine.high %v1166_v61, %v1170_v62  ;;  %v9480_v19 = vcombine.low %v1166_v61, %v1170_v62  ;;  %v1227_v61 = vld [vmem:[#allocation9 + $0xbb8] sm:$0xff] }
 0x31f   : > { %3865 = vmatpush1.bf16.msra.mxu0 %v9416_v37  ;;  %v9483_v37 = vcombine.high %v1167_v63, %v1171_v0 }
 0x320   : > { %4037 = vmatpush1.bf16.msra.mxu1 %v9418_v43  ;;  %3877 = vmatprep.subr.bf16.mxu0 %v9425_v44  ;;  %v1174_v43 = vld [vmem:[#allocation9 + $0xa10] sm:$0xff] }
 0x321   : > { %4049 = vmatprep.subr.bf16.mxu1 %v9427_v54  ;;  %v1178_v44 = vld [vmem:[#allocation9 + $0xa30] sm:$0xff]  ;;  %v1175_v54 = vld [vmem:[#allocation9 + $0xa18] sm:$0xff] }
 0x322   : > { %3867 = vmatmul.mubr.bf16.vlgmr.msra.gmra.mrb[4].mxu0 %v12328_v58  ;;  %v9489_v22 = vcombine.high %v1174_v43, %v1178_v44  ;;  %v9491_v3 = vcombine.high %v1175_v54, %v1179_v56 }
 0x323   : > { %4039 = vmatmul.mubr.bf16.vlgmr.msra.gmra.mrb[4].mxu1 %v12328_v58  ;;  %3878 = vmatpush1.bf16.msra.mxu0 %v9424_v21  ;;  %v9442_v58 = vcombine.low %v1127_v11, %v1131_v13  ;;  %v9482_v21 = vcombine.low %v1167_v63, %v1171_v0  ;;  %v9490_v11 = vcombine.low %v1175_v54, %v1179_v56  ;;  %v11432_v54 = vld [vmem:[%s12193_s24] sm:$0xff] }
 0x324   : > { %3909 = vmatprep.mubr.bf16.mxu0 %v12387_v42  ;;  %4050 = vmatpush1.bf16.msra.mxu1 %v9426_v6  ;;  %v1182_v6 = vld [vmem:[#allocation9 + $0xa50] sm:$0xff]  ;;  %v5220_v56 = vrot.slane %v11432_v54, 7 }
 0x325   : > { %4081 = vmatprep.mubr.bf16.mxu1 %v12387_v42  ;;  %3879 = vmatprep.subr.bf16.mxu0 %v9433_v8  ;;  %v9448_v42 = vcombine.low %v1134_v7, %v1138_v23  ;;  %v1186_v8 = vld [vmem:[#allocation9 + $0xa70] sm:$0xff]  ;;  %v1195_v7 = vld [vmem:[#allocation9 + $0xab8] sm:$0xff] }
 0x326   : > { %4051 = vmatprep.subr.bf16.mxu1 %v9435_v10  ;;  %v9488_v10 = vcombine.low %v1174_v43, %v1178_v44  ;;  %v9497_v13 = vcombine.high %v1182_v6, %v1186_v8  ;;  %v9496_v23 = vcombine.low %v1182_v6, %v1186_v8  ;;  %v1235_v43 = vld [vmem:[#allocation9 + $0xbf8] sm:$0xff]  ;;  %v1238_v8 = vld [vmem:[#allocation9 + $0xc10] sm:$0xff] }
 0x327   : > { %3880 = vmatpush1.bf16.msra.mxu0 %v9432_v16  ;;  %v9499_v16 = vcombine.high %v1183_v41, %v1187_v9  ;;  %v1242_v41 = vld [vmem:[#allocation9 + $0xc30] sm:$0xff]  ;;  %v1239_v9 = vld [vmem:[#allocation9 + $0xc18] sm:$0xff] }
 0x328   : > { %4052 = vmatpush1.bf16.msra.mxu1 %v9434_v17  ;;  %3881 = vmatprep.subr.bf16.mxu0 %v9441_v53  ;;  %v1190_v17 = vld [vmem:[#allocation9 + $0xa90] sm:$0xff] }
 0x329   : > { %4053 = vmatprep.subr.bf16.mxu1 %v9443_v18  ;;  %v1194_v53 = vld [vmem:[#allocation9 + $0xab0] sm:$0xff]  ;;  %v1191_v18 = vld [vmem:[#allocation9 + $0xa98] sm:$0xff] }
 0x32a   : > { %v9505_v25 = vcombine.high %v1190_v17, %v1194_v53  ;;  %v9504_v30 = vcombine.low %v1190_v17, %v1194_v53  ;;  %v9506_v5 = vcombine.low %v1191_v18, %v1195_v7  ;;  %v5225_v53 = vsel %vm577_vm8, 0.0, %v5220_v56 }
 0x32b   : > { %3882 = vmatpush1.bf16.msra.mxu0 %v9440_v26  ;;  %v9507_v26 = vcombine.high %v1191_v18, %v1195_v7  ;;  %v1246_v7 = vld [vmem:[#allocation9 + $0xc50] sm:$0xff] }
 0x32c   : > { %4054 = vmatpush1.bf16.msra.mxu1 %v9442_v58  ;;  %3883 = vmatprep.subr.bf16.mxu0 %v9449_v27  ;;  %v1198_v58 = vld [vmem:[#allocation9 + $0xad0] sm:$0xff] }
 0x32d   : > { %4055 = vmatprep.subr.bf16.mxu1 %v9451_v28  ;;  %v1202_v27 = vld [vmem:[#allocation9 + $0xaf0] sm:$0xff]  ;;  %v1199_v28 = vld [vmem:[#allocation9 + $0xad8] sm:$0xff] }
 0x32e   : > { %v9513_v12 = vcombine.high %v1198_v58, %v1202_v27  ;;  %v9512_v35 = vcombine.low %v1198_v58, %v1202_v27  ;;  %v9514_v36 = vcombine.low %v1199_v28, %v1203_v29  ;;  %v12433_v58 = vpop.permute.xlu1 %10542  ;;  %v9552_v27 = vcombine.low %v1238_v8, %v1242_v41 }
 0x32f   : > { %3884 = vmatpush1.bf16.msra.mxu0 %v9448_v42  ;;  %v9515_v42 = vcombine.high %v1199_v28, %v1203_v29 }
 0x330   : > { %4056 = vmatpush1.bf16.msra.mxu1 %v9450_v31  ;;  %3885 = vmatprep.subr.bf16.mxu0 %v9457_v32  ;;  %v1206_v31 = vld [vmem:[#allocation9 + $0xb10] sm:$0xff] }
 0x331   : > { %4057 = vmatprep.subr.bf16.mxu1 %v9459_v33  ;;  %v1210_v32 = vld [vmem:[#allocation9 + $0xb30] sm:$0xff]  ;;  %v1207_v33 = vld [vmem:[#allocation9 + $0xb18] sm:$0xff] }
 0x332   : > { %v9521_v4 = vcombine.high %v1206_v31, %v1210_v32  ;;  %v9520_v50 = vcombine.low %v1206_v31, %v1210_v32  ;;  %v9522_v51 = vcombine.low %v1207_v33, %v1211_v34  ;;  %v1255_v31 = vld [vmem:[#allocation9 + $0xc98] sm:$0xff] }
 0x333   : > { %3886 = vmatpush1.bf16.msra.mxu0 %v9456_v40  ;;  %v9523_v40 = vcombine.high %v1207_v33, %v1211_v34  ;;  %v1259_v32 = vld [vmem:[#allocation9 + $0xcb8] sm:$0xff]  ;;  %v10553_v34 = vpop.permute.xlu1 %10552 }
 0x334   : > { %4058 = vmatpush1.bf16.msra.mxu1 %v9458_v47  ;;  %3887 = vmatprep.subr.bf16.mxu0 %v9465_v48  ;;  %v1214_v47 = vld [vmem:[#allocation9 + $0xb50] sm:$0xff] }
 0x335   : > { %4059 = vmatprep.subr.bf16.mxu1 %v9467_v49  ;;  %v1218_v48 = vld [vmem:[#allocation9 + $0xb70] sm:$0xff]  ;;  %v1215_v49 = vld [vmem:[#allocation9 + $0xb58] sm:$0xff] }
 0x336   : > { %v9529_v52 = vcombine.high %v1214_v47, %v1218_v48  ;;  %v9528_v62 = vcombine.low %v1214_v47, %v1218_v48  ;;  %v9530_v63 = vcombine.low %v1215_v49, %v1219_v39  ;;  %v1266_v47 = vld [vmem:[#allocation9 + $0xcf0] sm:$0xff]  ;;  %v1263_v48 = vld [vmem:[#allocation9 + $0xcd8] sm:$0xff] }
 0x337   : > { %3888 = vmatpush1.bf16.msra.mxu0 %v9464_v55  ;;  %v9531_v55 = vcombine.high %v1215_v49, %v1219_v39  ;;  %v1267_v49 = vld [vmem:[#allocation9 + $0xcf8] sm:$0xff]  ;;  %v12442_v39 = vpop.permute.xlu0 %10537 }
 0x338   : > { %4060 = vmatpush1.bf16.msra.mxu1 %v9466_v57  ;;  %3889 = vmatprep.subr.bf16.mxu0 %v9473_v59  ;;  %v1222_v57 = vld [vmem:[#allocation9 + $0xb90] sm:$0xff] }
 0x339   : > { %4061 = vmatprep.subr.bf16.mxu1 %v9475_v60  ;;  %v1226_v59 = vld [vmem:[#allocation9 + $0xbb0] sm:$0xff]  ;;  %v1223_v60 = vld [vmem:[#allocation9 + $0xb98] sm:$0xff] }
 0x33a   : > { %v9537_v0 = vcombine.high %v1222_v57, %v1226_v59  ;;  %v9536_v44 = vcombine.low %v1222_v57, %v1226_v59  ;;  %v1274_v57 = vld [vmem:[#allocation9 + $0xd30] sm:$0xff]  ;;  %v10563_v59 = vpop.permute.xlu1 %10562 }
 0x33b   : > { %3890 = vmatpush1.bf16.msra.mxu0 %v9472_v1  ;;  %v9539_v1 = vcombine.high %v1223_v60, %v1227_v61 }
 0x33c   : > { %4062 = vmatpush1.bf16.msra.mxu1 %v9474_v46  ;;  %3891 = vmatprep.subr.bf16.mxu0 %v9481_v2  ;;  %v1230_v46 = vld [vmem:[#allocation9 + $0xbd0] sm:$0xff] }
 0x33d   : > { %4063 = vmatprep.subr.bf16.mxu1 %v9483_v37  ;;  %v1234_v2 = vld [vmem:[#allocation9 + $0xbf0] sm:$0xff]  ;;  %v1231_v37 = vld [vmem:[#allocation9 + $0xbd8] sm:$0xff] }
 0x33e   : > { %v9547_v6 = vcombine.high %v1231_v37, %v1235_v43 }
 0x33f   : > { %3892 = vmatpush1.bf16.msra.mxu0 %v9480_v19  ;;  %v11433_v19 = vld [vmem:[%s12193_s24 + $0x8] sm:$0xff]  ;;  %s460_s24 = scalar_lea.vmem [#allocation17], %s9163_s22  ;;  %s11694_s22 = scalar_lea.vmem %s11693_s16, 2048 }
 0x340   : > { %4064 = vmatpush1.bf16.msra.mxu1 %v9482_v21  ;;  %3893 = vmatprep.subr.bf16.mxu0 %v9489_v22  ;;  %v5221_v21 = vrot.slane %v11433_v19, 7  ;;  %v9538_v22 = vcombine.low %v1223_v60, %v1227_v61  ;;  %v1271_v60 = vld [vmem:[#allocation9 + $0xd18] sm:$0xff]  ;;  %s8990_s19 = sshll.u32 %s460_s24, 4  ;;  %s12919_s19 = int_to_ptr.vmem [resolvable:$true] %s8990_s19 }
 0x341   : > { %4065 = vmatprep.subr.bf16.mxu1 %v9491_v3  ;;  %v9545_v3 = vcombine.high %v1230_v46, %v1234_v2  ;;  %v1275_v61 = vld [vmem:[#allocation9 + $0xd38] sm:$0xff]  ;;  %p11695_p7 = scmp.lt.s32.totalorder %s12919_s19, %s11693_s16 }
 0x342   : > { %v5222_v17 = vsel %vm577_vm8, %v5220_v56, %v5221_v21  ;;  %v1279_v56 = vld [vmem:[#allocation9 + $0xd58] sm:$0xff] }
 0x343   : > { %3894 = vmatpush1.bf16.msra.mxu0 %v9488_v10  ;;  %v1243_v10 = vld [vmem:[#allocation9 + $0xc38] sm:$0xff] }
 0x344   : > { %4066 = vmatpush1.bf16.msra.mxu1 %v9490_v11  ;;  %3895 = vmatprep.subr.bf16.mxu0 %v9497_v13  ;;  %v9544_v11 = vcombine.low %v1230_v46, %v1234_v2  ;;  %v9546_v13 = vcombine.low %v1231_v37, %v1235_v43  ;;  %v9555_v18 = vcombine.high %v1239_v9, %v1243_v10  ;;  %v12444_v46 = vpop.permute.xlu0 %10547  ;;  %v1278_v37 = vld [vmem:[#allocation9 + $0xd50] sm:$0xff]  ;;  %v1283_v19 = vld [vmem:[#allocation9 + $0xd78] sm:$0xff] }
 0x345   : > { %4067 = vmatprep.subr.bf16.mxu1 %v9499_v16  ;;  %v9553_v16 = vcombine.high %v1238_v8, %v1242_v41  ;;  %v9554_v28 = vcombine.low %v1239_v9, %v1243_v10  ;;  %v9587_v2 = vcombine.high %v1271_v60, %v1275_v61  ;;  %v1282_v43 = vld [vmem:[#allocation9 + $0xd70] sm:$0xff]  ;;  %v10549_v54 = vunpack.i.l.bf16 %v12444_v46  ;;  %v10573_v8 = vpop.permute.xlu1 %10572 }
 0x346   : > { %v9593_v41 = vcombine.high %v1278_v37, %v1282_v43 }
 0x347   : > { %3896 = vmatpush1.bf16.msra.mxu0 %v9496_v23  ;;  %v1250_v23 = vld [vmem:[#allocation9 + $0xc70] sm:$0xff] }
 0x348   : > { %4068 = vmatpush1.bf16.msra.mxu1 %v9498_v24  ;;  %3897 = vmatprep.subr.bf16.mxu0 %v9505_v25  ;;  %v10576_v24 = vpack.i.bf16 %v5222_v17, %v5225_v53  ;;  %v1247_v25 = vld [vmem:[#allocation9 + $0xc58] sm:$0xff]  ;;  %v9561_v29 = vcombine.high %v1246_v7, %v1250_v23  ;;  %v9560_v33 = vcombine.low %v1246_v7, %v1250_v23  ;;  %v745_v17 = vld [vmem:[#allocation8 + $0x8] sm:$0xff]  ;;  %v10574_v7 = vunpack.i.l.bf16 %v10573_v8 }
 0x349   : > { %4069 = vmatprep.subr.bf16.mxu1 %v9507_v26  ;;  %v1251_v26 = vld [vmem:[#allocation9 + $0xc78] sm:$0xff]  ;;  %v749_v53 = vld [vmem:[#allocation8 + $0x28] sm:$0xff]  ;;  %v9592_v23 = vcombine.low %v1278_v37, %v1282_v43 }
 0x34a   : > { %10577 = vrot.lane.b32.xlu0 %v10576_v24, %s11799_s23 }
 0x34b   : > { %3898 = vmatpush1.bf16.msra.mxu0 %v9504_v30  ;;  %v5226_v30 = vsel %vm577_vm8, %v5221_v21, 0.0 }
 0x34c   : > { %4070 = vmatpush1.bf16.msra.mxu1 %v9506_v5  ;;  %3899 = vmatprep.subr.bf16.mxu0 %v9513_v12  ;;  %v9563_v5 = vcombine.high %v1247_v25, %v1251_v26  ;;  %v1254_v12 = vld [vmem:[#allocation9 + $0xc90] sm:$0xff] }
 0x34d   : > { %4071 = vmatprep.subr.bf16.mxu1 %v9515_v42  ;;  %v1258_v42 = vld [vmem:[#allocation9 + $0xcb0] sm:$0xff]  ;;  %5233 = vrot.lane.b32.xlu1 %v5226_v30, %s11799_s23  ;;  %v756_v30 = vld [vmem:[#allocation8 + $0x60] sm:$0xff] }
 0x34f   : > { %3900 = vmatpush1.bf16.msra.mxu0 %v9512_v35  ;;  %v9562_v35 = vcombine.low %v1247_v25, %v1251_v26  ;;  %v9594_v26 = vcombine.low %v1279_v56, %v1283_v19 }
 0x350   : > { %4072 = vmatpush1.bf16.msra.mxu1 %v9514_v36  ;;  %3901 = vmatprep.subr.bf16.mxu0 %v9521_v4  ;;  %v9569_v36 = vcombine.high %v1254_v12, %v1258_v42  ;;  %v9571_v4 = vcombine.high %v1255_v31, %v1259_v32 }
 0x351   : > { %4073 = vmatprep.subr.bf16.mxu1 %v9523_v40  ;;  %v1262_v40 = vld [vmem:[#allocation9 + $0xcd0] sm:$0xff] }
 0x353   : > { %3902 = vmatpush1.bf16.msra.mxu0 %v9520_v50  ;;  %v9570_v50 = vcombine.low %v1255_v31, %v1259_v32 }
 0x354   : > { %4074 = vmatpush1.bf16.msra.mxu1 %v9522_v51  ;;  %3903 = vmatprep.subr.bf16.mxu0 %v9529_v52  ;;  %v9577_v51 = vcombine.high %v1262_v40, %v1266_v47  ;;  %v9579_v52 = vcombine.high %v1263_v48, %v1267_v49 }
 0x355   : > { %4075 = vmatprep.subr.bf16.mxu1 %v9531_v55  ;;  %v1270_v55 = vld [vmem:[#allocation9 + $0xd10] sm:$0xff] }
 0x356   : > { %v9584_v21 = vcombine.low %v1270_v55, %v1274_v57 }
 0x357   : > { %3904 = vmatpush1.bf16.msra.mxu0 %v9528_v62  ;;  %v9576_v62 = vcombine.low %v1262_v40, %v1266_v47  ;;  %v761_v47 = vld [vmem:[#allocation8 + $0x88] sm:$0xff] }
 0x358   : > { %4076 = vmatpush1.bf16.msra.mxu1 %v9530_v63  ;;  %3905 = vmatprep.subr.bf16.mxu0 %v9537_v0  ;;  %v9585_v63 = vcombine.high %v1270_v55, %v1274_v57  ;;  %v10555_v0 = vunpack.i.h.bf16 %v10553_v34  ;;  %v772_v55 = vld [vmem:[#allocation8 + $0xe0] sm:$0xff]  ;;  %v769_v57 = vld [vmem:[#allocation8 + $0xc8] sm:$0xff] }
 0x359   : > { %4077 = vmatprep.subr.bf16.mxu1 %v9539_v1  ;;  %v10554_v1 = vunpack.i.l.bf16 %v10553_v34 }
 0x35b   : > { %3906 = vmatpush1.bf16.msra.mxu0 %v9536_v44  ;;  %v10550_v44 = vunpack.i.h.bf16 %v12444_v46  ;;  %v611_v9 = vsel %vm610_vm1, %v10549_v54, %v10554_v1  ;;  %v781_v1 = vld [vmem:[#allocation8 + $0x128] sm:$0xff] }
 0x35c   : > { %4078 = vmatpush1.bf16.msra.mxu1 %v9538_v22  ;;  %3907 = vmatprep.subr.bf16.mxu0 %v9545_v3  ;;  %v9586_v22 = vcombine.low %v1271_v60, %v1275_v61  ;;  %v10565_v3 = vunpack.i.h.bf16 %v10563_v59 }
 0x35d   : > { %4079 = vmatprep.subr.bf16.mxu1 %v9547_v6  ;;  %v10564_v6 = vunpack.i.l.bf16 %v10563_v59  ;;  %v612_v10 = vsel %vm610_vm1, %v10550_v44, %v10555_v0  ;;  %v773_v59 = vld [vmem:[#allocation8 + $0xe8] sm:$0xff] }
 0x35e   : > { %v615_v25 = vsel %vm613_vm14, %v612_v10, %v10565_v3  ;;  %v777_v0 = vld [vmem:[#allocation8 + $0x108] sm:$0xff]  ;;  %v9626_v37 = vcombine.low %v769_v57, %v773_v59  ;;  %v792_v10 = vld [vmem:[#allocation8 + $0x180] sm:$0xff] }
 0x35f   : > { %3908 = vmatpush1.bf16.msra.mxu0 %v9544_v11  ;;  %v9595_v11 = vcombine.high %v1279_v56, %v1283_v19  ;;  %v614_v24 = vsel %vm613_vm14, %v611_v9, %v10564_v6  ;;  %v9635_v56 = vcombine.high %v777_v0, %v781_v1  ;;  %v784_v19 = vld [vmem:[#allocation8 + $0x140] sm:$0xff]  ;;  %v789_v3 = vld [vmem:[#allocation8 + $0x168] sm:$0xff] }
 0x360   : > { %4080 = vmatpush1.bf16.msra.mxu1 %v9546_v13  ;;  %3920 = vmatprep.subr.bf16.mxu0 %v9553_v16  ;;  %v744_v13 = vld [vmem:[#allocation8] sm:$0xff] }
 0x361   : > { %4092 = vmatprep.subr.bf16.mxu1 %v9555_v18  ;;  %v748_v16 = vld [vmem:[#allocation8 + $0x20] sm:$0xff]  ;;  %v10575_v18 = vunpack.i.h.bf16 %v10573_v8  ;;  %v9634_v8 = vcombine.low %v777_v0, %v781_v1 }
 0x362   : > { %3910 = vmatmul.mubr.bf16.vlgmr.msra.gmra.mrb[4].mxu0 %v12314_v38  ;;  %v9600_v32 = vcombine.low %v744_v13, %v748_v16  ;;  %v832_v1 = vld [vmem:[#allocation8 + $0x2c0] sm:$0xff] }
 0x363   : > { %4082 = vmatmul.mubr.bf16.vlgmr.msra.gmra.mrb[4].mxu1 %v12314_v38  ;;  %3921 = vmatpush1.bf16.msra.mxu0 %v9552_v27  ;;  %v9568_v38 = vcombine.low %v1254_v12, %v1258_v42  ;;  %v9601_v27 = vcombine.high %v744_v13, %v748_v16  ;;  %v757_v12 = vld [vmem:[#allocation8 + $0x68] sm:$0xff]  ;;  %v617_v42 = vsel %vm616_vm10, %v614_v24, %v10574_v7  ;;  %v804_v24 = vld [vmem:[#allocation8 + $0x1e0] sm:$0xff] }
 0x364   : > { %4093 = vmatpush1.bf16.msra.mxu1 %v9554_v28  ;;  %3922 = vmatprep.subr.bf16.mxu0 %v9561_v29  ;;  %v9603_v28 = vcombine.high %v745_v17, %v749_v53  ;;  %v752_v29 = vld [vmem:[#allocation8 + $0x40] sm:$0xff]  ;;  %v618_v31 = vsel %vm616_vm10, %v615_v25, %v10575_v18  ;;  %v793_v13 = vld [vmem:[#allocation8 + $0x188] sm:$0xff] }
 0x365   : > { %4094 = vmatprep.subr.bf16.mxu1 %v9563_v5  ;;  %3952 = vmatprep.mubr.bf16.mxu0 %v11804_v45  ;;  %v753_v5 = vld [vmem:[#allocation8 + $0x48] sm:$0xff]  ;;  %v9609_v34 = vcombine.high %v752_v29, %v756_v30  ;;  %v12456_v40 = vpack.c.bf16 %v618_v31, %v617_v42 }
 0x366   : > { %4124 = vmatprep.mubr.bf16.mxu1 %v11804_v45  ;;  %v9578_v45 = vcombine.low %v1263_v48, %v1267_v49  ;;  %v765_v48 = vld [vmem:[#allocation8 + $0xa8] sm:$0xff]  ;;  %v9608_v49 = vcombine.low %v752_v29, %v756_v30 }
 0x367   : > { %3923 = vmatpush1.bf16.msra.mxu0 %v9560_v33  ;;  %v9602_v33 = vcombine.low %v745_v17, %v749_v53  ;;  %v9618_v60 = vcombine.low %v761_v47, %v765_v48  ;;  %v797_v16 = vld [vmem:[#allocation8 + $0x1a8] sm:$0xff] }
 0x368   : > { %4095 = vmatpush1.bf16.msra.mxu1 %v9562_v35  ;;  %3924 = vmatprep.subr.bf16.mxu0 %v9569_v36  ;;  %v9611_v35 = vcombine.high %v753_v5, %v757_v12  ;;  %v760_v36 = vld [vmem:[#allocation8 + $0x80] sm:$0xff]  ;;  %v9651_v7 = vcombine.high %v793_v13, %v797_v16  ;;  %v801_v25 = vld [vmem:[#allocation8 + $0x1c8] sm:$0xff] }
 0x369   : > { %4096 = vmatprep.subr.bf16.mxu1 %v9571_v4  ;;  %v764_v4 = vld [vmem:[#allocation8 + $0xa0] sm:$0xff]  ;;  %v809_v42 = vld [vmem:[#allocation8 + $0x208] sm:$0xff] }
 0x36a   : > { %v813_v31 = vld [vmem:[#allocation8 + $0x228] sm:$0xff] }
 0x36b   : > { %3925 = vmatpush1.bf16.msra.mxu0 %v9568_v38  ;;  %v9610_v38 = vcombine.low %v753_v5, %v757_v12  ;;  %v808_v5 = vld [vmem:[#allocation8 + $0x200] sm:$0xff] }
 0x36c   : > { %4097 = vmatpush1.bf16.msra.mxu1 %v9570_v50  ;;  %3926 = vmatprep.subr.bf16.mxu0 %v9577_v51  ;;  %v9617_v50 = vcombine.high %v760_v36, %v764_v4  ;;  %v9619_v51 = vcombine.high %v761_v47, %v765_v48  ;;  %v812_v12 = vld [vmem:[#allocation8 + $0x220] sm:$0xff]  ;;  %v817_v47 = vld [vmem:[#allocation8 + $0x248] sm:$0xff] }
 0x36d   : > { %4098 = vmatprep.subr.bf16.mxu1 %v9579_v52  ;;  %v768_v52 = vld [vmem:[#allocation8 + $0xc0] sm:$0xff]  ;;  %v821_v48 = vld [vmem:[#allocation8 + $0x268] sm:$0xff] }
 0x36e   : > { %v9625_v61 = vcombine.high %v768_v52, %v772_v55 }
 0x36f   : > { %3927 = vmatpush1.bf16.msra.mxu0 %v9576_v62  ;;  %v9627_v62 = vcombine.high %v769_v57, %v773_v59  ;;  %v825_v57 = vld [vmem:[#allocation8 + $0x288] sm:$0xff] }
 0x370   : > { %4099 = vmatpush1.bf16.msra.mxu1 %v9578_v45  ;;  %3928 = vmatprep.subr.bf16.mxu0 %v9585_v63  ;;  %v776_v45 = vld [vmem:[#allocation8 + $0x100] sm:$0xff]  ;;  %v829_v59 = vld [vmem:[#allocation8 + $0x2a8] sm:$0xff] }
 0x371   : > { %4100 = vmatprep.subr.bf16.mxu1 %v9587_v2  ;;  %v780_v63 = vld [vmem:[#allocation8 + $0x120] sm:$0xff]  ;;  %v9624_v2 = vcombine.low %v768_v52, %v772_v55  ;;  %v9683_v0 = vcombine.high %v825_v57, %v829_v59 }
 0x372   : > { %v9633_v43 = vcombine.high %v776_v45, %v780_v63  ;;  %v9632_v6 = vcombine.low %v776_v45, %v780_v63  ;;  %v824_v52 = vld [vmem:[#allocation8 + $0x280] sm:$0xff]  ;;  %v10540_v45 = vunpack.i.h.bf16 %v12442_v39  ;;  %v10558_v63 = vpop.permute.xlu0 %10557 }
 0x373   : > { %3929 = vmatpush1.bf16.msra.mxu0 %v9584_v21  ;;  %v788_v21 = vld [vmem:[#allocation8 + $0x160] sm:$0xff] }
 0x374   : > { %4101 = vmatpush1.bf16.msra.mxu1 %v9586_v22  ;;  %3930 = vmatprep.subr.bf16.mxu0 %v9593_v41  ;;  %v785_v22 = vld [vmem:[#allocation8 + $0x148] sm:$0xff]  ;;  %v9641_v41 = vcombine.high %v784_v19, %v788_v21  ;;  %v9640_v17 = vcombine.low %v784_v19, %v788_v21  ;;  %v828_v55 = vld [vmem:[#allocation8 + $0x2a0] sm:$0xff]  ;;  %v10544_v19 = vunpack.i.l.bf16 %v12433_v58 }
 0x375   : > { %4102 = vmatprep.subr.bf16.mxu1 %v9595_v11  ;;  %v9643_v9 = vcombine.high %v785_v22, %v789_v3  ;;  %v796_v11 = vld [vmem:[#allocation8 + $0x1a0] sm:$0xff]  ;;  %v9642_v53 = vcombine.low %v785_v22, %v789_v3  ;;  %v9680_v21 = vcombine.low %v824_v52, %v828_v55  ;;  %v10545_v22 = vunpack.i.h.bf16 %v12433_v58 }
 0x376   : > { %v9649_v18 = vcombine.high %v792_v10, %v796_v11 }
 0x377   : > { %3931 = vmatpush1.bf16.msra.mxu0 %v9592_v23  ;;  %v800_v23 = vld [vmem:[#allocation8 + $0x1c0] sm:$0xff] }
 0x378   : > { %4103 = vmatpush1.bf16.msra.mxu1 %v9594_v26  ;;  %4703 = vmatprep.subr.bf16.mxu0 %v9601_v27  ;;  %v805_v26 = vld [vmem:[#allocation8 + $0x1e8] sm:$0xff]  ;;  %v9648_v27 = vcombine.low %v792_v10, %v796_v11  ;;  %v9657_v29 = vcombine.high %v800_v23, %v804_v24  ;;  %v10560_v11 = vunpack.i.h.bf16 %v10558_v63 }
 0x379   : > { %4746 = vmatprep.subr.bf16.mxu1 %v9603_v28  ;;  %v9650_v28 = vcombine.low %v793_v13, %v797_v16  ;;  %v9659_v30 = vcombine.high %v801_v25, %v805_v26  ;;  %v841_v10 = vld [vmem:[#allocation8 + $0x308] sm:$0xff]  ;;  %v10559_v13 = vunpack.i.l.bf16 %v10558_v63  ;;  %v766_v63 = vld [vmem:[#allocation8 + $0xb0] sm:$0xff] }
 0x37a   : > { %9598 = vmatmul.mubr.msk.bf16.vlgmr.msra.gmra.mrb[4].mxu0 %vm604_vm9, %v12399_v20 }
 0x37b   : > { %9599 = vmatmul.mubr.msk.bf16.vlgmr.msra.gmra.mrb[4].mxu1 %vm604_vm9, %v12399_v20  ;;  %4704 = vmatpush1.bf16.msra.mxu0 %v9600_v32  ;;  %v9616_v20 = vcombine.low %v760_v36, %v764_v4  ;;  %v9656_v32 = vcombine.low %v800_v23, %v804_v24  ;;  %v816_v36 = vld [vmem:[#allocation8 + $0x240] sm:$0xff] }
 0x37c   : > { %4747 = vmatpush1.bf16.msra.mxu1 %v9602_v33  ;;  %4705 = vmatprep.subr.bf16.mxu0 %v9609_v34  ;;  %v9658_v33 = vcombine.low %v801_v25, %v805_v26  ;;  %v9665_v34 = vcombine.high %v808_v5, %v812_v12  ;;  %v820_v4 = vld [vmem:[#allocation8 + $0x260] sm:$0xff]  ;;  %v849_v26 = vld [vmem:[#allocation8 + $0x348] sm:$0xff] }
 0x37d   : > { %4748 = vmatprep.subr.bf16.mxu1 %v9611_v35  ;;  %9713 = vmatprep.mubr.msk.bf16.mxu0 %vm4675_vm15, %v12456_v40  ;;  %v9667_v35 = vcombine.high %v809_v42, %v813_v31  ;;  %v848_v23 = vld [vmem:[#allocation8 + $0x340] sm:$0xff] }
 0x37e   : > { %9715 = vmatprep.mubr.msk.bf16.mxu1 %vm4675_vm15, %v12456_v40 }
 0x37f   : > { %4706 = vmatpush1.bf16.msra.mxu0 %v9608_v49  ;;  %v9664_v49 = vcombine.low %v808_v5, %v812_v12  ;;  %v9705_v5 = vcombine.high %v848_v23, %v848_v23  ;;  %v9704_v12 = vcombine.low %v848_v23, %v848_v23 }
 0x380   : > { %4749 = vmatpush1.bf16.msra.mxu1 %v9610_v38  ;;  %4707 = vmatprep.subr.bf16.mxu0 %v9617_v50  ;;  %v9666_v38 = vcombine.low %v809_v42, %v813_v31  ;;  %v9673_v50 = vcombine.high %v816_v36, %v820_v4  ;;  %v9707_v42 = vcombine.high %v849_v26, %v849_v26 }
 0x381   : > { %4750 = vmatprep.subr.bf16.mxu1 %v9619_v51  ;;  %v9675_v51 = vcombine.high %v817_v47, %v821_v48  ;;  %v9706_v31 = vcombine.low %v849_v26, %v849_v26  ;;  %v795_v26 = vld [vmem:[#allocation8 + $0x198] sm:$0xff] }
 0x383   : > { %4708 = vmatpush1.bf16.msra.mxu0 %v9616_v20  ;;  %v10539_v20 = vunpack.i.l.bf16 %v12442_v39  ;;  %v9682_v39 = vcombine.low %v825_v57, %v829_v59  ;;  %v755_v59 = vld [vmem:[#allocation8 + $0x58] sm:$0xff] }
 0x384   : > { %4751 = vmatpush1.bf16.msra.mxu1 %v9618_v60  ;;  %4709 = vmatprep.subr.bf16.mxu0 %v9625_v61  ;;  %v9672_v60 = vcombine.low %v816_v36, %v820_v4  ;;  %v9674_v61 = vcombine.low %v817_v47, %v821_v48  ;;  %v747_v36 = vld [vmem:[#allocation8 + $0x18] sm:$0xff]  ;;  %v4680_v47 = vsel %vm476_vm0, %v9704_v12, 0  ;;  %v802_v12 = vld [vmem:[#allocation8 + $0x1d0] sm:$0xff] }
 0x385   : > { %4752 = vmatprep.subr.bf16.mxu1 %v9627_v62  ;;  %v9681_v62 = vcombine.high %v824_v52, %v828_v55  ;;  %v751_v4 = vld [vmem:[#allocation8 + $0x38] sm:$0xff]  ;;  %v754_v52 = vld [vmem:[#allocation8 + $0x50] sm:$0xff] }
 0x386   : > { %v758_v55 = vld [vmem:[#allocation8 + $0x70] sm:$0xff] }
 0x387   : > { %4710 = vmatpush1.bf16.msra.mxu0 %v9624_v2  ;;  %v836_v2 = vld [vmem:[#allocation8 + $0x2e0] sm:$0xff] }
 0x388   : > { %4753 = vmatpush1.bf16.msra.mxu1 %v9626_v37  ;;  %4711 = vmatprep.subr.bf16.mxu0 %v9633_v43  ;;  %v833_v37 = vld [vmem:[#allocation8 + $0x2c8] sm:$0xff]  ;;  %v9689_v3 = vcombine.high %v832_v1, %v836_v2  ;;  %v9688_v58 = vcombine.low %v832_v1, %v836_v2 }
 0x389   : > { %4754 = vmatprep.subr.bf16.mxu1 %v9635_v56  ;;  %v837_v43 = vld [vmem:[#allocation8 + $0x2e8] sm:$0xff]  ;;  %v596_v56 = vsel %vm595_vm2, %v12347_v14, %v10539_v20  ;;  %v759_v20 = vld [vmem:[#allocation8 + $0x78] sm:$0xff] }
 0x38a   : > { %v845_v14 = vld [vmem:[#allocation8 + $0x328] sm:$0xff]  ;;  %v599_v16 = vsel %vm598_vm3, %v596_v56, %v10544_v19  ;;  %v9615_v46 = vcombine.high %v755_v59, %v759_v20  ;;  %v9614_v1 = vcombine.low %v755_v59, %v759_v20  ;;  %v774_v56 = vld [vmem:[#allocation8 + $0xf0] sm:$0xff]  ;;  %v771_v19 = vld [vmem:[#allocation8 + $0xd8] sm:$0xff] }
 0x38b   : > { %4712 = vmatpush1.bf16.msra.mxu0 %v9632_v6  ;;  %v597_v6 = vsel %vm595_vm2, %v12350_v15, %v10540_v45  ;;  %v762_v45 = vld [vmem:[#allocation8 + $0x90] sm:$0xff]  ;;  %v819_v59 = vld [vmem:[#allocation8 + $0x258] sm:$0xff] }
 0x38c   : > { %4755 = vmatpush1.bf16.msra.mxu1 %v9634_v8  ;;  %4713 = vmatprep.subr.bf16.mxu0 %v9641_v41  ;;  %v9691_v8 = vcombine.high %v833_v37, %v837_v43  ;;  %v840_v41 = vld [vmem:[#allocation8 + $0x300] sm:$0xff]  ;;  %v9621_v2 = vcombine.high %v762_v45, %v766_v63  ;;  %v823_v20 = vld [vmem:[#allocation8 + $0x278] sm:$0xff] }
 0x38d   : > { %4756 = vmatprep.subr.bf16.mxu1 %v9643_v9  ;;  %v844_v9 = vld [vmem:[#allocation8 + $0x320] sm:$0xff] }
 0x38e   : > { %v9697_v15 = vcombine.high %v840_v41, %v844_v9 }
 0x38f   : > { %4714 = vmatpush1.bf16.msra.mxu0 %v9640_v17  ;;  %v10568_v17 = vpop.permute.xlu0 %10567 }
 0x390   : > { %4757 = vmatpush1.bf16.msra.mxu1 %v9642_v53  ;;  %4715 = vmatprep.subr.bf16.mxu0 %v9649_v18  ;;  %v600_v53 = vsel %vm598_vm3, %v597_v6, %v10545_v22  ;;  %v9690_v18 = vcombine.low %v833_v37, %v837_v43  ;;  %v10570_v24 = vunpack.i.h.bf16 %v10568_v17  ;;  %v10569_v25 = vunpack.i.l.bf16 %v10568_v17  ;;  %v770_v43 = vld [vmem:[#allocation8 + $0xd0] sm:$0xff] }
 0x391   : > { %4758 = vmatprep.subr.bf16.mxu1 %v9651_v7  ;;  %v9699_v7 = vcombine.high %v841_v10, %v845_v14  ;;  %v9620_v22 = vcombine.low %v762_v45, %v766_v63  ;;  %v790_v17 = vld [vmem:[#allocation8 + $0x170] sm:$0xff]  ;;  %v9679_v63 = vcombine.high %v819_v59, %v823_v20 }
 0x393   : > { %4716 = vmatpush1.bf16.msra.mxu0 %v9648_v27  ;;  %v602_v27 = vsel %vm601_vm5, %v599_v16, %v10559_v13  ;;  %v786_v16 = vld [vmem:[#allocation8 + $0x150] sm:$0xff] }
 0x394   : > { %4759 = vmatpush1.bf16.msra.mxu1 %v9650_v28  ;;  %4717 = vmatprep.subr.bf16.mxu0 %v9657_v29  ;;  %v603_v28 = vsel %vm601_vm5, %v600_v53, %v10560_v11  ;;  %v9696_v29 = vcombine.low %v840_v41, %v844_v9  ;;  %v782_v41 = vld [vmem:[#allocation8 + $0x130] sm:$0xff]  ;;  %v779_v9 = vld [vmem:[#allocation8 + $0x118] sm:$0xff] }
 0x395   : > { %4760 = vmatprep.subr.bf16.mxu1 %v9659_v30  ;;  %v9698_v30 = vcombine.low %v841_v10, %v845_v14  ;;  %v783_v10 = vld [vmem:[#allocation8 + $0x138] sm:$0xff] }
 0x396   : > { %v9639_v13 = vcombine.high %v779_v9, %v783_v10  ;;  %v791_v53 = vld [vmem:[#allocation8 + $0x178] sm:$0xff] }
 0x397   : > { %4718 = vmatpush1.bf16.msra.mxu0 %v9656_v32  ;;  %v746_v32 = vld [vmem:[#allocation8 + $0x10] sm:$0xff] }
 0x398   : > { %4761 = vmatpush1.bf16.msra.mxu1 %v9658_v33  ;;  %4719 = vmatprep.subr.bf16.mxu0 %v9665_v34  ;;  %v750_v33 = vld [vmem:[#allocation8 + $0x30] sm:$0xff]  ;;  %v605_v34 = vsel %vm604_vm9, %v602_v27, %v10569_v25  ;;  %v799_v27 = vld [vmem:[#allocation8 + $0x1b8] sm:$0xff] }
 0x399   : > { %4762 = vmatprep.subr.bf16.mxu1 %v9667_v35  ;;  %v606_v35 = vsel %vm604_vm9, %v603_v28, %v10570_v24  ;;  %v9605_v48 = vcombine.high %v746_v32, %v750_v33  ;;  %v9604_v57 = vcombine.low %v746_v32, %v750_v33  ;;  %v794_v24 = vld [vmem:[#allocation8 + $0x190] sm:$0xff]  ;;  %v9644_v28 = vcombine.low %v786_v16, %v790_v17  ;;  %v807_v32 = vld [vmem:[#allocation8 + $0x1f8] sm:$0xff] }
 0x39a   : > { %v798_v25 = vld [vmem:[#allocation8 + $0x1b0] sm:$0xff]  ;;  %vm5241_vm9 = vcmask 556032  }
 0x39b   : > { %4720 = vmatpush1.bf16.msra.mxu0 %v9664_v49  ;;  %v4686_v49 = vsel %vm476_vm0, %v9706_v31, 0  ;;  %v803_v31 = vld [vmem:[#allocation8 + $0x1d8] sm:$0xff]  ;;  %v9652_v33 = vcombine.low %v794_v24, %v798_v25 }
 0x39c   : > { %4763 = vmatpush1.bf16.msra.mxu1 %v9666_v38  ;;  %4721 = vmatprep.subr.bf16.mxu0 %v9673_v50  ;;  %v608_v38 = vsel %vm607_vm7, %v605_v34, %v10549_v54  ;;  %v609_v50 = vsel %vm607_vm7, %v606_v35, %v10550_v44  ;;  %v763_v44 = vld [vmem:[#allocation8 + $0x98] sm:$0xff]  ;;  %v9654_v34 = vcombine.low %v795_v26, %v799_v27 }
 0x39d   : > { %4764 = vmatprep.subr.bf16.mxu1 %v9675_v51  ;;  %v9607_v51 = vcombine.high %v747_v36, %v751_v4  ;;  %v767_v54 = vld [vmem:[#allocation8 + $0xb8] sm:$0xff] }
 0x39e   : > { %v9623_v37 = vcombine.high %v763_v44, %v767_v54 }
 0x39f   : > { %4722 = vmatpush1.bf16.msra.mxu0 %v9672_v60  ;;  %v12488_v60 = vpack.c.bf16 %v609_v50, %v608_v38  ;;  %v9662_v50 = vcombine.low %v803_v31, %v807_v32 }
 0x3a0   : > { %4765 = vmatpush1.bf16.msra.mxu1 %v9674_v61  ;;  %4723 = vmatprep.subr.bf16.mxu0 %v9681_v62  ;;  %v9606_v61 = vcombine.low %v747_v36, %v751_v4  ;;  %v9613_v62 = vcombine.high %v754_v52, %v758_v55  ;;  %v9663_v36 = vcombine.high %v803_v31, %v807_v32  ;;  %v810_v4 = vld [vmem:[#allocation8 + $0x210] sm:$0xff] }
 0x3a1   : > { %4766 = vmatprep.subr.bf16.mxu1 %v9683_v0  ;;  %v9612_v0 = vcombine.low %v754_v52, %v758_v55  ;;  %v818_v55 = vld [vmem:[#allocation8 + $0x250] sm:$0xff] }
 0x3a3   : > { %4724 = vmatpush1.bf16.msra.mxu0 %v9680_v21  ;;  %v775_v21 = vld [vmem:[#allocation8 + $0xf8] sm:$0xff] }
 0x3a4   : > { %4767 = vmatpush1.bf16.msra.mxu1 %v9682_v39  ;;  %4725 = vmatprep.subr.bf16.mxu0 %v9689_v3  ;;  %v9622_v39 = vcombine.low %v763_v44, %v767_v54  ;;  %v9629_v3 = vcombine.high %v770_v43, %v774_v56  ;;  %v9631_v6 = vcombine.high %v771_v19, %v775_v21  ;;  %v830_v44 = vld [vmem:[#allocation8 + $0x2b0] sm:$0xff] }
 0x3a5   : > { %4768 = vmatprep.subr.bf16.mxu1 %v9691_v8  ;;  %v778_v8 = vld [vmem:[#allocation8 + $0x110] sm:$0xff]  ;;  %v9630_v14 = vcombine.low %v771_v19, %v775_v21 }
 0x3a6   : > { %v9637_v11 = vcombine.high %v778_v8, %v782_v41 }
 0x3a7   : > { %4726 = vmatpush1.bf16.msra.mxu0 %v9688_v58  ;;  %v787_v58 = vld [vmem:[#allocation8 + $0x158] sm:$0xff] }
 0x3a8   : > { %4769 = vmatpush1.bf16.msra.mxu1 %v9690_v18  ;;  %4727 = vmatprep.subr.bf16.mxu0 %v9697_v15  ;;  %v9636_v18 = vcombine.low %v778_v8, %v782_v41  ;;  %v9638_v15 = vcombine.low %v779_v9, %v783_v10  ;;  %v9647_v23 = vcombine.high %v787_v58, %v791_v53  ;;  %v834_v8 = vld [vmem:[#allocation8 + $0x2d0] sm:$0xff] }
 0x3a9   : > { %4770 = vmatprep.subr.bf16.mxu1 %v9699_v7  ;;  %v9645_v7 = vcombine.high %v786_v16, %v790_v17  ;;  %v838_v41 = vld [vmem:[#allocation8 + $0x2f0] sm:$0xff] }
 0x3aa   : > { %v9692_v32 = vcombine.low %v834_v8, %v838_v41 }
 0x3ab   : > { %4728 = vmatpush1.bf16.msra.mxu0 %v9696_v29  ;;  %v9646_v29 = vcombine.low %v787_v58, %v791_v53 }
 0x3ac   : > { %4771 = vmatpush1.bf16.msra.mxu1 %v9698_v30  ;;  %9712 = vmatprep.subr.msk.bf16.mxu0 %vm476_vm0, %v9705_v5  ;;  %v9653_v30 = vcombine.high %v794_v24, %v798_v25  ;;  %v9655_v5 = vcombine.high %v795_v26, %v799_v27  ;;  %v842_v27 = vld [vmem:[#allocation8 + $0x310] sm:$0xff] }
 0x3ad   : > { %9714 = vmatprep.subr.msk.bf16.mxu1 %vm476_vm0, %v9707_v42  ;;  %v806_v42 = vld [vmem:[#allocation8 + $0x1f0] sm:$0xff] }
 0x3ae   : > { %v9661_v35 = vcombine.high %v802_v12, %v806_v42  ;;  %v9660_v38 = vcombine.low %v802_v12, %v806_v42  ;;  %v843_v12 = vld [vmem:[#allocation8 + $0x318] sm:$0xff] }
 0x3af   : > { %4730 = vmatpush1.bf16.msra.mxu0 %v4680_v47  ;;  %v814_v47 = vld [vmem:[#allocation8 + $0x230] sm:$0xff]  ;;  %v847_v42 = vld [vmem:[#allocation8 + $0x338] sm:$0xff] }
 0x3b0   : > { %4773 = vmatpush1.bf16.msra.mxu1 %v4686_v49  ;;  %4789 = vmatprep.subr.bf16.mxu0 %v9605_v48  ;;  %v811_v48 = vld [vmem:[#allocation8 + $0x218] sm:$0xff] }
 0x3b1   : > { %4832 = vmatprep.subr.bf16.mxu1 %v9607_v51  ;;  %v815_v49 = vld [vmem:[#allocation8 + $0x238] sm:$0xff]  ;;  %v9669_v51 = vcombine.high %v810_v4, %v814_v47 }
 0x3b2   : > { %4736 = vmatmul.mubr.bf16.vlgmr.msra.gmra.mrb[0].mxu0 %v12488_v60  ;;  %v9671_v52 = vcombine.high %v811_v48, %v815_v49 }
 0x3b3   : > { %4779 = vmatmul.mubr.bf16.vlgmr.msra.gmra.mrb[0].mxu1 %v12488_v60  ;;  %4790 = vmatpush1.bf16.msra.mxu0 %v9604_v57  ;;  %v822_v57 = vld [vmem:[#allocation8 + $0x270] sm:$0xff] }
 0x3b4   : > { %9717 = vmatprep.mubr.msk.bf16.mxu0 %vm4675_vm15, %v12456_v40  ;;  %4833 = vmatpush1.bf16.msra.mxu1 %v9606_v61  ;;  %v9668_v61 = vcombine.low %v810_v4, %v814_v47  ;;  %v9677_v45 = vcombine.high %v818_v55, %v822_v57  ;;  %v851_v4 = vld [vmem:[#allocation8 + $0x358] sm:$0xff] }
 0x3b5   : > { %9719 = vmatprep.mubr.msk.bf16.mxu1 %vm4675_vm15, %v12456_v40  ;;  %4791 = vmatprep.subr.bf16.mxu0 %v9613_v62  ;;  %v9628_v40 = vcombine.low %v770_v43, %v774_v56  ;;  %v9670_v62 = vcombine.low %v811_v48, %v815_v49  ;;  %v9676_v43 = vcombine.low %v818_v55, %v822_v57  ;;  %v4877_v57 = vlaneseq }
 0x3b6   : > { %4834 = vmatprep.subr.bf16.mxu1 %v9615_v46  ;;  %v826_v46 = vld [vmem:[#allocation8 + $0x290] sm:$0xff]  ;;  %v9678_v56 = vcombine.low %v819_v59, %v823_v20  ;;  %v9702_v48 = vcombine.low %v843_v12, %v847_v42  ;;  %v12524_v20 = vld [vmem:[#allocation11] sm:$0xff] }
 0x3b7   : > { %4792 = vmatpush1.bf16.msra.mxu0 %v9612_v0  ;;  %v827_v0 = vld [vmem:[#allocation8 + $0x298] sm:$0xff]  ;;  %v9685_v21 = vcombine.high %v826_v46, %v830_v44  ;;  %v9684_v53 = vcombine.low %v826_v46, %v830_v44  ;;  %v12522_v59 = vshrl.u32 %v4877_v57, 7  ;;  %v10729_v57 = vld [vmem:[#allocation14 + $0x188] ss:$16 sps:$4 sm:$0xff]  }
 0x3b8   : > { %4835 = vmatpush1.bf16.msra.mxu1 %v9614_v1  ;;  %4793 = vmatprep.subr.bf16.mxu0 %v9621_v2  ;;  %v831_v1 = vld [vmem:[#allocation8 + $0x2b8] sm:$0xff] }
 0x3b9   : > { %4836 = vmatprep.subr.bf16.mxu1 %v9623_v37  ;;  %v4891_v46 = vsub.s32 3, %v12522_v59 }
 0x3bb   : > { %4794 = vmatpush1.bf16.msra.mxu0 %v9620_v22 }
 0x3bc   : > { %4837 = vmatpush1.bf16.msra.mxu1 %v9622_v39  ;;  %4795 = vmatprep.subr.bf16.mxu0 %v9629_v3  ;;  %v10578_v54 = vpop.permute.xlu0 %10577 }
 0x3bd   : > { %4838 = vmatprep.subr.bf16.mxu1 %v9631_v6  ;;  %v10580_v2 = vunpack.i.h.bf16 %v10578_v54  ;;  %v10579_v37 = vunpack.i.l.bf16 %v10578_v54  ;;  %v9687_v6 = vcombine.high %v827_v0, %v831_v1  ;;  %v12548_v54 = vrot.slane %v12524_v20, %v4891_v46 }
 0x3bf   : > { %4796 = vmatpush1.bf16.msra.mxu0 %v9628_v40  ;;  %v5234_v19 = vpop.permute.xlu1 %5233  ;;  %v5239_v22 = vsel %vm495_vm12, 0.0, %v10580_v2  ;;  %v5238_v39 = vsel %vm495_vm12, 0.0, %v10579_v37  ;;  %v10657_v2 = vld [vmem:[#allocation14 + $0x8] ss:$16 sps:$4 sm:$0xff]   ;;  %v10659_v37 = vld [vmem:[#allocation14 + $0xc] ss:$16 sps:$4 sm:$0xff]  }
 0x3c0   : > { %4839 = vmatpush1.bf16.msra.mxu1 %v9630_v14  ;;  %4797 = vmatprep.subr.bf16.mxu0 %v9637_v11  ;;  %v5240_v3 = vsel %vm495_vm12, 0.0, %v5234_v19  ;;  %v12500_v9 = vsel %vm5241_vm9, %v5238_v39, 0.0  ;;  %v12503_v10 = vsel %vm5241_vm9, %v5239_v22, 0.0  ;;  %v835_v14 = vld [vmem:[#allocation8 + $0x2d8] sm:$0xff]  ;;  %v10671_v39 = vld [vmem:[#allocation14 + $0x4c] ss:$16 sps:$4 sm:$0xff]  }
 0x3c1   : > { %4840 = vmatprep.subr.bf16.mxu1 %v9639_v13  ;;  %v5244_v40 = vsel %vm5241_vm9, %v5240_v3, 0.0  ;;  %v839_v11 = vld [vmem:[#allocation8 + $0x2f8] sm:$0xff]  ;;  %v5248_v13 = vrot.slane %v12500_v9, 1  ;;  %v5249_v16 = vrot.slane %v12503_v10, 1  ;;  %v5259_v58 = vrot.slane %v12500_v9, 2 }
 0x3c2   : > { %v5251_v17 = vrot.slane %v5244_v40, 1  ;;  %v9695_v26 = vcombine.high %v835_v14, %v839_v11  ;;  %v10660_v19 = vld [vmem:[#allocation14 + $0x20] ss:$16 sps:$4 sm:$0xff]   ;;  %v10668_v22 = vld [vmem:[#allocation14 + $0x44] ss:$16 sps:$4 sm:$0xff]  }
 0x3c3   : > { %4798 = vmatpush1.bf16.msra.mxu0 %v9636_v18  ;;  %v9686_v18 = vcombine.low %v827_v0, %v831_v1  ;;  %v5250_v24 = vsel %vm506_vm4, %v5248_v13, %v5249_v16  ;;  %v10654_v0 = vld [vmem:[#allocation14] ss:$16 sps:$4 sm:$0xff]   ;;  %v10656_v1 = vld [vmem:[#allocation14 + $0x4] ss:$16 sps:$4 sm:$0xff]   ;;  %v10683_v13 = vld [vmem:[#allocation14 + $0x8c] ss:$16 sps:$4 sm:$0xff]  }
 0x3c4   : > { %4841 = vmatpush1.bf16.msra.mxu1 %v9638_v15  ;;  %4799 = vmatprep.subr.bf16.mxu0 %v9645_v7  ;;  %v5260_v15 = vrot.slane %v12503_v10, 2  ;;  %v5262_v7 = vrot.slane %v5244_v40, 2  ;;  %v5252_v25 = vsel %vm506_vm4, %v5249_v16, %v5251_v17  ;;  %v10666_v3 = vld [vmem:[#allocation14 + $0x40] ss:$16 sps:$4 sm:$0xff]   ;;  %v10681_v17 = vld [vmem:[#allocation14 + $0x88] ss:$16 sps:$4 sm:$0xff]  }
 0x3c5   : > { %4842 = vmatprep.subr.bf16.mxu1 %v9647_v23  ;;  %v9693_v23 = vcombine.high %v834_v8, %v838_v41  ;;  %v10674_v8 = vld [vmem:[#allocation14 + $0x64] ss:$16 sps:$4 sm:$0xff]   ;;  %v10677_v41 = vld [vmem:[#allocation14 + $0x6c] ss:$16 sps:$4 sm:$0xff]   ;;  %v10672_v40 = vld [vmem:[#allocation14 + $0x60] ss:$16 sps:$4 sm:$0xff]  }
 0x3c6   : > { %v10678_v16 = vld [vmem:[#allocation14 + $0x80] ss:$16 sps:$4 sm:$0xff]  }
 0x3c7   : > { %4800 = vmatpush1.bf16.msra.mxu0 %v9644_v28  ;;  %v846_v28 = vld [vmem:[#allocation8 + $0x330] sm:$0xff] }
 0x3c8   : > { %4843 = vmatpush1.bf16.msra.mxu1 %v9646_v29  ;;  %4801 = vmatprep.subr.bf16.mxu0 %v9653_v30  ;;  %v5261_v29 = vsel %vm518_vm6, %v5259_v58, %v5260_v15  ;;  %v5263_v30 = vsel %vm518_vm6, %v5260_v15, %v5262_v7  ;;  %v9700_v47 = vcombine.low %v842_v27, %v846_v28  ;;  %v10686_v58 = vld [vmem:[#allocation14 + $0xa4] ss:$16 sps:$4 sm:$0xff]   ;;  %v10687_v15 = vld [vmem:[#allocation14 + $0xa8] ss:$16 sps:$4 sm:$0xff]  }
 0x3c9   : > { %4844 = vmatprep.subr.bf16.mxu1 %v9655_v5  ;;  %v10581_v5 = vpack.i.bf16 %v5252_v25, %v5250_v24  ;;  %v10586_v31 = vpack.i.bf16 %v5263_v30, %v5261_v29  ;;  %v10692_v7 = vld [vmem:[#allocation14 + $0xc4] ss:$16 sps:$4 sm:$0xff]   ;;  %v10690_v24 = vld [vmem:[#allocation14 + $0xc0] ss:$16 sps:$4 sm:$0xff]   ;;  %v10693_v25 = vld [vmem:[#allocation14 + $0xc8] ss:$16 sps:$4 sm:$0xff]  }
 0x3ca   : > { %v10699_v29 = vld [vmem:[#allocation14 + $0xe8] ss:$16 sps:$4 sm:$0xff]   ;;  %v10704_v30 = vld [vmem:[#allocation14 + $0x104] ss:$16 sps:$4 sm:$0xff]  }
 0x3cb   : > { %4802 = vmatpush1.bf16.msra.mxu0 %v9652_v33  ;;  %10582 = vrot.lane.b32.xlu0 %v10581_v5, %s11802_s13  ;;  %v9694_v33 = vcombine.low %v835_v14, %v839_v11  ;;  %v10675_v14 = vld [vmem:[#allocation14 + $0x68] ss:$16 sps:$4 sm:$0xff]   ;;  %v10680_v11 = vld [vmem:[#allocation14 + $0x84] ss:$16 sps:$4 sm:$0xff]   ;;  %v10707_v5 = vld [vmem:[#allocation14 + $0x10c] ss:$16 sps:$4 sm:$0xff]  }
 0x3cc   : > { %4845 = vmatpush1.bf16.msra.mxu1 %v9654_v34  ;;  %4803 = vmatprep.subr.bf16.mxu0 %v9661_v35  ;;  %v9701_v34 = vcombine.high %v842_v27, %v846_v28  ;;  %v9703_v35 = vcombine.high %v843_v12, %v847_v42  ;;  %v10701_v27 = vld [vmem:[#allocation14 + $0xec] ss:$16 sps:$4 sm:$0xff]   ;;  %v10696_v28 = vld [vmem:[#allocation14 + $0xe0] ss:$16 sps:$4 sm:$0xff]   ;;  %v10705_v42 = vld [vmem:[#allocation14 + $0x108] ss:$16 sps:$4 sm:$0xff]  }
 0x3cd   : > { %4846 = vmatprep.subr.bf16.mxu1 %v9663_v36  ;;  %v850_v36 = vld [vmem:[#allocation8 + $0x350] sm:$0xff]  ;;  %10587 = vrot.lane.b32.xlu1 %v10586_v31, %s11795_s14  ;;  %v10702_v12 = vld [vmem:[#allocation14 + $0x100] ss:$16 sps:$4 sm:$0xff]   ;;  %v10710_v31 = vld [vmem:[#allocation14 + $0x124] ss:$16 sps:$4 sm:$0xff]   ;;  %s10230_s14 = sshll.u32 %s11879_s15, 10 }
 0x3ce   : > { %v9709_v49 = vcombine.high %v850_v36, %v850_v36  ;;  %s13013_s15 = sld [smem:[#allocation26_spill]]  ;;  %s11688_s13 = scalar_lea.vmem %s12919_s19, 1024 }
 0x3cf   : > { %4804 = vmatpush1.bf16.msra.mxu0 %v9660_v38  ;;  %v9708_v38 = vcombine.low %v850_v36, %v850_v36  ;;  %v10719_v36 = vld [vmem:[#allocation14 + $0x14c] ss:$16 sps:$4 sm:$0xff]   ;;  %p11689_p13 = scmp.ne.s32.totalorder %s12919_s19, %s11688_s13  ;;  %p11696_p9 = scmp.lt.s32.totalorder %s11694_s22, %s11688_s13 }
 0x3d0   : > { %4847 = vmatpush1.bf16.msra.mxu1 %v9662_v50  ;;  %4805 = vmatprep.subr.bf16.mxu0 %v9669_v51  ;;  %v9711_v50 = vcombine.high %v851_v4, %v851_v4  ;;  %v9710_v51 = vcombine.low %v851_v4, %v851_v4  ;;  %v10714_v4 = vld [vmem:[#allocation14 + $0x140] ss:$16 sps:$4 sm:$0xff]  }
 0x3d1   : > { %4848 = vmatprep.subr.bf16.mxu1 %v9671_v52  ;;  %v4692_v52 = vsel %vm476_vm0, %v9708_v38, 0  ;;  %v10720_v38 = vld [vmem:[#allocation14 + $0x160] ss:$16 sps:$4 sm:$0xff]   ;;  %p11690_p3 = pnand %p11689_p13, %p13014_p8  ;;  %p11697_p4 = por %p11696_p9, %p11695_p7 }
 0x3d2   : > { %v4698_v55 = vsel %vm476_vm0, %v9710_v51, 0  ;;  %v10728_v51 = vld [vmem:[#allocation14 + $0x184] ss:$16 sps:$4 sm:$0xff]  }
 0x3d3   : > { %4806 = vmatpush1.bf16.msra.mxu0 %v9668_v61  ;;  %v4879_v61 = vsub.s32 0, %v12522_v59  ;;  %p11691_p0 = pneg %p11690_p3 }
 0x3d4   : > { %4849 = vmatpush1.bf16.msra.mxu1 %v9670_v62  ;;  %4807 = vmatprep.subr.bf16.mxu0 %v9677_v45  ;;  %v4887_v45 = vsub.s32 2, %v12522_v59  ;;  %s12916_s26 = scalar_lea.hbm %s13013_s15, %s10230_s14 }
 0x3d5   : > { %4850 = vmatprep.subr.bf16.mxu1 %v9679_v63  ;;  %v12530_v62 = vrot.slane %v12524_v20, %v4879_v61  ;;  %v4883_v63 = vsub.s32 1, %v12522_v59  ;;  %p11698_p2 = pnand %p11697_p4, %p11691_p0 }
 0x3d7   : > { %4808 = vmatpush1.bf16.msra.mxu0 %v9676_v43  ;;  %v12543_v44 = vrot.slane %v12524_v20, %v4883_v63  ;;  %v10662_v43 = vld [vmem:[#allocation14 + $0x24] ss:$16 sps:$4 sm:$0xff]  }
 0x3d8   : > { %4851 = vmatpush1.bf16.msra.mxu1 %v9678_v56  ;;  %4809 = vmatprep.subr.bf16.mxu0 %v9685_v21  ;;  %v10665_v56 = vld [vmem:[#allocation14 + $0x2c] ss:$16 sps:$4 sm:$0xff]   ;;  %v10663_v21 = vld [vmem:[#allocation14 + $0x28] ss:$16 sps:$4 sm:$0xff]  }
 0x3d9   : > { %4852 = vmatprep.subr.bf16.mxu1 %v9687_v6  ;;  %v10669_v6 = vld [vmem:[#allocation14 + $0x48] ss:$16 sps:$4 sm:$0xff]  }
 0x3db   : > { %4810 = vmatpush1.bf16.msra.mxu0 %v9684_v53  ;;  %v10689_v53 = vld [vmem:[#allocation14 + $0xac] ss:$16 sps:$4 sm:$0xff]  }
 0x3dc   : > { %4853 = vmatpush1.bf16.msra.mxu1 %v9686_v18  ;;  %4811 = vmatprep.subr.bf16.mxu0 %v9693_v23  ;;  %v10684_v18 = vld [vmem:[#allocation14 + $0xa0] ss:$16 sps:$4 sm:$0xff]   ;;  %v10695_v23 = vld [vmem:[#allocation14 + $0xcc] ss:$16 sps:$4 sm:$0xff]  }
 0x3dd   : > { %4854 = vmatprep.subr.bf16.mxu1 %v9695_v26  ;;  %v10698_v26 = vld [vmem:[#allocation14 + $0xe4] ss:$16 sps:$4 sm:$0xff]  }
 0x3df   : > { %4812 = vmatpush1.bf16.msra.mxu0 %v9692_v32  ;;  %v10713_v32 = vld [vmem:[#allocation14 + $0x12c] ss:$16 sps:$4 sm:$0xff]  }
 0x3e0   : > { %4855 = vmatpush1.bf16.msra.mxu1 %v9694_v33  ;;  %4813 = vmatprep.subr.bf16.mxu0 %v9701_v34  ;;  %v10708_v33 = vld [vmem:[#allocation14 + $0x120] ss:$16 sps:$4 sm:$0xff]   ;;  %v10711_v34 = vld [vmem:[#allocation14 + $0x128] ss:$16 sps:$4 sm:$0xff]  }
 0x3e1   : > { %4856 = vmatprep.subr.bf16.mxu1 %v9703_v35  ;;  %v10716_v35 = vld [vmem:[#allocation14 + $0x144] ss:$16 sps:$4 sm:$0xff]  }
 0x3e3   : > { %4814 = vmatpush1.bf16.msra.mxu0 %v9700_v47  ;;  %v10717_v47 = vld [vmem:[#allocation14 + $0x148] ss:$16 sps:$4 sm:$0xff]  }
 0x3e4   : > { %4857 = vmatpush1.bf16.msra.mxu1 %v9702_v48  ;;  %9716 = vmatprep.subr.msk.bf16.mxu0 %vm476_vm0, %v9709_v49  ;;  %v10722_v48 = vld [vmem:[#allocation14 + $0x164] ss:$16 sps:$4 sm:$0xff]   ;;  %v10725_v49 = vld [vmem:[#allocation14 + $0x16c] ss:$16 sps:$4 sm:$0xff]  }
 0x3e5   : > { %9718 = vmatprep.subr.msk.bf16.mxu1 %vm476_vm0, %v9711_v50  ;;  %v10723_v50 = vld [vmem:[#allocation14 + $0x168] ss:$16 sps:$4 sm:$0xff]  }
 0x3e7   : > { %4816 = vmatpush1.bf16.msra.mxu0 %v4692_v52  ;;  %v10731_v52 = vld [vmem:[#allocation14 + $0x18c] ss:$16 sps:$4 sm:$0xff]  }
 0x3e8   : > { %4859 = vmatpush1.bf16.msra.mxu1 %v4698_v55  ;;  %6047 = vmatprep.subr.bf16.mxu0 %v10656_v1  ;;  %v10726_v55 = vld [vmem:[#allocation14 + $0x180] ss:$16 sps:$4 sm:$0xff]  }
 0x3e9   : > { %6090 = vmatprep.subr.bf16.mxu1 %v10659_v37  ;;  %v5761_v37 = vld [vmem:[#allocation14 + $0x1a8] sm:$0xff] }
 0x3ea   : > { %4822 = vmatmul.mubr.bf16.vlgmr.msra.gmra.mrb[4].mxu0 %v12488_v60 }
 0x3eb   : > { %4865 = vmatmul.mubr.bf16.vlgmr.msra.gmra.mrb[4].mxu1 %v12488_v60  ;;  %v12538_v60 = vrot.slane %v12524_v20, %v4887_v45  ;;  %6048 = vmatpush1.bf16.msra.mxu0 %v10654_v0 }
 0x3ec   : > { %6091 = vmatpush1.bf16.msra.mxu1 %v10657_v2  ;;  %6049 = vmatprep.subr.bf16.mxu0 %v10662_v43  ;;  %v5760_v2 = vld [vmem:[#allocation14 + $0x1a0] sm:$0xff] }
 0x3ed   : > { %6092 = vmatprep.subr.bf16.mxu1 %v10665_v56 }
 0x3ef   : > { %6050 = vmatpush1.bf16.msra.mxu0 %v10660_v19 }
 0x3f0   : > { %6093 = vmatpush1.bf16.msra.mxu1 %v10663_v21  ;;  %6051 = vmatprep.subr.bf16.mxu0 %v10668_v22  ;;  %v9773_v22 = vcombine.high %v5760_v2, %v5760_v2 }
 0x3f1   : > { %6094 = vmatprep.subr.bf16.mxu1 %v10671_v39  ;;  %v9775_v39 = vcombine.high %v5761_v37, %v5761_v37 }
 0x3f3   : > { %6052 = vmatpush1.bf16.msra.mxu0 %v10666_v3  ;;  %v9772_v3 = vcombine.low %v5760_v2, %v5760_v2  ;;  %v10792_v2 = vld [vmem:[#allocation12 + $0x124] ss:$16 sps:$4 sm:$0xff]  }
 0x3f4   : > { %6095 = vmatpush1.bf16.msra.mxu1 %v10669_v6  ;;  %6053 = vmatprep.subr.bf16.mxu0 %v10674_v8  ;;  %v9774_v6 = vcombine.low %v5761_v37, %v5761_v37  ;;  %v10795_v37 = vld [vmem:[#allocation12 + $0x12c] ss:$16 sps:$4 sm:$0xff]  }
 0x3f5   : > { %6096 = vmatprep.subr.bf16.mxu1 %v10677_v41 }
 0x3f7   : > { %6054 = vmatpush1.bf16.msra.mxu0 %v10672_v40 }
 0x3f8   : > { %6097 = vmatpush1.bf16.msra.mxu1 %v10675_v14  ;;  %6055 = vmatprep.subr.bf16.mxu0 %v10680_v11 }
 0x3f9   : > { %6098 = vmatprep.subr.bf16.mxu1 %v10683_v13 }
 0x3fb   : > { %6056 = vmatpush1.bf16.msra.mxu0 %v10678_v16  ;;  %v6036_v16 = vsel %vm476_vm0, %v9772_v3, 0  ;;  %v10798_v3 = vld [vmem:[#allocation12 + $0x144] ss:$16 sps:$4 sm:$0xff]  }
 0x3fc   : > { %6099 = vmatpush1.bf16.msra.mxu1 %v10681_v17  ;;  %6057 = vmatprep.subr.bf16.mxu0 %v10686_v58  ;;  %v6042_v17 = vsel %vm476_vm0, %v9774_v6, 0  ;;  %v10739_v58 = vld [vmem:[#allocation12 + $0x8] ss:$16 sps:$4 sm:$0xff]  }
 0x3fd   : > { %6100 = vmatprep.subr.bf16.mxu1 %v10689_v53  ;;  %v10741_v53 = vld [vmem:[#allocation12 + $0xc] ss:$16 sps:$4 sm:$0xff]  }
 0x3ff   : > { %6058 = vmatpush1.bf16.msra.mxu0 %v10684_v18  ;;  %v10744_v18 = vld [vmem:[#allocation12 + $0x24] ss:$16 sps:$4 sm:$0xff]  }
 0x400   : > { %6101 = vmatpush1.bf16.msra.mxu1 %v10687_v15  ;;  %6059 = vmatprep.subr.bf16.mxu0 %v10692_v7  ;;  %v10747_v15 = vld [vmem:[#allocation12 + $0x2c] ss:$16 sps:$4 sm:$0xff]   ;;  %v10742_v7 = vld [vmem:[#allocation12 + $0x20] ss:$16 sps:$4 sm:$0xff]  }
 0x401   : > { %6102 = vmatprep.subr.bf16.mxu1 %v10695_v23  ;;  %v10745_v23 = vld [vmem:[#allocation12 + $0x28] ss:$16 sps:$4 sm:$0xff]  }
 0x403   : > { %6060 = vmatpush1.bf16.msra.mxu0 %v10690_v24  ;;  %v10750_v24 = vld [vmem:[#allocation12 + $0x44] ss:$16 sps:$4 sm:$0xff]  }
 0x404   : > { %6103 = vmatpush1.bf16.msra.mxu1 %v10693_v25  ;;  %6061 = vmatprep.subr.bf16.mxu0 %v10698_v26  ;;  %v10753_v25 = vld [vmem:[#allocation12 + $0x4c] ss:$16 sps:$4 sm:$0xff]   ;;  %v10748_v26 = vld [vmem:[#allocation12 + $0x40] ss:$16 sps:$4 sm:$0xff]  }
 0x405   : > { %6104 = vmatprep.subr.bf16.mxu1 %v10701_v27  ;;  %v10751_v27 = vld [vmem:[#allocation12 + $0x48] ss:$16 sps:$4 sm:$0xff]  }
 0x407   : > { %6062 = vmatpush1.bf16.msra.mxu0 %v10696_v28  ;;  %v10756_v28 = vld [vmem:[#allocation12 + $0x64] ss:$16 sps:$4 sm:$0xff]  }
 0x408   : > { %6105 = vmatpush1.bf16.msra.mxu1 %v10699_v29  ;;  %6063 = vmatprep.subr.bf16.mxu0 %v10704_v30  ;;  %v10759_v29 = vld [vmem:[#allocation12 + $0x6c] ss:$16 sps:$4 sm:$0xff]   ;;  %v10754_v30 = vld [vmem:[#allocation12 + $0x60] ss:$16 sps:$4 sm:$0xff]  }
 0x409   : > { %6106 = vmatprep.subr.bf16.mxu1 %v10707_v5  ;;  %v10757_v5 = vld [vmem:[#allocation12 + $0x68] ss:$16 sps:$4 sm:$0xff]  }
 0x40b   : > { %6064 = vmatpush1.bf16.msra.mxu0 %v10702_v12  ;;  %v10762_v12 = vld [vmem:[#allocation12 + $0x84] ss:$16 sps:$4 sm:$0xff]  }
 0x40c   : > { %6107 = vmatpush1.bf16.msra.mxu1 %v10705_v42  ;;  %6065 = vmatprep.subr.bf16.mxu0 %v10710_v31  ;;  %v10765_v42 = vld [vmem:[#allocation12 + $0x8c] ss:$16 sps:$4 sm:$0xff]   ;;  %v10760_v31 = vld [vmem:[#allocation12 + $0x80] ss:$16 sps:$4 sm:$0xff]  }
 0x40d   : > { %6108 = vmatprep.subr.bf16.mxu1 %v10713_v32  ;;  %v10763_v32 = vld [vmem:[#allocation12 + $0x88] ss:$16 sps:$4 sm:$0xff]  }
 0x40f   : > { %6066 = vmatpush1.bf16.msra.mxu0 %v10708_v33  ;;  %v10768_v33 = vld [vmem:[#allocation12 + $0xa4] ss:$16 sps:$4 sm:$0xff]  }
 0x410   : > { %6109 = vmatpush1.bf16.msra.mxu1 %v10711_v34  ;;  %6067 = vmatprep.subr.bf16.mxu0 %v10716_v35  ;;  %v10771_v34 = vld [vmem:[#allocation12 + $0xac] ss:$16 sps:$4 sm:$0xff]   ;;  %v10766_v35 = vld [vmem:[#allocation12 + $0xa0] ss:$16 sps:$4 sm:$0xff]  }
 0x411   : > { %6110 = vmatprep.subr.bf16.mxu1 %v10719_v36  ;;  %v10769_v36 = vld [vmem:[#allocation12 + $0xa8] ss:$16 sps:$4 sm:$0xff]  }
 0x413   : > { %6068 = vmatpush1.bf16.msra.mxu0 %v10714_v4  ;;  %v10774_v4 = vld [vmem:[#allocation12 + $0xc4] ss:$16 sps:$4 sm:$0xff]  }
 0x414   : > { %6111 = vmatpush1.bf16.msra.mxu1 %v10717_v47  ;;  %6069 = vmatprep.subr.bf16.mxu0 %v10722_v48  ;;  %v10777_v47 = vld [vmem:[#allocation12 + $0xcc] ss:$16 sps:$4 sm:$0xff]   ;;  %v10772_v48 = vld [vmem:[#allocation12 + $0xc0] ss:$16 sps:$4 sm:$0xff]  }
 0x415   : > { %6112 = vmatprep.subr.bf16.mxu1 %v10725_v49  ;;  %v10775_v49 = vld [vmem:[#allocation12 + $0xc8] ss:$16 sps:$4 sm:$0xff]  }
 0x417   : > { %6070 = vmatpush1.bf16.msra.mxu0 %v10720_v38  ;;  %v10780_v38 = vld [vmem:[#allocation12 + $0xe4] ss:$16 sps:$4 sm:$0xff]  }
 0x418   : > { %6113 = vmatpush1.bf16.msra.mxu1 %v10723_v50  ;;  %6071 = vmatprep.subr.bf16.mxu0 %v10728_v51  ;;  %v10783_v50 = vld [vmem:[#allocation12 + $0xec] ss:$16 sps:$4 sm:$0xff]   ;;  %v10778_v51 = vld [vmem:[#allocation12 + $0xe0] ss:$16 sps:$4 sm:$0xff]  }
 0x419   : > { %6114 = vmatprep.subr.bf16.mxu1 %v10731_v52  ;;  %v10781_v52 = vld [vmem:[#allocation12 + $0xe8] ss:$16 sps:$4 sm:$0xff]  }
 0x41b   : > { %6072 = vmatpush1.bf16.msra.mxu0 %v10726_v55  ;;  %v10786_v55 = vld [vmem:[#allocation12 + $0x104] ss:$16 sps:$4 sm:$0xff]  }
 0x41c   : > { %6115 = vmatpush1.bf16.msra.mxu1 %v10729_v57  ;;  %9776 = vmatprep.subr.msk.bf16.mxu0 %vm476_vm0, %v9773_v22  ;;  %v10789_v57 = vld [vmem:[#allocation12 + $0x10c] ss:$16 sps:$4 sm:$0xff]  }
 0x41d   : > { %9778 = vmatprep.subr.msk.bf16.mxu1 %vm476_vm0, %v9775_v39  ;;  %v10793_v39 = vld [vmem:[#allocation12 + $0x128] ss:$16 sps:$4 sm:$0xff]   ;;  %vm12699_vm0 = vmneg %vm728_vm11 }
 0x41f   : > { %6074 = vmatpush1.bf16.msra.mxu0 %v6036_v16 }
 0x420   : > { %6117 = vmatpush1.bf16.msra.mxu1 %v6042_v17 }
 0x421   : > { %8597 = vmatprep.subr.bf16.mxu1 %v10741_v53 }
 0x43d   : > { %v10583_v1 = vpop.permute.xlu0 %10582 }
 0x43e   : > { %v10585_v19 = vunpack.i.h.bf16 %v10583_v1  ;;  %v10584_v21 = vunpack.i.l.bf16 %v10583_v1  ;;  %v10787_v1 = vld [vmem:[#allocation12 + $0x108] ss:$16 sps:$4 sm:$0xff]  }
 0x43f   : > { %v10588_v0 = vpop.permute.xlu1 %10587 }
 0x440   : > { %v10590_v43 = vunpack.i.h.bf16 %v10588_v0  ;;  %v10589_v56 = vunpack.i.l.bf16 %v10588_v0  ;;  %v5271_v8 = vsel %vm601_vm5, %v12503_v10, %v10585_v19  ;;  %v5270_v40 = vsel %vm601_vm5, %v12500_v9, %v10584_v21  ;;  %v10736_v9 = vld [vmem:[#allocation12] ss:$16 sps:$4 sm:$0xff]   ;;  %v10738_v10 = vld [vmem:[#allocation12 + $0x4] ss:$16 sps:$4 sm:$0xff]  }
 0x441   : > { %v5274_v11 = vpack.c.bf16 %v5271_v8, %v5270_v40  ;;  %8296 = vmatprep.subr.bf16.mxu0 %v10738_v10  ;;  %v10784_v0 = vld [vmem:[#allocation12 + $0x100] ss:$16 sps:$4 sm:$0xff]  }
 0x442   : > { %v5273_v41 = vsel %vm610_vm1, %v10585_v19, %v10590_v43  ;;  %v5272_v14 = vsel %vm610_vm1, %v10584_v21, %v10589_v56  ;;  %v10790_v56 = vld [vmem:[#allocation12 + $0x120] ss:$16 sps:$4 sm:$0xff]   ;;  %vm10214_vm1 = vmpackc.low %vm12699_vm0, %vm12699_vm0 }
 0x443   : > { %v5275_v13 = vpack.c.bf16 %v5273_v41, %v5272_v14  ;;  %v10801_v14 = vld [vmem:[#allocation12 + $0x14c] ss:$16 sps:$4 sm:$0xff]  }
 0x445   : > { %9777 = vmatprep.mubr.msk.bf16.mxu0 %vm4675_vm15, %v5275_v13  ;;  %9779 = vmatprep.mubr.msk.bf16.mxu1 %vm4675_vm15, %v5275_v13 }
 0x446   : > { %6080 = vmatmul.mubr.bf16.vlgmr.msra.gmra.mrb[8].mxu0 %v5274_v11  ;;  %6123 = vmatmul.mubr.bf16.vlgmr.msra.gmra.mrb[8].mxu1 %v5274_v11 }
 0x447   : > { %8297 = vmatpush1.bf16.msra.mxu0 %v10736_v9  ;;  %8598 = vmatpush1.bf16.msra.mxu1 %v10739_v58 }
 0x448   : > { %8298 = vmatprep.subr.bf16.mxu0 %v10744_v18  ;;  %8599 = vmatprep.subr.bf16.mxu1 %v10747_v15 }
 0x44b   : > { %8299 = vmatpush1.bf16.msra.mxu0 %v10742_v7  ;;  %8600 = vmatpush1.bf16.msra.mxu1 %v10745_v23  ;;  %v10796_v7 = vld [vmem:[#allocation12 + $0x140] ss:$16 sps:$4 sm:$0xff]  }
 0x44c   : > { %8300 = vmatprep.subr.bf16.mxu0 %v10750_v24  ;;  %8601 = vmatprep.subr.bf16.mxu1 %v10753_v25 }
 0x44f   : > { %8301 = vmatpush1.bf16.msra.mxu0 %v10748_v26  ;;  %8602 = vmatpush1.bf16.msra.mxu1 %v10751_v27  ;;  %v10799_v26 = vld [vmem:[#allocation12 + $0x148] ss:$16 sps:$4 sm:$0xff]  }
 0x450   : > { %8302 = vmatprep.subr.bf16.mxu0 %v10756_v28  ;;  %8603 = vmatprep.subr.bf16.mxu1 %v10759_v29  ;;  %v10807_v28 = vld [vmem:[#allocation12 + $0x16c] ss:$16 sps:$4 sm:$0xff]   ;;  %v10802_v29 = vld [vmem:[#allocation12 + $0x160] ss:$16 sps:$4 sm:$0xff]  }
 0x453   : > { %8303 = vmatpush1.bf16.msra.mxu0 %v10754_v30  ;;  %8604 = vmatpush1.bf16.msra.mxu1 %v10757_v5  ;;  %v10805_v30 = vld [vmem:[#allocation12 + $0x168] ss:$16 sps:$4 sm:$0xff]   ;;  %v10810_v5 = vld [vmem:[#allocation12 + $0x184] ss:$16 sps:$4 sm:$0xff]  }
 0x454   : > { %8304 = vmatprep.subr.bf16.mxu0 %v10762_v12  ;;  %8605 = vmatprep.subr.bf16.mxu1 %v10765_v42  ;;  %v10808_v12 = vld [vmem:[#allocation12 + $0x180] ss:$16 sps:$4 sm:$0xff]   ;;  %v10811_v42 = vld [vmem:[#allocation12 + $0x188] ss:$16 sps:$4 sm:$0xff]  }
 0x457   : > { %8305 = vmatpush1.bf16.msra.mxu0 %v10760_v31  ;;  %8606 = vmatpush1.bf16.msra.mxu1 %v10763_v32  ;;  %v10816_v31 = vld [vmem:[#allocation12 + $0x1a4] ss:$16 sps:$4 sm:$0xff]   ;;  %v10819_v32 = vld [vmem:[#allocation12 + $0x1ac] ss:$16 sps:$4 sm:$0xff]  }
 0x458   : > { %8306 = vmatprep.subr.bf16.mxu0 %v10768_v33  ;;  %8607 = vmatprep.subr.bf16.mxu1 %v10771_v34 }
 0x45b   : > { %8307 = vmatpush1.bf16.msra.mxu0 %v10766_v35  ;;  %8608 = vmatpush1.bf16.msra.mxu1 %v10769_v36  ;;  %v10814_v36 = vld [vmem:[#allocation12 + $0x1a0] ss:$16 sps:$4 sm:$0xff]  }
 0x45c   : > { %8308 = vmatprep.subr.bf16.mxu0 %v10774_v4  ;;  %8609 = vmatprep.subr.bf16.mxu1 %v10777_v47 }
 0x45f   : > { %8309 = vmatpush1.bf16.msra.mxu0 %v10772_v48  ;;  %8610 = vmatpush1.bf16.msra.mxu1 %v10775_v49  ;;  %v10817_v48 = vld [vmem:[#allocation12 + $0x1a8] ss:$16 sps:$4 sm:$0xff]   ;;  %v10822_v49 = vld [vmem:[#allocation12 + $0x1c4] ss:$16 sps:$4 sm:$0xff]  }
 0x460   : > { %8310 = vmatprep.subr.bf16.mxu0 %v10780_v38  ;;  %8611 = vmatprep.subr.bf16.mxu1 %v10783_v50 }
 0x463   : > { %8311 = vmatpush1.bf16.msra.mxu0 %v10778_v51  ;;  %8612 = vmatpush1.bf16.msra.mxu1 %v10781_v52  ;;  %v10825_v52 = vld [vmem:[#allocation12 + $0x1cc] ss:$16 sps:$4 sm:$0xff]  }
 0x464   : > { %8312 = vmatprep.subr.bf16.mxu0 %v10786_v55  ;;  %8613 = vmatprep.subr.bf16.mxu1 %v10789_v57 }
 0x467   : > { %8313 = vmatpush1.bf16.msra.mxu0 %v10784_v0  ;;  %8614 = vmatpush1.bf16.msra.mxu1 %v10787_v1  ;;  %v12574_v1 = vld [vmem:[#allocation5] sm:$0xff] }
 0x468   : > { %8314 = vmatprep.subr.bf16.mxu0 %v10792_v2  ;;  %8615 = vmatprep.subr.bf16.mxu1 %v10795_v37 }
 0x46b   : > { %8315 = vmatpush1.bf16.msra.mxu0 %v10790_v56  ;;  %8616 = vmatpush1.bf16.msra.mxu1 %v10793_v39 }
 0x46c   : > { %8316 = vmatprep.subr.bf16.mxu0 %v10798_v3  ;;  %8617 = vmatprep.subr.bf16.mxu1 %v10801_v14 }
 0x46f   : > { %8317 = vmatpush1.bf16.msra.mxu0 %v10796_v7  ;;  %8618 = vmatpush1.bf16.msra.mxu1 %v10799_v26 }
 0x470   : > { %8619 = vmatprep.subr.bf16.mxu1 %v10807_v28 }
 0x473   : > { %8620 = vmatpush1.bf16.msra.mxu1 %v10805_v30 }
 0x485   : > { %v4737_v43 = vpop.f32.mrb[0].mxu0 }
 0x486   : > { %v4917_v19 = vadd.f32 %v12530_v62, %v4737_v43  ;;  %v4780_v21 = vpop.f32.mrb[0].mxu1  ;;  %v4739_v22 = vpop.f32.mrb[1].mxu0 }
 0x487   : > { %v4919_v6 = vadd.f32 %v12538_v60, %v4780_v21  ;;  %v4918_v8 = vadd.f32 %v12543_v44, %v4739_v22  ;;  %v4782_v41 = vpop.f32.mrb[1].mxu1  ;;  %v4741_v40 = vpop.f32.mrb[2].mxu0  ;;  %v10820_v21 = vld [vmem:[#allocation12 + $0x1c0] ss:$16 sps:$4 sm:$0xff]  }
 0x488   : > { %v4933_v11 = vmul.f32 0.5, %v4917_v19  ;;  %v4920_v13 = vadd.f32 %v12548_v54, %v4782_v41  ;;  %v4925_v16 = vadd.f32 %v12530_v62, %v4741_v40  ;;  %v4784_v17 = vpop.f32.mrb[2].mxu1  ;;  %v4743_v9 = vpop.f32.mrb[3].mxu0  ;;  %v10804_v62 = vld [vmem:[#allocation12 + $0x164] ss:$16 sps:$4 sm:$0xff]   ;;  %v12579_v19 = vld [vmem:[#allocation5 + $0x10] sm:$0xff] }
 0x489   : > { %v4935_v10 = vmul.f32 0.5, %v4919_v6  ;;  %v4934_v58 = vmul.f32 0.5, %v4918_v8  ;;  %v4927_v53 = vadd.f32 %v12538_v60, %v4784_v17  ;;  %v4926_v18 = vadd.f32 %v12543_v44, %v4743_v9  ;;  %v4786_v15 = vpop.f32.mrb[3].mxu1  ;;  %8318 = vmatprep.subr.bf16.mxu0 %v10804_v62  ;;  %v12584_v8 = vld [vmem:[#allocation5 + $0x8] sm:$0xff]  ;;  %v10823_v41 = vld [vmem:[#allocation12 + $0x1c8] ss:$16 sps:$4 sm:$0xff]  }
 0x48a   : > { %11384 = vtanh.f32 %v4933_v11  ;;  %v4936_v23 = vmul.f32 0.5, %v4920_v13  ;;  %v4937_v24 = vmul.f32 0.5, %v4925_v16  ;;  %v4928_v25 = vadd.f32 %v12548_v54, %v4786_v15  ;;  %v10813_v54 = vld [vmem:[#allocation12 + $0x18c] ss:$16 sps:$4 sm:$0xff]   ;;  %8319 = vmatpush1.bf16.msra.mxu0 %v10802_v29  ;;  %v12592_v17 = vld [vmem:[#allocation5 + $0x18] sm:$0xff] }
 0x48b   : > { %11386 = vtanh.f32 %v4935_v10  ;;  %v4939_v27 = vmul.f32 0.5, %v4927_v53  ;;  %v4938_v60 = vmul.f32 0.5, %v4926_v18  ;;  %8320 = vmatprep.subr.bf16.mxu0 %v10810_v5  ;;  %8621 = vmatprep.subr.bf16.mxu1 %v10813_v54  ;;  %v12600_v18 = vld [vmem:[#allocation5 + $0x20] sm:$0xff] }
 0x48c   : > { %11388 = vtanh.f32 %v4934_v58  ;;  %v4940_v44 = vmul.f32 0.5, %v4928_v25  ;;  %8622 = vmatpush1.bf16.msra.mxu1 %v10811_v42  ;;  %v4903_v42 = vsub.s32 6, %v12522_v59 }
 0x48d   : > { %11390 = vtanh.f32 %v4936_v23  ;;  %8623 = vmatprep.subr.bf16.mxu1 %v10819_v32  ;;  %v4907_v32 = vsub.s32 7, %v12522_v59 }
 0x48e   : > { %11392 = vtanh.f32 %v4937_v24  ;;  %8321 = vmatpush1.bf16.msra.mxu0 %v10808_v12  ;;  %v12608_v24 = vld [vmem:[#allocation5 + $0x30] sm:$0xff]  ;;  %v4895_v12 = vsub.s32 4, %v12522_v59 }
 0x48f   : > { %11394 = vtanh.f32 %v4939_v27  ;;  %8322 = vmatprep.subr.bf16.mxu0 %v10816_v31  ;;  %v12616_v27 = vld [vmem:[#allocation5 + $0x28] sm:$0xff]  ;;  %v4899_v31 = vsub.s32 5, %v12522_v59 }
 0x490   : > { %11396 = vtanh.f32 %v4938_v60  ;;  %8624 = vmatpush1.bf16.msra.mxu1 %v10817_v48 }
 0x491   : > { %11398 = vtanh.f32 %v4940_v44  ;;  %8625 = vmatprep.subr.bf16.mxu1 %v10825_v52  ;;  %v12622_v44 = vld [vmem:[#allocation5 + $0x38] sm:$0xff] }
 0x492   : > { %8323 = vmatpush1.bf16.msra.mxu0 %v10814_v36  ;;  %v4908_v36 = vrot.slane %v12524_v20, %v4907_v32 }
 0x493   : > { %8324 = vmatprep.subr.bf16.mxu0 %v10822_v49 }
 0x494   : > { %v11385_v33 = vpop.eup %11384  ;;  %8626 = vmatpush1.bf16.msra.mxu1 %v10823_v41 }
 0x495   : > { %v11387_v34 = vpop.eup %11386  ;;  %v4949_v35 = vadd.f32 1.0, %v11385_v33  ;;  %v4896_v33 = vrot.slane %v12524_v20, %v4895_v12 }
 0x496   : > { %v11389_v4 = vpop.eup %11388  ;;  %v4951_v47 = vadd.f32 1.0, %v11387_v34  ;;  %8325 = vmatpush1.bf16.msra.mxu0 %v10820_v21  ;;  %v4904_v34 = vrot.slane %v12524_v20, %v4903_v42 }
 0x497   : > { %v11391_v38 = vpop.eup %11390  ;;  %v12570_v50 = vmul.f32 0.5, %v4949_v35  ;;  %v4950_v51 = vadd.f32 1.0, %v11389_v4  ;;  %v4900_v35 = vrot.slane %v12524_v20, %v4899_v31 }
 0x498   : > { %v11393_v55 = vpop.eup %11392  ;;  %v12572_v57 = vmul.f32 0.5, %v4951_v47  ;;  %v4952_v0 = vadd.f32 1.0, %v11391_v38 }
 0x499   : > { %v11395_v2 = vpop.eup %11394  ;;  %v8936_v37 = vsub.f32 1.0, %v12570_v50  ;;  %v12577_v43 = vmul.f32 0.5, %v4950_v51  ;;  %v4953_v56 = vadd.f32 1.0, %v11393_v55 }
 0x49a   : > { %v11397_v22 = vpop.eup %11396  ;;  %v8938_v39 = vsub.f32 1.0, %v12572_v57  ;;  %v12582_v3 = vmul.f32 0.5, %v4952_v0  ;;  %v4955_v6 = vadd.f32 1.0, %v11395_v2 }
 0x49b   : > { %v11399_v40 = vpop.eup %11398  ;;  %v8937_v14 = vsub.f32 1.0, %v12577_v43  ;;  %v12587_v11 = vmul.f32 0.5, %v4953_v56  ;;  %v4954_v13 = vadd.f32 1.0, %v11397_v22  ;;  %v12590_v16 = vmul.f32 %v8936_v37, %v12574_v1 }
 0x49c   : > { %v8939_v9 = vsub.f32 1.0, %v12582_v3  ;;  %v12595_v10 = vmul.f32 0.5, %v4955_v6  ;;  %v4956_v58 = vadd.f32 1.0, %v11399_v40  ;;  %v12598_v53 = vmul.f32 %v8938_v39, %v12579_v19 }
 0x49d   : > { %v8940_v15 = vsub.f32 1.0, %v12587_v11  ;;  %v12603_v7 = vmul.f32 0.5, %v4954_v13  ;;  %v12606_v23 = vmul.f32 %v8937_v14, %v12584_v8 }
 0x49e   : > { %v8942_v25 = vsub.f32 1.0, %v12595_v10  ;;  %v12611_v26 = vmul.f32 0.5, %v4956_v58  ;;  %v12614_v62 = vmul.f32 %v8939_v9, %v12592_v17 }
 0x49f   : > { %v8941_v28 = vsub.f32 1.0, %v12603_v7  ;;  %v12620_v60 = vmul.f32 %v8940_v15, %v12600_v18 }
 0x4a0   : > { %v8943_v29 = vsub.f32 1.0, %v12611_v26  ;;  %v12626_v30 = vmul.f32 %v8942_v25, %v12608_v24 }
 0x4a1   : > { %v12629_v5 = vmul.f32 %v8941_v28, %v12616_v27 }
 0x4a2   : > { %v12632_v54 = vmul.f32 %v8943_v29, %v12622_v44 }
 0x4bd   : > { %v4823_v4 = vpop.f32.mrb[4].mxu0 }
 0x4be   : > { %v4921_v47 = vadd.f32 %v4896_v33, %v4823_v4  ;;  %v4866_v48 = vpop.f32.mrb[4].mxu1  ;;  %v4825_v49 = vpop.f32.mrb[5].mxu0 }
 0x4bf   : > { %v4923_v38 = vadd.f32 %v4904_v34, %v4866_v48  ;;  %v4922_v51 = vadd.f32 %v4900_v35, %v4825_v49  ;;  %v4868_v52 = vpop.f32.mrb[5].mxu1  ;;  %v4827_v55 = vpop.f32.mrb[6].mxu0 }
 0x4c0   : > { %v4965_v0 = vmul.f32 0.5, %v4921_v47  ;;  %v4924_v2 = vadd.f32 %v4908_v36, %v4868_v52  ;;  %v4929_v37 = vadd.f32 %v4896_v33, %v4827_v55  ;;  %v4870_v56 = vpop.f32.mrb[6].mxu1  ;;  %v4829_v21 = vpop.f32.mrb[7].mxu0 }
 0x4c1   : > { %v4967_v22 = vmul.f32 0.5, %v4923_v38  ;;  %v4966_v39 = vmul.f32 0.5, %v4922_v51  ;;  %v4931_v6 = vadd.f32 %v4904_v34, %v4870_v56  ;;  %v4930_v41 = vadd.f32 %v4900_v35, %v4829_v21  ;;  %v4872_v40 = vpop.f32.mrb[7].mxu1 }
 0x4c2   : > { %11400 = vtanh.f32 %v4965_v0  ;;  %v4968_v20 = vmul.f32 0.5, %v4924_v2  ;;  %v4969_v14 = vmul.f32 0.5, %v4929_v37  ;;  %v4932_v13 = vadd.f32 %v4908_v36, %v4872_v40  ;;  %v10826_v40 = vld [vmem:[#allocation12 + $0x1e0] ss:$16 sps:$4 sm:$0xff]  }
 0x4c3   : > { %11402 = vtanh.f32 %v4967_v22  ;;  %v4971_v9 = vmul.f32 0.5, %v4931_v6  ;;  %v4970_v58 = vmul.f32 0.5, %v4930_v41 }
 0x4c4   : > { %11404 = vtanh.f32 %v4966_v39  ;;  %v4972_v15 = vmul.f32 0.5, %v4932_v13  ;;  %v10828_v13 = vld [vmem:[#allocation12 + $0x1e4] ss:$16 sps:$4 sm:$0xff]  }
 0x4c5   : > { %11406 = vtanh.f32 %v4968_v20  ;;  %8326 = vmatprep.subr.bf16.mxu0 %v10828_v13 }
 0x4c6   : > { %11408 = vtanh.f32 %v4969_v14  ;;  %8327 = vmatpush1.bf16.msra.mxu0 %v10826_v40 }
 0x4c7   : > { %11410 = vtanh.f32 %v4971_v9 }
 0x4c8   : > { %11412 = vtanh.f32 %v4970_v58 }
 0x4c9   : > { %11414 = vtanh.f32 %v4972_v15 }
 0x4cc   : > { %v11401_v25 = vpop.eup %11400 }
 0x4cd   : > { %v11403_v28 = vpop.eup %11402  ;;  %v4981_v29 = vadd.f32 1.0, %v11401_v25  ;;  %v10829_v25 = vld [vmem:[#allocation12 + $0x1e8] ss:$16 sps:$4 sm:$0xff]  }
 0x4ce   : > { %v11405_v12 = vpop.eup %11404  ;;  %v4983_v42 = vadd.f32 1.0, %v11403_v28 }
 0x4cf   : > { %v11407_v31 = vpop.eup %11406  ;;  %v4989_v32 = vmul.f32 0.5, %v4981_v29  ;;  %v4982_v33 = vadd.f32 1.0, %v11405_v12  ;;  %v10831_v12 = vld [vmem:[#allocation12 + $0x1ec] ss:$16 sps:$4 sm:$0xff]  }
 0x4d0   : > { %v11409_v34 = vpop.eup %11408  ;;  %v4991_v35 = vmul.f32 0.5, %v4983_v42  ;;  %v4984_v36 = vadd.f32 1.0, %v11407_v31  ;;  %8627 = vmatprep.subr.bf16.mxu1 %v10831_v12 }
 0x4d1   : > { %v11411_v4 = vpop.eup %11410  ;;  %v4997_v47 = vmul.f32 %v4989_v32, %v12574_v1  ;;  %v4990_v48 = vmul.f32 0.5, %v4982_v33  ;;  %v4985_v49 = vadd.f32 1.0, %v11409_v34  ;;  %8628 = vmatpush1.bf16.msra.mxu1 %v10829_v25 }
 0x4d2   : > { %v11413_v38 = vpop.eup %11412  ;;  %v4999_v51 = vmul.f32 %v4991_v35, %v12579_v19  ;;  %v4992_v52 = vmul.f32 0.5, %v4984_v36  ;;  %v4987_v55 = vadd.f32 1.0, %v11411_v4 }
 0x4d3   : > { %v11415_v0 = vpop.eup %11414  ;;  %v4998_v2 = vmul.f32 %v4990_v48, %v12584_v8  ;;  %v4993_v37 = vmul.f32 0.5, %v4985_v49  ;;  %v4986_v56 = vadd.f32 1.0, %v11413_v38  ;;  %v5013_v21 = vrot.slane %v4997_v47, 7 }
 0x4d4   : > { %v5000_v22 = vmul.f32 %v4992_v52, %v12592_v17  ;;  %v4995_v39 = vmul.f32 0.5, %v4987_v55  ;;  %v4988_v6 = vadd.f32 1.0, %v11415_v0  ;;  %v5015_v41 = vrot.slane %v4999_v51, 7 }
 0x4d5   : > { %v5001_v1 = vmul.f32 %v4993_v37, %v12600_v18  ;;  %v4994_v20 = vmul.f32 0.5, %v4986_v56  ;;  %v5014_v14 = vrot.slane %v4998_v2, 7  ;;  %v5033_v19 = vsel %vm577_vm8, 0.0, %v5013_v21 }
 0x4d6   : > { %v5003_v9 = vmul.f32 %v4995_v39, %v12608_v24  ;;  %v4996_v58 = vmul.f32 0.5, %v4988_v6  ;;  %v5016_v8 = vrot.slane %v5000_v22, 7  ;;  %v5035_v15 = vsel %vm577_vm8, 0.0, %v5015_v41  ;;  %v10834_v24 = vld [vmem:[#allocation12 + $0x204] ss:$16 sps:$4 sm:$0xff]  }
 0x4d7   : > { %v5017_v28 = vrot.slane %v5001_v1, 7  ;;  %v5002_v17 = vmul.f32 %v4994_v20, %v12616_v27  ;;  %v5034_v29 = vsel %vm577_vm8, 0.0, %v5014_v14  ;;  %v10837_v27 = vld [vmem:[#allocation12 + $0x20c] ss:$16 sps:$4 sm:$0xff]   ;;  %8339 = vmatprep.subr.bf16.mxu0 %v10834_v24 }
 0x4d8   : > { %v5021_v18 = vrot.slane %v5003_v9, 7  ;;  %v5004_v42 = vmul.f32 %v4996_v58, %v12622_v44  ;;  %v10591_v31 = vpack.i.bf16 %v5034_v29, %v5033_v19  ;;  %v5036_v32 = vsel %vm577_vm8, 0.0, %v5016_v8  ;;  %8640 = vmatprep.subr.bf16.mxu1 %v10837_v27 }
 0x4d9   : > { %v5019_v33 = vrot.slane %v5002_v17, 7  ;;  %v5018_v34 = vsel %vm577_vm8, %v5013_v21, %v5017_v28  ;;  %v10601_v35 = vpack.i.bf16 %v5036_v32, %v5035_v15  ;;  %v5037_v36 = vsel %vm577_vm8, %v5017_v28, 0.0 }
 0x4da   : > { %v5023_v4 = vrot.slane %v5004_v42, 7  ;;  %10592 = vrot.lane.b32.xlu0 %v10591_v31, %s11798_s28  ;;  %v5022_v47 = vsel %vm577_vm8, %v5015_v41, %v5021_v18  ;;  %v12659_v44 = vsel %vm577_vm8, %v5021_v18, 0.0 }
 0x4db   : > { %v5020_v48 = vsel %vm577_vm8, %v5014_v14, %v5019_v33  ;;  %v5038_v49 = vsel %vm577_vm8, %v5019_v33, 0.0 }
 0x4dc   : > { %v10596_v38 = vpack.i.bf16 %v5020_v48, %v5018_v34  ;;  %v5024_v51 = vsel %vm577_vm8, %v5016_v8, %v5023_v4  ;;  %v10611_v52 = vpack.i.bf16 %v5038_v49, %v5037_v36  ;;  %v12665_v55 = vsel %vm577_vm8, %v5023_v4, 0.0  ;;  %v10835_v36 = vld [vmem:[#allocation12 + $0x208] ss:$16 sps:$4 sm:$0xff]  }
 0x4dd   : > { %v10606_v0 = vpack.i.bf16 %v5024_v51, %v5022_v47  ;;  %v10626_v2 = vpack.i.bf16 %v12665_v55, %v12659_v44  ;;  %v10858_v44 = vld [vmem:[#allocation12 + $0x284] ss:$16 sps:$4 sm:$0xff]   ;;  %v10861_v55 = vld [vmem:[#allocation12 + $0x28c] ss:$16 sps:$4 sm:$0xff]  }
 0x4de   : > { %10597 = vrot.lane.b32.xlu1 %v10596_v38, %s11798_s28  ;;  %10602 = vrot.lane.b32.xlu0 %v10601_v35, %s11798_s28  ;;  %v10832_v35 = vld [vmem:[#allocation12 + $0x200] ss:$16 sps:$4 sm:$0xff]  }
 0x4e2   : > { %10607 = vrot.lane.b32.xlu1 %v10606_v0, %s11798_s28  ;;  %10612 = vrot.lane.b32.xlu0 %v10611_v52, %s11798_s28  ;;  %v10840_v0 = vld [vmem:[#allocation12 + $0x224] ss:$16 sps:$4 sm:$0xff]  }
 0x54c   : > { %v10593_v37 = vpop.permute.xlu0 %10592 }
 0x54d   : > { %v10594_v56 = vunpack.i.l.bf16 %v10593_v37  ;;  %v10595_v21 = vunpack.i.h.bf16 %v10593_v37 }
 0x54f   : > { %v12676_v41 = vsel %vm728_vm11, 0.0, %v10594_v56  ;;  %v12683_v14 = vsel %vm728_vm11, %v10594_v56, %v10595_v21 }
 0x550   : > { %v10598_v22 = vpop.permute.xlu1 %10597  ;;  %v12673_v39 = vpop.permute.xlu0 %10602  ;;  %v5106_v58 = vrot.slane %v12676_v41, 1  ;;  %v5109_v17 = vrot.slane %v12683_v14, 1 }
 0x551   : > { %v10599_v6 = vunpack.i.l.bf16 %v10598_v22  ;;  %v10600_v40 = vunpack.i.h.bf16 %v10598_v22  ;;  %v10604_v20 = vunpack.i.l.bf16 %v12673_v39  ;;  %v10605_v12 = vunpack.i.h.bf16 %v12673_v39 }
 0x553   : > { %v12679_v1 = vsel %vm728_vm11, 0.0, %v10599_v6  ;;  %v12695_v28 = vsel %vm728_vm11, %v10599_v6, %v10600_v40  ;;  %v12705_v18 = vsel %vm728_vm11, %v10595_v21, %v10604_v20  ;;  %v10215_v24 = vpack.c.bf16 %v10599_v6, %v10594_v56  ;;  %v10843_v6 = vld [vmem:[#allocation12 + $0x22c] ss:$16 sps:$4 sm:$0xff]  }
 0x554   : > { %v5107_v19 = vrot.slane %v12679_v1, 1  ;;  %v12686_v13 = vpop.permute.xlu1 %10607  ;;  %v12688_v9 = vpop.permute.xlu0 %10612  ;;  %v5110_v31 = vrot.slane %v12695_v28, 1  ;;  %v5170_v32 = vrot.slane %v12679_v1, 2  ;;  %v5207_v47 = vpack.c.bf16 %v12695_v28, %v12683_v14 }
 0x555   : > { %v10609_v8 = vunpack.i.l.bf16 %v12686_v13  ;;  %v10615_v15 = vunpack.i.h.bf16 %v12688_v9  ;;  %v10614_v25 = vunpack.i.l.bf16 %v12688_v9  ;;  %v10610_v42 = vunpack.i.h.bf16 %v12686_v13 }
 0x556   : > { %v5108_v34 = vsel %vm506_vm4, %v5106_v58, %v5107_v19  ;;  %v5111_v48 = vsel %vm506_vm4, %v5109_v17, %v5110_v31  ;;  %v5112_v49 = vrot.slane %v12705_v18, 1  ;;  %v5173_v52 = vrot.slane %v12695_v28, 2  ;;  %8328 = vmatprep.mubr.bf16.mxu0 %v5207_v47  ;;  %8629 = vmatprep.mubr.bf16.mxu1 %v5207_v47  ;;  %v10841_v17 = vld [vmem:[#allocation12 + $0x228] ss:$16 sps:$4 sm:$0xff]  }
 0x557   : > { %v12711_v33 = vsel %vm728_vm11, %v10600_v40, %v10609_v8  ;;  %v5079_v27 = vsel %vm728_vm11, %v10614_v25, %v10615_v15  ;;  %v5096_v4 = vsel %vm728_vm11, 0.0, %v10614_v25  ;;  %v10616_v56 = vpack.i.bf16 %v5111_v48, %v5108_v34  ;;  %10216 = vmatmul.mubr.msk.bf16.vlgmr.msra.gmra.mrb[8].mxu0 %vm10214_vm1, %v10215_v24  ;;  %10222 = vmatmul.mubr.msk.bf16.vlgmr.msra.gmra.mrb[8].mxu1 %vm10214_vm1, %v10215_v24  ;;  %v10846_v24 = vld [vmem:[#allocation12 + $0x244] ss:$16 sps:$4 sm:$0xff]   ;;  %v10849_v48 = vld [vmem:[#allocation12 + $0x24c] ss:$16 sps:$4 sm:$0xff]  }
 0x558   : > { %v5121_v38 = vrot.slane %v5096_v4, 1  ;;  %v5123_v51 = vrot.slane %v5079_v27, 1  ;;  %v5113_v37 = vrot.slane %v12711_v33, 1  ;;  %v5075_v21 = vsel %vm728_vm11, %v10604_v20, %v10605_v12  ;;  %8340 = vmatpush1.bf16.msra.mxu0 %v10832_v35  ;;  %8641 = vmatpush1.bf16.msra.mxu1 %v10835_v36 }
 0x559   : > { %v12733_v22 = vsel %vm728_vm11, %v10609_v8, %v10610_v42  ;;  %v5176_v40 = vrot.slane %v12711_v33, 2  ;;  %v5184_v1 = vrot.slane %v5096_v4, 2  ;;  %v5186_v58 = vrot.slane %v5079_v27, 2  ;;  %v10838_v8 = vld [vmem:[#allocation12 + $0x220] ss:$16 sps:$4 sm:$0xff]   ;;  %10617 = vrot.lane.b32.xlu1 %v10616_v56, %s11797_s21  ;;  %8341 = vmatprep.subr.bf16.mxu0 %v10840_v0 }
 0x55a   : > { %v5116_v20 = vrot.slane %v12733_v22, 1  ;;  %v5115_v25 = vrot.slane %v5075_v21, 1  ;;  %v5209_v28 = vpack.c.bf16 %v12733_v22, %v5075_v21  ;;  %v5122_v34 = vsel %vm506_vm4, %v5107_v19, %v5121_v38  ;;  %8642 = vmatprep.subr.bf16.mxu1 %v10843_v6  ;;  %v10847_v0 = vld [vmem:[#allocation12 + $0x248] ss:$16 sps:$4 sm:$0xff]  }
 0x55b   : > { %v5124_v27 = vsel %vm506_vm4, %v5110_v31, %v5123_v51  ;;  %v5169_v4 = vrot.slane %v12676_v41, 2  ;;  %v5175_v47 = vrot.slane %v12705_v18, 2  ;;  %v5179_v29 = vrot.slane %v12733_v22, 2  ;;  %v11041_v22 = vld [vmem:[#allocation12 + $0x64c] ss:$16 sps:$4 sm:$0xff]  }
 0x55c   : > { %v10621_v35 = vpack.i.bf16 %v5124_v27, %v5122_v34  ;;  %v5172_v36 = vrot.slane %v12683_v14, 2  ;;  %8371 = vmatprep.mubr.bf16.mxu0 %v5209_v28  ;;  %v5114_v19 = vsel %vm506_vm4, %v5112_v49, %v5113_v37  ;;  %v5117_v41 = vsel %vm506_vm4, %v5115_v25, %v5116_v20  ;;  %8672 = vmatprep.mubr.bf16.mxu1 %v5209_v28  ;;  %v10844_v49 = vld [vmem:[#allocation12 + $0x240] ss:$16 sps:$4 sm:$0xff]   ;;  %v10864_v34 = vld [vmem:[#allocation12 + $0x2a4] ss:$16 sps:$4 sm:$0xff]  }
 0x55d   : > { %v5178_v31 = vrot.slane %v5075_v21, 2  ;;  %v5171_v38 = vsel %vm518_vm6, %v5169_v4, %v5170_v32  ;;  %v5185_v51 = vsel %vm518_vm6, %v5170_v32, %v5184_v1  ;;  %v12767_v14 = vsel %vm518_vm6, %v5175_v47, %v5176_v40  ;;  %8342 = vmatpush1.bf16.msra.mxu0 %v10838_v8  ;;  %8643 = vmatpush1.bf16.msra.mxu1 %v10841_v17  ;;  %v10852_v32 = vld [vmem:[#allocation12 + $0x264] ss:$16 sps:$4 sm:$0xff]   ;;  %v10855_v1 = vld [vmem:[#allocation12 + $0x26c] ss:$16 sps:$4 sm:$0xff]  }
 0x55e   : > { %10622 = vrot.lane.b32.xlu0 %v10621_v35, %s11797_s21  ;;  %v12769_v56 = vpack.c.bf16 %v5185_v51, %v5171_v38  ;;  %v5174_v21 = vsel %vm518_vm6, %v5172_v36, %v5173_v52  ;;  %v5187_v6 = vsel %vm518_vm6, %v5173_v52, %v5186_v58  ;;  %10627 = vrot.lane.b32.xlu1 %v10626_v2, %s11798_s28  ;;  %v10850_v52 = vld [vmem:[#allocation12 + $0x260] ss:$16 sps:$4 sm:$0xff]   ;;  %v10853_v58 = vld [vmem:[#allocation12 + $0x268] ss:$16 sps:$4 sm:$0xff]   ;;  %v10867_v27 = vld [vmem:[#allocation12 + $0x2ac] ss:$16 sps:$4 sm:$0xff]  }
 0x55f   : > { %8343 = vmatprep.subr.bf16.mxu0 %v10846_v24  ;;  %v10631_v25 = vpack.i.bf16 %v5117_v41, %v5114_v19  ;;  %v12777_v28 = vpack.c.bf16 %v5187_v6, %v5174_v21  ;;  %v12782_v8 = vsel %vm518_vm6, %v5178_v31, %v5179_v29  ;;  %8644 = vmatprep.subr.bf16.mxu1 %v10849_v48  ;;  %v10856_v2 = vld [vmem:[#allocation12 + $0x280] ss:$16 sps:$4 sm:$0xff]   ;;  %v10859_v17 = vld [vmem:[#allocation12 + $0x288] ss:$16 sps:$4 sm:$0xff]   ;;  %v10870_v24 = vld [vmem:[#allocation12 + $0x2c4] ss:$16 sps:$4 sm:$0xff]  }
 0x560   : > { %v10862_v4 = vld [vmem:[#allocation12 + $0x2a0] ss:$16 sps:$4 sm:$0xff]   ;;  %v10865_v47 = vld [vmem:[#allocation12 + $0x2a8] ss:$16 sps:$4 sm:$0xff]   ;;  %v10873_v35 = vld [vmem:[#allocation12 + $0x2cc] ss:$16 sps:$4 sm:$0xff]  }
 0x561   : > { %8344 = vmatpush1.bf16.msra.mxu0 %v10844_v49  ;;  %8645 = vmatpush1.bf16.msra.mxu1 %v10847_v0  ;;  %v10868_v36 = vld [vmem:[#allocation12 + $0x2c0] ss:$16 sps:$4 sm:$0xff]   ;;  %v10871_v48 = vld [vmem:[#allocation12 + $0x2c8] ss:$16 sps:$4 sm:$0xff]   ;;  %v10876_v19 = vld [vmem:[#allocation12 + $0x2e4] ss:$16 sps:$4 sm:$0xff]  }
 0x562   : > { %10632 = vrot.lane.b32.xlu0 %v10631_v25, %s11797_s21  ;;  %8345 = vmatprep.subr.bf16.mxu0 %v10852_v32  ;;  %v10879_v41 = vld [vmem:[#allocation12 + $0x2ec] ss:$16 sps:$4 sm:$0xff]   ;;  %v10874_v31 = vld [vmem:[#allocation12 + $0x2e0] ss:$16 sps:$4 sm:$0xff]   ;;  %v10877_v38 = vld [vmem:[#allocation12 + $0x2e8] ss:$16 sps:$4 sm:$0xff]  }
 0x563   : > { %8646 = vmatprep.subr.bf16.mxu1 %v10855_v1  ;;  %v10882_v51 = vld [vmem:[#allocation12 + $0x304] ss:$16 sps:$4 sm:$0xff]   ;;  %v10885_v49 = vld [vmem:[#allocation12 + $0x30c] ss:$16 sps:$4 sm:$0xff]   ;;  %v10880_v0 = vld [vmem:[#allocation12 + $0x300] ss:$16 sps:$4 sm:$0xff]  }
 0x564   : > { %v10883_v21 = vld [vmem:[#allocation12 + $0x308] ss:$16 sps:$4 sm:$0xff]   ;;  %v10888_v6 = vld [vmem:[#allocation12 + $0x324] ss:$16 sps:$4 sm:$0xff]   ;;  %v10891_v32 = vld [vmem:[#allocation12 + $0x32c] ss:$16 sps:$4 sm:$0xff]  }
 0x565   : > { %8346 = vmatpush1.bf16.msra.mxu0 %v10850_v52  ;;  %8647 = vmatpush1.bf16.msra.mxu1 %v10853_v58  ;;  %v10886_v1 = vld [vmem:[#allocation12 + $0x320] ss:$16 sps:$4 sm:$0xff]   ;;  %v10889_v25 = vld [vmem:[#allocation12 + $0x328] ss:$16 sps:$4 sm:$0xff]   ;;  %v10894_v52 = vld [vmem:[#allocation12 + $0x344] ss:$16 sps:$4 sm:$0xff]  }
 0x566   : > { %8347 = vmatprep.subr.bf16.mxu0 %v10858_v44  ;;  %8648 = vmatprep.subr.bf16.mxu1 %v10861_v55  ;;  %v10897_v58 = vld [vmem:[#allocation12 + $0x34c] ss:$16 sps:$4 sm:$0xff]   ;;  %v10892_v44 = vld [vmem:[#allocation12 + $0x340] ss:$16 sps:$4 sm:$0xff]   ;;  %v10895_v55 = vld [vmem:[#allocation12 + $0x348] ss:$16 sps:$4 sm:$0xff]  }
 0x567   : > { %v12801_v13 = vsel %vm728_vm11, %v10605_v12, 0.0  ;;  %v11018_v12 = vld [vmem:[#allocation12 + $0x5e0] ss:$16 sps:$4 sm:$0xff]  }
 0x569   : > { %8348 = vmatpush1.bf16.msra.mxu0 %v10856_v2  ;;  %8649 = vmatpush1.bf16.msra.mxu1 %v10859_v17  ;;  %v10900_v2 = vld [vmem:[#allocation12 + $0x364] ss:$16 sps:$4 sm:$0xff]   ;;  %v10903_v17 = vld [vmem:[#allocation12 + $0x36c] ss:$16 sps:$4 sm:$0xff]  }
 0x56a   : > { %8349 = vmatprep.subr.bf16.mxu0 %v10864_v34  ;;  %8650 = vmatprep.subr.bf16.mxu1 %v10867_v27  ;;  %v10898_v34 = vld [vmem:[#allocation12 + $0x360] ss:$16 sps:$4 sm:$0xff]   ;;  %v10901_v27 = vld [vmem:[#allocation12 + $0x368] ss:$16 sps:$4 sm:$0xff]  }
 0x56d   : > { %8350 = vmatpush1.bf16.msra.mxu0 %v10862_v4  ;;  %8651 = vmatpush1.bf16.msra.mxu1 %v10865_v47  ;;  %v10906_v4 = vld [vmem:[#allocation12 + $0x384] ss:$16 sps:$4 sm:$0xff]   ;;  %v10909_v47 = vld [vmem:[#allocation12 + $0x38c] ss:$16 sps:$4 sm:$0xff]  }
 0x56e   : > { %8351 = vmatprep.subr.bf16.mxu0 %v10870_v24  ;;  %8652 = vmatprep.subr.bf16.mxu1 %v10873_v35  ;;  %v10904_v24 = vld [vmem:[#allocation12 + $0x380] ss:$16 sps:$4 sm:$0xff]   ;;  %v10907_v35 = vld [vmem:[#allocation12 + $0x388] ss:$16 sps:$4 sm:$0xff]  }
 0x571   : > { %8352 = vmatpush1.bf16.msra.mxu0 %v10868_v36  ;;  %8653 = vmatpush1.bf16.msra.mxu1 %v10871_v48  ;;  %v10912_v36 = vld [vmem:[#allocation12 + $0x3a4] ss:$16 sps:$4 sm:$0xff]   ;;  %v10915_v48 = vld [vmem:[#allocation12 + $0x3ac] ss:$16 sps:$4 sm:$0xff]  }
 0x572   : > { %8353 = vmatprep.subr.bf16.mxu0 %v10876_v19  ;;  %8654 = vmatprep.subr.bf16.mxu1 %v10879_v41  ;;  %v10910_v19 = vld [vmem:[#allocation12 + $0x3a0] ss:$16 sps:$4 sm:$0xff]   ;;  %v10913_v41 = vld [vmem:[#allocation12 + $0x3a8] ss:$16 sps:$4 sm:$0xff]  }
 0x575   : > { %8354 = vmatpush1.bf16.msra.mxu0 %v10874_v31  ;;  %8655 = vmatpush1.bf16.msra.mxu1 %v10877_v38  ;;  %v10918_v31 = vld [vmem:[#allocation12 + $0x3c4] ss:$16 sps:$4 sm:$0xff]   ;;  %v10921_v38 = vld [vmem:[#allocation12 + $0x3cc] ss:$16 sps:$4 sm:$0xff]  }
 0x576   : > { %8355 = vmatprep.subr.bf16.mxu0 %v10882_v51  ;;  %8656 = vmatprep.subr.bf16.mxu1 %v10885_v49  ;;  %v10916_v51 = vld [vmem:[#allocation12 + $0x3c0] ss:$16 sps:$4 sm:$0xff]   ;;  %v10919_v49 = vld [vmem:[#allocation12 + $0x3c8] ss:$16 sps:$4 sm:$0xff]  }
 0x579   : > { %8356 = vmatpush1.bf16.msra.mxu0 %v10880_v0  ;;  %8657 = vmatpush1.bf16.msra.mxu1 %v10883_v21  ;;  %v10924_v0 = vld [vmem:[#allocation12 + $0x3e4] ss:$16 sps:$4 sm:$0xff]   ;;  %v10927_v21 = vld [vmem:[#allocation12 + $0x3ec] ss:$16 sps:$4 sm:$0xff]  }
 0x57a   : > { %8357 = vmatprep.subr.bf16.mxu0 %v10888_v6  ;;  %8658 = vmatprep.subr.bf16.mxu1 %v10891_v32  ;;  %v10922_v6 = vld [vmem:[#allocation12 + $0x3e0] ss:$16 sps:$4 sm:$0xff]   ;;  %v10925_v32 = vld [vmem:[#allocation12 + $0x3e8] ss:$16 sps:$4 sm:$0xff]  }
 0x57d   : > { %8358 = vmatpush1.bf16.msra.mxu0 %v10886_v1  ;;  %8659 = vmatpush1.bf16.msra.mxu1 %v10889_v25  ;;  %v10930_v1 = vld [vmem:[#allocation12 + $0x404] ss:$16 sps:$4 sm:$0xff]   ;;  %v10933_v25 = vld [vmem:[#allocation12 + $0x40c] ss:$16 sps:$4 sm:$0xff]  }
 0x57e   : > { %8359 = vmatprep.subr.bf16.mxu0 %v10894_v52  ;;  %8660 = vmatprep.subr.bf16.mxu1 %v10897_v58  ;;  %v10928_v52 = vld [vmem:[#allocation12 + $0x400] ss:$16 sps:$4 sm:$0xff]   ;;  %v10931_v58 = vld [vmem:[#allocation12 + $0x408] ss:$16 sps:$4 sm:$0xff]  }
 0x581   : > { %8360 = vmatpush1.bf16.msra.mxu0 %v10892_v44  ;;  %8661 = vmatpush1.bf16.msra.mxu1 %v10895_v55  ;;  %v5208_v44 = vpack.c.bf16 %v12711_v33, %v12705_v18  ;;  %v10936_v55 = vld [vmem:[#allocation12 + $0x424] ss:$16 sps:$4 sm:$0xff]   ;;  %v11033_v33 = vld [vmem:[#allocation12 + $0x628] ss:$16 sps:$4 sm:$0xff]  }
 0x582   : > { %8361 = vmatprep.subr.bf16.mxu0 %v10900_v2  ;;  %8662 = vmatprep.subr.bf16.mxu1 %v10903_v17  ;;  %v10939_v2 = vld [vmem:[#allocation12 + $0x42c] ss:$16 sps:$4 sm:$0xff]   ;;  %v10934_v17 = vld [vmem:[#allocation12 + $0x420] ss:$16 sps:$4 sm:$0xff]   ;;  %v10948_v18 = vld [vmem:[#allocation12 + $0x464] ss:$16 sps:$4 sm:$0xff]  }
 0x585   : > { %8362 = vmatpush1.bf16.msra.mxu0 %v10898_v34  ;;  %8663 = vmatpush1.bf16.msra.mxu1 %v10901_v27  ;;  %v10937_v34 = vld [vmem:[#allocation12 + $0x428] ss:$16 sps:$4 sm:$0xff]   ;;  %v10942_v27 = vld [vmem:[#allocation12 + $0x444] ss:$16 sps:$4 sm:$0xff]  }
 0x586   : > { %8363 = vmatprep.subr.bf16.mxu0 %v10906_v4  ;;  %8664 = vmatprep.subr.bf16.mxu1 %v10909_v47  ;;  %v10945_v4 = vld [vmem:[#allocation12 + $0x44c] ss:$16 sps:$4 sm:$0xff]   ;;  %v10940_v47 = vld [vmem:[#allocation12 + $0x440] ss:$16 sps:$4 sm:$0xff]  }
 0x589   : > { %8364 = vmatpush1.bf16.msra.mxu0 %v10904_v24  ;;  %8665 = vmatpush1.bf16.msra.mxu1 %v10907_v35  ;;  %v10943_v24 = vld [vmem:[#allocation12 + $0x448] ss:$16 sps:$4 sm:$0xff]   ;;  %v10951_v35 = vld [vmem:[#allocation12 + $0x46c] ss:$16 sps:$4 sm:$0xff]  }
 0x58a   : > { %8365 = vmatprep.subr.bf16.mxu0 %v10912_v36  ;;  %8666 = vmatprep.subr.bf16.mxu1 %v10915_v48  ;;  %v10946_v36 = vld [vmem:[#allocation12 + $0x460] ss:$16 sps:$4 sm:$0xff]   ;;  %v10949_v48 = vld [vmem:[#allocation12 + $0x468] ss:$16 sps:$4 sm:$0xff]  }
 0x58d   : > { %8366 = vmatpush1.bf16.msra.mxu0 %v10910_v19  ;;  %8667 = vmatpush1.bf16.msra.mxu1 %v10913_v41  ;;  %v10954_v19 = vld [vmem:[#allocation12 + $0x484] ss:$16 sps:$4 sm:$0xff]   ;;  %v10957_v41 = vld [vmem:[#allocation12 + $0x48c] ss:$16 sps:$4 sm:$0xff]  }
 0x58e   : > { %8367 = vmatprep.subr.bf16.mxu0 %v10918_v31  ;;  %8668 = vmatprep.subr.bf16.mxu1 %v10921_v38  ;;  %v10952_v31 = vld [vmem:[#allocation12 + $0x480] ss:$16 sps:$4 sm:$0xff]   ;;  %v10955_v38 = vld [vmem:[#allocation12 + $0x488] ss:$16 sps:$4 sm:$0xff]  }
 0x591   : > { %8368 = vmatpush1.bf16.msra.mxu0 %v10916_v51  ;;  %8669 = vmatpush1.bf16.msra.mxu1 %v10919_v49  ;;  %v10960_v51 = vld [vmem:[#allocation12 + $0x4a4] ss:$16 sps:$4 sm:$0xff]   ;;  %v10963_v49 = vld [vmem:[#allocation12 + $0x4ac] ss:$16 sps:$4 sm:$0xff]  }
 0x592   : > { %8369 = vmatprep.subr.bf16.mxu0 %v10924_v0  ;;  %8670 = vmatprep.subr.bf16.mxu1 %v10927_v21  ;;  %v10958_v0 = vld [vmem:[#allocation12 + $0x4a0] ss:$16 sps:$4 sm:$0xff]   ;;  %v10961_v21 = vld [vmem:[#allocation12 + $0x4a8] ss:$16 sps:$4 sm:$0xff]  }
 0x595   : > { %8370 = vmatpush1.bf16.msra.mxu0 %v10922_v6  ;;  %8671 = vmatpush1.bf16.msra.mxu1 %v10925_v32  ;;  %v10966_v6 = vld [vmem:[#allocation12 + $0x4c4] ss:$16 sps:$4 sm:$0xff]   ;;  %v10969_v32 = vld [vmem:[#allocation12 + $0x4cc] ss:$16 sps:$4 sm:$0xff]  }
 0x596   : > { %8382 = vmatprep.subr.bf16.mxu0 %v10930_v1  ;;  %8683 = vmatprep.subr.bf16.mxu1 %v10933_v25  ;;  %v10964_v1 = vld [vmem:[#allocation12 + $0x4c0] ss:$16 sps:$4 sm:$0xff]   ;;  %v10967_v25 = vld [vmem:[#allocation12 + $0x4c8] ss:$16 sps:$4 sm:$0xff]  }
 0x598   : > { %8372 = vmatmul.mubr.bf16.vlgmr.msra.gmra.mrb[8].mxu0 %v5208_v44  ;;  %8673 = vmatmul.mubr.bf16.vlgmr.msra.gmra.mrb[8].mxu1 %v5208_v44  ;;  %v10970_v44 = vld [vmem:[#allocation12 + $0x4e0] ss:$16 sps:$4 sm:$0xff]  }
 0x599   : > { %8383 = vmatpush1.bf16.msra.mxu0 %v10928_v52  ;;  %8684 = vmatpush1.bf16.msra.mxu1 %v10931_v58  ;;  %v10972_v52 = vld [vmem:[#allocation12 + $0x4e4] ss:$16 sps:$4 sm:$0xff]   ;;  %v10975_v58 = vld [vmem:[#allocation12 + $0x4ec] ss:$16 sps:$4 sm:$0xff]  }
 0x59a   : > { %8384 = vmatprep.subr.bf16.mxu0 %v10936_v55  ;;  %8685 = vmatprep.subr.bf16.mxu1 %v10939_v2  ;;  %v10973_v55 = vld [vmem:[#allocation12 + $0x4e8] ss:$16 sps:$4 sm:$0xff]   ;;  %v10978_v2 = vld [vmem:[#allocation12 + $0x504] ss:$16 sps:$4 sm:$0xff]  }
 0x59d   : > { %8385 = vmatpush1.bf16.msra.mxu0 %v10934_v17  ;;  %8686 = vmatpush1.bf16.msra.mxu1 %v10937_v34  ;;  %v10981_v17 = vld [vmem:[#allocation12 + $0x50c] ss:$16 sps:$4 sm:$0xff]   ;;  %v10976_v34 = vld [vmem:[#allocation12 + $0x500] ss:$16 sps:$4 sm:$0xff]  }
 0x59e   : > { %8386 = vmatprep.subr.bf16.mxu0 %v10942_v27  ;;  %8687 = vmatprep.subr.bf16.mxu1 %v10945_v4  ;;  %v10979_v27 = vld [vmem:[#allocation12 + $0x508] ss:$16 sps:$4 sm:$0xff]   ;;  %v10984_v4 = vld [vmem:[#allocation12 + $0x524] ss:$16 sps:$4 sm:$0xff]  }
 0x5a1   : > { %8387 = vmatpush1.bf16.msra.mxu0 %v10940_v47  ;;  %8688 = vmatpush1.bf16.msra.mxu1 %v10943_v24  ;;  %v10987_v47 = vld [vmem:[#allocation12 + $0x52c] ss:$16 sps:$4 sm:$0xff]   ;;  %v10982_v24 = vld [vmem:[#allocation12 + $0x520] ss:$16 sps:$4 sm:$0xff]  }
 0x5a2   : > { %8388 = vmatprep.subr.bf16.mxu0 %v10948_v18  ;;  %8689 = vmatprep.subr.bf16.mxu1 %v10951_v35  ;;  %v10985_v18 = vld [vmem:[#allocation12 + $0x528] ss:$16 sps:$4 sm:$0xff]   ;;  %v10990_v35 = vld [vmem:[#allocation12 + $0x544] ss:$16 sps:$4 sm:$0xff]  }
 0x5a5   : > { %8389 = vmatpush1.bf16.msra.mxu0 %v10946_v36  ;;  %8690 = vmatpush1.bf16.msra.mxu1 %v10949_v48  ;;  %v10993_v36 = vld [vmem:[#allocation12 + $0x54c] ss:$16 sps:$4 sm:$0xff]   ;;  %v10988_v48 = vld [vmem:[#allocation12 + $0x540] ss:$16 sps:$4 sm:$0xff]  }
 0x5a6   : > { %8390 = vmatprep.subr.bf16.mxu0 %v10954_v19  ;;  %8691 = vmatprep.subr.bf16.mxu1 %v10957_v41  ;;  %v10991_v19 = vld [vmem:[#allocation12 + $0x548] ss:$16 sps:$4 sm:$0xff]   ;;  %v10996_v41 = vld [vmem:[#allocation12 + $0x564] ss:$16 sps:$4 sm:$0xff]  }
 0x5a9   : > { %8391 = vmatpush1.bf16.msra.mxu0 %v10952_v31  ;;  %8692 = vmatpush1.bf16.msra.mxu1 %v10955_v38  ;;  %v10999_v31 = vld [vmem:[#allocation12 + $0x56c] ss:$16 sps:$4 sm:$0xff]   ;;  %v10994_v38 = vld [vmem:[#allocation12 + $0x560] ss:$16 sps:$4 sm:$0xff]  }
 0x5aa   : > { %8392 = vmatprep.subr.bf16.mxu0 %v10960_v51  ;;  %8693 = vmatprep.subr.bf16.mxu1 %v10963_v49  ;;  %v10997_v51 = vld [vmem:[#allocation12 + $0x568] ss:$16 sps:$4 sm:$0xff]   ;;  %v11002_v49 = vld [vmem:[#allocation12 + $0x584] ss:$16 sps:$4 sm:$0xff]  }
 0x5ad   : > { %8393 = vmatpush1.bf16.msra.mxu0 %v10958_v0  ;;  %8694 = vmatpush1.bf16.msra.mxu1 %v10961_v21  ;;  %v11005_v0 = vld [vmem:[#allocation12 + $0x58c] ss:$16 sps:$4 sm:$0xff]   ;;  %v11000_v21 = vld [vmem:[#allocation12 + $0x580] ss:$16 sps:$4 sm:$0xff]  }
 0x5ae   : > { %8394 = vmatprep.subr.bf16.mxu0 %v10966_v6  ;;  %8695 = vmatprep.subr.bf16.mxu1 %v10969_v32  ;;  %v11003_v6 = vld [vmem:[#allocation12 + $0x588] ss:$16 sps:$4 sm:$0xff]   ;;  %v11008_v32 = vld [vmem:[#allocation12 + $0x5a4] ss:$16 sps:$4 sm:$0xff]  }
 0x5b1   : > { %8395 = vmatpush1.bf16.msra.mxu0 %v10964_v1  ;;  %8696 = vmatpush1.bf16.msra.mxu1 %v10967_v25  ;;  %v11011_v1 = vld [vmem:[#allocation12 + $0x5ac] ss:$16 sps:$4 sm:$0xff]   ;;  %v11006_v25 = vld [vmem:[#allocation12 + $0x5a0] ss:$16 sps:$4 sm:$0xff]  }
 0x5b2   : > { %8396 = vmatprep.subr.bf16.mxu0 %v10972_v52  ;;  %8697 = vmatprep.subr.bf16.mxu1 %v10975_v58  ;;  %v11009_v52 = vld [vmem:[#allocation12 + $0x5a8] ss:$16 sps:$4 sm:$0xff]   ;;  %v11014_v58 = vld [vmem:[#allocation12 + $0x5c4] ss:$16 sps:$4 sm:$0xff]  }
 0x5b5   : > { %8397 = vmatpush1.bf16.msra.mxu0 %v10970_v44  ;;  %8698 = vmatpush1.bf16.msra.mxu1 %v10973_v55  ;;  %v11017_v44 = vld [vmem:[#allocation12 + $0x5cc] ss:$16 sps:$4 sm:$0xff]  }
 0x5b6   : > { %8398 = vmatprep.subr.bf16.mxu0 %v10978_v2  ;;  %8699 = vmatprep.subr.bf16.mxu1 %v10981_v17  ;;  %v12792_v2 = vsel %vm728_vm11, %v10610_v42, 0.0 }
 0x5b9   : > { %8399 = vmatpush1.bf16.msra.mxu0 %v10976_v34  ;;  %8700 = vmatpush1.bf16.msra.mxu1 %v10979_v27  ;;  %v11012_v27 = vld [vmem:[#allocation12 + $0x5c0] ss:$16 sps:$4 sm:$0xff]  }
 0x5ba   : > { %8400 = vmatprep.subr.bf16.mxu0 %v10984_v4  ;;  %8701 = vmatprep.subr.bf16.mxu1 %v10987_v47  ;;  %v11015_v4 = vld [vmem:[#allocation12 + $0x5c8] ss:$16 sps:$4 sm:$0xff]  }
 0x5bd   : > { %8401 = vmatpush1.bf16.msra.mxu0 %v10982_v24  ;;  %8702 = vmatpush1.bf16.msra.mxu1 %v10985_v18  ;;  %v11020_v24 = vld [vmem:[#allocation12 + $0x5e4] ss:$16 sps:$4 sm:$0xff]   ;;  %v11023_v18 = vld [vmem:[#allocation12 + $0x5ec] ss:$16 sps:$4 sm:$0xff]  }
 0x5be   : > { %8402 = vmatprep.subr.bf16.mxu0 %v10990_v35  ;;  %8703 = vmatprep.subr.bf16.mxu1 %v10993_v36  ;;  %v5119_v36 = vrot.slane %v12792_v2, 1 }
 0x5c1   : > { %8403 = vmatpush1.bf16.msra.mxu0 %v10988_v48  ;;  %8704 = vmatpush1.bf16.msra.mxu1 %v10991_v19 }
 0x5c2   : > { %8404 = vmatprep.subr.bf16.mxu0 %v10996_v41  ;;  %8705 = vmatprep.subr.bf16.mxu1 %v10999_v31 }
 0x5c5   : > { %8405 = vmatpush1.bf16.msra.mxu0 %v10994_v38  ;;  %8706 = vmatpush1.bf16.msra.mxu1 %v10997_v51  ;;  %v11021_v38 = vld [vmem:[#allocation12 + $0x5e8] ss:$16 sps:$4 sm:$0xff]  }
 0x5c6   : > { %8406 = vmatprep.subr.bf16.mxu0 %v11002_v49  ;;  %8707 = vmatprep.subr.bf16.mxu1 %v11005_v0  ;;  %v5118_v49 = vrot.slane %v12801_v13, 1 }
 0x5c9   : > { %8407 = vmatpush1.bf16.msra.mxu0 %v11000_v21  ;;  %8708 = vmatpush1.bf16.msra.mxu1 %v11003_v6  ;;  %v11026_v21 = vld [vmem:[#allocation12 + $0x604] ss:$16 sps:$4 sm:$0xff]   ;;  %v11029_v6 = vld [vmem:[#allocation12 + $0x60c] ss:$16 sps:$4 sm:$0xff]  }
 0x5ca   : > { %8408 = vmatprep.subr.bf16.mxu0 %v11008_v32  ;;  %8709 = vmatprep.subr.bf16.mxu1 %v11011_v1 }
 0x5cb   : > { %v12787_v55 = vpop.permute.xlu1 %10617 }
 0x5cc   : > { %v10620_v17 = vunpack.i.h.bf16 %v12787_v55  ;;  %v10619_v34 = vunpack.i.l.bf16 %v12787_v55  ;;  %v11128_v55 = vld [vmem:[#allocation12 + $0x824] ss:$16 sps:$4 sm:$0xff]  }
 0x5cd   : > { %8409 = vmatpush1.bf16.msra.mxu0 %v11006_v25  ;;  %8710 = vmatpush1.bf16.msra.mxu1 %v11009_v52 }
 0x5ce   : > { %8410 = vmatprep.subr.bf16.mxu0 %v11014_v58  ;;  %8711 = vmatprep.subr.bf16.mxu1 %v11017_v44  ;;  %v5151_v19 = vsel %vm616_vm10, %v10619_v34, %v10620_v17  ;;  %v5204_v32 = vsel %vm616_vm10, %v12801_v13, %v10619_v34  ;;  %v5120_v34 = vsel %vm506_vm4, %v5118_v49, %v5119_v36  ;;  %v11039_v49 = vld [vmem:[#allocation12 + $0x648] ss:$16 sps:$4 sm:$0xff]  }
 0x5d0   : > { %v12796_v47 = vpop.permute.xlu0 %10622  ;;  %v10628_v48 = vpop.permute.xlu1 %10627 }
 0x5d1   : > { %v10625_v42 = vunpack.i.h.bf16 %v12796_v47  ;;  %v10624_v35 = vunpack.i.l.bf16 %v12796_v47  ;;  %v10630_v41 = vunpack.i.h.bf16 %v10628_v48  ;;  %v10629_v31 = vunpack.i.l.bf16 %v10628_v48  ;;  %8411 = vmatpush1.bf16.msra.mxu0 %v11012_v27  ;;  %8712 = vmatpush1.bf16.msra.mxu1 %v11015_v4  ;;  %v11024_v48 = vld [vmem:[#allocation12 + $0x600] ss:$16 sps:$4 sm:$0xff]  }
 0x5d2   : > { %8412 = vmatprep.subr.bf16.mxu0 %v11020_v24  ;;  %8713 = vmatprep.subr.bf16.mxu1 %v11023_v18  ;;  %v11126_v47 = vld [vmem:[#allocation12 + $0x820] ss:$16 sps:$4 sm:$0xff]  }
 0x5d3   : > { %v5205_v39 = vsel %vm616_vm10, %v12792_v2, %v10624_v35  ;;  %v5155_v51 = vsel %vm616_vm10, %v10624_v35, %v10625_v42  ;;  %v12818_v1 = vsel %vm728_vm11, %v10630_v41, 0.0  ;;  %v5080_v25 = vsel %vm728_vm11, %v10615_v15, %v10629_v31 }
 0x5d4   : > { %v5211_v0 = vpack.c.bf16 %v5155_v51, %v5151_v19  ;;  %v5081_v52 = vsel %vm728_vm11, %v10629_v31, %v10630_v41  ;;  %v5129_v58 = vrot.slane %v12818_v1, 1  ;;  %v5125_v44 = vrot.slane %v5080_v25, 1  ;;  %v11027_v19 = vld [vmem:[#allocation12 + $0x608] ss:$16 sps:$4 sm:$0xff]   ;;  %v11030_v51 = vld [vmem:[#allocation12 + $0x620] ss:$16 sps:$4 sm:$0xff]  }
 0x5d5   : > { %v5127_v27 = vrot.slane %v5081_v52, 1  ;;  %v5210_v4 = vpack.c.bf16 %v5205_v39, %v5204_v32  ;;  %v5188_v24 = vrot.slane %v5080_v25, 2  ;;  %v5190_v18 = vrot.slane %v5081_v52, 2  ;;  %8413 = vmatpush1.bf16.msra.mxu0 %v11018_v12  ;;  %8714 = vmatpush1.bf16.msra.mxu1 %v11021_v38  ;;  %v11032_v39 = vld [vmem:[#allocation12 + $0x624] ss:$16 sps:$4 sm:$0xff]  }
 0x5d6   : > { %8414 = vmatprep.mubr.bf16.mxu0 %v5211_v0  ;;  %8715 = vmatprep.mubr.bf16.mxu1 %v5211_v0  ;;  %v5130_v35 = vsel %vm506_vm4, %v5119_v36, %v5129_v58  ;;  %v5126_v9 = vsel %vm506_vm4, %v5113_v37, %v5125_v44  ;;  %v11035_v12 = vld [vmem:[#allocation12 + $0x62c] ss:$16 sps:$4 sm:$0xff]   ;;  %v11044_v0 = vld [vmem:[#allocation12 + $0x664] ss:$16 sps:$4 sm:$0xff]   ;;  %v11048_v25 = vld [vmem:[#allocation12 + $0x680] ss:$16 sps:$4 sm:$0xff]  }
 0x5d7   : > { %v5128_v15 = vsel %vm506_vm4, %v5116_v20, %v5127_v27  ;;  %8425 = vmatprep.subr.bf16.mxu0 %v11026_v21  ;;  %8726 = vmatprep.subr.bf16.mxu1 %v11029_v6  ;;  %v10641_v41 = vpack.i.bf16 %v5130_v35, %v5120_v34  ;;  %v5189_v36 = vsel %vm518_vm6, %v5176_v40, %v5188_v24  ;;  %v11038_v40 = vld [vmem:[#allocation12 + $0x644] ss:$16 sps:$4 sm:$0xff]   ;;  %v11045_v21 = vld [vmem:[#allocation12 + $0x668] ss:$16 sps:$4 sm:$0xff]   ;;  %v11053_v32 = vld [vmem:[#allocation12 + $0x68c] ss:$16 sps:$4 sm:$0xff]  }
 0x5d8   : > { %v10636_v31 = vpack.i.bf16 %v5128_v15, %v5126_v9  ;;  %8415 = vmatmul.mubr.bf16.vlgmr.msra.gmra.mrb[8].mxu0 %v5210_v4  ;;  %8716 = vmatmul.mubr.bf16.vlgmr.msra.gmra.mrb[8].mxu1 %v5210_v4  ;;  %v5191_v37 = vsel %vm518_vm6, %v5179_v29, %v5190_v18  ;;  %v12842_v20 = vpack.c.bf16 %v5189_v36, %v12767_v14  ;;  %v11036_v29 = vld [vmem:[#allocation12 + $0x640] ss:$16 sps:$4 sm:$0xff]   ;;  %v11047_v14 = vld [vmem:[#allocation12 + $0x66c] ss:$16 sps:$4 sm:$0xff]   ;;  %v11050_v6 = vld [vmem:[#allocation12 + $0x684] ss:$16 sps:$4 sm:$0xff]  }
 0x5d9   : > { %10642 = vrot.lane.b32.xlu0 %v10641_v41, %s11797_s21  ;;  %v12845_v38 = vpack.c.bf16 %v5191_v37, %v12782_v8  ;;  %8426 = vmatpush1.bf16.msra.mxu0 %v11024_v48  ;;  %v11042_v8 = vld [vmem:[#allocation12 + $0x660] ss:$16 sps:$4 sm:$0xff]   ;;  %v11051_v52 = vld [vmem:[#allocation12 + $0x688] ss:$16 sps:$4 sm:$0xff]   ;;  %v11056_v58 = vld [vmem:[#allocation12 + $0x6a4] ss:$16 sps:$4 sm:$0xff]  }
 0x5da   : > { %10637 = vrot.lane.b32.xlu1 %v10636_v31, %s11797_s21  ;;  %8727 = vmatpush1.bf16.msra.mxu1 %v11027_v19  ;;  %v11059_v44 = vld [vmem:[#allocation12 + $0x6ac] ss:$16 sps:$4 sm:$0xff]   ;;  %v11054_v27 = vld [vmem:[#allocation12 + $0x6a0] ss:$16 sps:$4 sm:$0xff]   ;;  %v11057_v4 = vld [vmem:[#allocation12 + $0x6a8] ss:$16 sps:$4 sm:$0xff]  }
 0x5db   : > { %8427 = vmatprep.subr.bf16.mxu0 %v11032_v39  ;;  %8728 = vmatprep.subr.bf16.mxu1 %v11035_v12  ;;  %v11062_v24 = vld [vmem:[#allocation12 + $0x6c4] ss:$16 sps:$4 sm:$0xff]   ;;  %v11065_v18 = vld [vmem:[#allocation12 + $0x6cc] ss:$16 sps:$4 sm:$0xff]   ;;  %v11060_v34 = vld [vmem:[#allocation12 + $0x6c0] ss:$16 sps:$4 sm:$0xff]  }
 0x5dc   : > { %v11063_v35 = vld [vmem:[#allocation12 + $0x6c8] ss:$16 sps:$4 sm:$0xff]   ;;  %v11068_v9 = vld [vmem:[#allocation12 + $0x6e4] ss:$16 sps:$4 sm:$0xff]   ;;  %v11071_v15 = vld [vmem:[#allocation12 + $0x6ec] ss:$16 sps:$4 sm:$0xff]  }
 0x5dd   : > { %8428 = vmatpush1.bf16.msra.mxu0 %v11030_v51  ;;  %v11066_v48 = vld [vmem:[#allocation12 + $0x6e0] ss:$16 sps:$4 sm:$0xff]   ;;  %v11069_v19 = vld [vmem:[#allocation12 + $0x6e8] ss:$16 sps:$4 sm:$0xff]   ;;  %v11074_v41 = vld [vmem:[#allocation12 + $0x704] ss:$16 sps:$4 sm:$0xff]  }
 0x5de   : > { %8729 = vmatpush1.bf16.msra.mxu1 %v11033_v33  ;;  %8429 = vmatprep.subr.bf16.mxu0 %v11038_v40  ;;  %v11077_v31 = vld [vmem:[#allocation12 + $0x70c] ss:$16 sps:$4 sm:$0xff]   ;;  %v11072_v39 = vld [vmem:[#allocation12 + $0x700] ss:$16 sps:$4 sm:$0xff]   ;;  %v11075_v12 = vld [vmem:[#allocation12 + $0x708] ss:$16 sps:$4 sm:$0xff]  }
 0x5df   : > { %8730 = vmatprep.subr.bf16.mxu1 %v11041_v22  ;;  %v11080_v36 = vld [vmem:[#allocation12 + $0x724] ss:$16 sps:$4 sm:$0xff]   ;;  %v11083_v37 = vld [vmem:[#allocation12 + $0x72c] ss:$16 sps:$4 sm:$0xff]   ;;  %v11078_v51 = vld [vmem:[#allocation12 + $0x720] ss:$16 sps:$4 sm:$0xff]  }
 0x5e0   : > { %v11081_v33 = vld [vmem:[#allocation12 + $0x728] ss:$16 sps:$4 sm:$0xff]   ;;  %v11086_v40 = vld [vmem:[#allocation12 + $0x744] ss:$16 sps:$4 sm:$0xff]   ;;  %v11089_v22 = vld [vmem:[#allocation12 + $0x74c] ss:$16 sps:$4 sm:$0xff]  }
 0x5e1   : > { %8430 = vmatpush1.bf16.msra.mxu0 %v11036_v29  ;;  %v11084_v29 = vld [vmem:[#allocation12 + $0x740] ss:$16 sps:$4 sm:$0xff]  }
 0x5e2   : > { %8731 = vmatpush1.bf16.msra.mxu1 %v11039_v49  ;;  %8431 = vmatprep.subr.bf16.mxu0 %v11044_v0  ;;  %v11087_v49 = vld [vmem:[#allocation12 + $0x748] ss:$16 sps:$4 sm:$0xff]   ;;  %v11092_v0 = vld [vmem:[#allocation12 + $0x764] ss:$16 sps:$4 sm:$0xff]  }
 0x5e3   : > { %8732 = vmatprep.subr.bf16.mxu1 %v11047_v14  ;;  %v11095_v14 = vld [vmem:[#allocation12 + $0x76c] ss:$16 sps:$4 sm:$0xff]  }
 0x5e5   : > { %8432 = vmatpush1.bf16.msra.mxu0 %v11042_v8  ;;  %v11090_v8 = vld [vmem:[#allocation12 + $0x760] ss:$16 sps:$4 sm:$0xff]  }
 0x5e6   : > { %8733 = vmatpush1.bf16.msra.mxu1 %v11045_v21  ;;  %8433 = vmatprep.subr.bf16.mxu0 %v11050_v6  ;;  %v11093_v21 = vld [vmem:[#allocation12 + $0x768] ss:$16 sps:$4 sm:$0xff]   ;;  %v11098_v6 = vld [vmem:[#allocation12 + $0x784] ss:$16 sps:$4 sm:$0xff]  }
 0x5e7   : > { %8734 = vmatprep.subr.bf16.mxu1 %v11053_v32  ;;  %v11101_v32 = vld [vmem:[#allocation12 + $0x78c] ss:$16 sps:$4 sm:$0xff]  }
 0x5e9   : > { %8434 = vmatpush1.bf16.msra.mxu0 %v11048_v25  ;;  %v11096_v25 = vld [vmem:[#allocation12 + $0x780] ss:$16 sps:$4 sm:$0xff]  }
 0x5ea   : > { %8735 = vmatpush1.bf16.msra.mxu1 %v11051_v52  ;;  %8435 = vmatprep.subr.bf16.mxu0 %v11056_v58  ;;  %v11099_v52 = vld [vmem:[#allocation12 + $0x788] ss:$16 sps:$4 sm:$0xff]   ;;  %v11104_v58 = vld [vmem:[#allocation12 + $0x7a4] ss:$16 sps:$4 sm:$0xff]  }
 0x5eb   : > { %8736 = vmatprep.subr.bf16.mxu1 %v11059_v44  ;;  %v11107_v44 = vld [vmem:[#allocation12 + $0x7ac] ss:$16 sps:$4 sm:$0xff]  }
 0x5ed   : > { %8436 = vmatpush1.bf16.msra.mxu0 %v11054_v27  ;;  %v11102_v27 = vld [vmem:[#allocation12 + $0x7a0] ss:$16 sps:$4 sm:$0xff]  }
 0x5ee   : > { %8737 = vmatpush1.bf16.msra.mxu1 %v11057_v4  ;;  %8437 = vmatprep.subr.bf16.mxu0 %v11062_v24  ;;  %v11105_v4 = vld [vmem:[#allocation12 + $0x7a8] ss:$16 sps:$4 sm:$0xff]   ;;  %v11110_v24 = vld [vmem:[#allocation12 + $0x7c4] ss:$16 sps:$4 sm:$0xff]  }
 0x5ef   : > { %8738 = vmatprep.subr.bf16.mxu1 %v11065_v18  ;;  %v11113_v18 = vld [vmem:[#allocation12 + $0x7cc] ss:$16 sps:$4 sm:$0xff]  }
 0x5f1   : > { %8438 = vmatpush1.bf16.msra.mxu0 %v11060_v34  ;;  %v11108_v34 = vld [vmem:[#allocation12 + $0x7c0] ss:$16 sps:$4 sm:$0xff]  }
 0x5f2   : > { %8739 = vmatpush1.bf16.msra.mxu1 %v11063_v35  ;;  %8439 = vmatprep.subr.bf16.mxu0 %v11068_v9  ;;  %v11111_v35 = vld [vmem:[#allocation12 + $0x7c8] ss:$16 sps:$4 sm:$0xff]   ;;  %v11116_v9 = vld [vmem:[#allocation12 + $0x7e4] ss:$16 sps:$4 sm:$0xff]  }
 0x5f3   : > { %8740 = vmatprep.subr.bf16.mxu1 %v11071_v15  ;;  %v11119_v15 = vld [vmem:[#allocation12 + $0x7ec] ss:$16 sps:$4 sm:$0xff]  }
 0x5f5   : > { %8440 = vmatpush1.bf16.msra.mxu0 %v11066_v48  ;;  %v11114_v48 = vld [vmem:[#allocation12 + $0x7e0] ss:$16 sps:$4 sm:$0xff]  }
 0x5f6   : > { %8741 = vmatpush1.bf16.msra.mxu1 %v11069_v19  ;;  %8441 = vmatprep.subr.bf16.mxu0 %v11074_v41  ;;  %v11117_v19 = vld [vmem:[#allocation12 + $0x7e8] ss:$16 sps:$4 sm:$0xff]   ;;  %v11122_v41 = vld [vmem:[#allocation12 + $0x804] ss:$16 sps:$4 sm:$0xff]  }
 0x5f7   : > { %8742 = vmatprep.subr.bf16.mxu1 %v11077_v31  ;;  %v11125_v31 = vld [vmem:[#allocation12 + $0x80c] ss:$16 sps:$4 sm:$0xff]  }
 0x5f9   : > { %8442 = vmatpush1.bf16.msra.mxu0 %v11072_v39  ;;  %v12847_v39 = vpop.permute.xlu0 %10632 }
 0x5fa   : > { %8743 = vmatpush1.bf16.msra.mxu1 %v11075_v12  ;;  %8443 = vmatprep.subr.bf16.mxu0 %v11080_v36  ;;  %v10635_v12 = vunpack.i.h.bf16 %v12847_v39  ;;  %v10634_v36 = vunpack.i.l.bf16 %v12847_v39  ;;  %v11222_v39 = vld [vmem:[#allocation12 + $0xa20] ss:$16 sps:$4 sm:$0xff]  }
 0x5fb   : > { %8744 = vmatprep.subr.bf16.mxu1 %v11083_v37 }
 0x5fd   : > { %8444 = vmatpush1.bf16.msra.mxu0 %v11078_v51 }
 0x5fe   : > { %8745 = vmatpush1.bf16.msra.mxu1 %v11081_v33  ;;  %8445 = vmatprep.subr.bf16.mxu0 %v11086_v40  ;;  %v5152_v40 = vsel %vm616_vm10, %v10620_v17, %v10634_v36  ;;  %v11131_v17 = vld [vmem:[#allocation12 + $0x82c] ss:$16 sps:$4 sm:$0xff]  }
 0x5ff   : > { %8746 = vmatprep.subr.bf16.mxu1 %v11089_v22 }
 0x601   : > { %8446 = vmatpush1.bf16.msra.mxu0 %v11084_v29  ;;  %v5153_v29 = vsel %vm616_vm10, %v10634_v36, %v10635_v12  ;;  %v11159_v36 = vld [vmem:[#allocation12 + $0x8c8] ss:$16 sps:$4 sm:$0xff]  }
 0x602   : > { %8747 = vmatpush1.bf16.msra.mxu1 %v11087_v49  ;;  %8447 = vmatprep.subr.bf16.mxu0 %v11092_v0 }
 0x603   : > { %8748 = vmatprep.subr.bf16.mxu1 %v11095_v14 }
 0x605   : > { %8448 = vmatpush1.bf16.msra.mxu0 %v11090_v8  ;;  %v11120_v8 = vld [vmem:[#allocation12 + $0x800] ss:$16 sps:$4 sm:$0xff]  }
 0x606   : > { %8749 = vmatpush1.bf16.msra.mxu1 %v11093_v21  ;;  %8449 = vmatprep.subr.bf16.mxu0 %v11098_v6  ;;  %v11123_v21 = vld [vmem:[#allocation12 + $0x808] ss:$16 sps:$4 sm:$0xff]   ;;  %v11134_v6 = vld [vmem:[#allocation12 + $0x844] ss:$16 sps:$4 sm:$0xff]  }
 0x607   : > { %8750 = vmatprep.subr.bf16.mxu1 %v11101_v32  ;;  %v11137_v32 = vld [vmem:[#allocation12 + $0x84c] ss:$16 sps:$4 sm:$0xff]  }
 0x609   : > { %8450 = vmatpush1.bf16.msra.mxu0 %v11096_v25  ;;  %v11132_v25 = vld [vmem:[#allocation12 + $0x840] ss:$16 sps:$4 sm:$0xff]  }
 0x60a   : > { %8751 = vmatpush1.bf16.msra.mxu1 %v11099_v52  ;;  %8451 = vmatprep.subr.bf16.mxu0 %v11104_v58  ;;  %v11135_v52 = vld [vmem:[#allocation12 + $0x848] ss:$16 sps:$4 sm:$0xff]   ;;  %v11140_v58 = vld [vmem:[#allocation12 + $0x864] ss:$16 sps:$4 sm:$0xff]  }
 0x60b   : > { %8752 = vmatprep.subr.bf16.mxu1 %v11107_v44  ;;  %v11143_v44 = vld [vmem:[#allocation12 + $0x86c] ss:$16 sps:$4 sm:$0xff]  }
 0x60d   : > { %8452 = vmatpush1.bf16.msra.mxu0 %v11102_v27  ;;  %v11138_v27 = vld [vmem:[#allocation12 + $0x860] ss:$16 sps:$4 sm:$0xff]  }
 0x60e   : > { %8753 = vmatpush1.bf16.msra.mxu1 %v11105_v4  ;;  %8453 = vmatprep.subr.bf16.mxu0 %v11110_v24  ;;  %v11141_v4 = vld [vmem:[#allocation12 + $0x868] ss:$16 sps:$4 sm:$0xff]   ;;  %v11146_v24 = vld [vmem:[#allocation12 + $0x884] ss:$16 sps:$4 sm:$0xff]  }
 0x60f   : > { %8754 = vmatprep.subr.bf16.mxu1 %v11113_v18  ;;  %v11144_v18 = vld [vmem:[#allocation12 + $0x880] ss:$16 sps:$4 sm:$0xff]  }
 0x611   : > { %8454 = vmatpush1.bf16.msra.mxu0 %v11108_v34  ;;  %v11147_v34 = vld [vmem:[#allocation12 + $0x888] ss:$16 sps:$4 sm:$0xff]  }
 0x612   : > { %8755 = vmatpush1.bf16.msra.mxu1 %v11111_v35  ;;  %8455 = vmatprep.subr.bf16.mxu0 %v11116_v9  ;;  %v11152_v35 = vld [vmem:[#allocation12 + $0x8a4] ss:$16 sps:$4 sm:$0xff]   ;;  %v11155_v9 = vld [vmem:[#allocation12 + $0x8ac] ss:$16 sps:$4 sm:$0xff]  }
 0x613   : > { %8756 = vmatprep.subr.bf16.mxu1 %v11119_v15  ;;  %v11150_v15 = vld [vmem:[#allocation12 + $0x8a0] ss:$16 sps:$4 sm:$0xff]  }
 0x615   : > { %8456 = vmatpush1.bf16.msra.mxu0 %v11114_v48  ;;  %v11153_v48 = vld [vmem:[#allocation12 + $0x8a8] ss:$16 sps:$4 sm:$0xff]  }
 0x616   : > { %8757 = vmatpush1.bf16.msra.mxu1 %v11117_v19  ;;  %8468 = vmatprep.subr.bf16.mxu0 %v11122_v41  ;;  %v11158_v19 = vld [vmem:[#allocation12 + $0x8c4] ss:$16 sps:$4 sm:$0xff]   ;;  %v11161_v41 = vld [vmem:[#allocation12 + $0x8cc] ss:$16 sps:$4 sm:$0xff]  }
 0x617   : > { %8769 = vmatprep.subr.bf16.mxu1 %v11125_v31  ;;  %v11156_v31 = vld [vmem:[#allocation12 + $0x8c0] ss:$16 sps:$4 sm:$0xff]  }
 0x64c   : > { %v12851_v37 = vpop.permute.xlu1 %10637 }
 0x64d   : > { %v10640_v51 = vunpack.i.h.bf16 %v12851_v37  ;;  %v10639_v33 = vunpack.i.l.bf16 %v12851_v37  ;;  %v11230_v37 = vld [vmem:[#allocation12 + $0xa44] ss:$16 sps:$4 sm:$0xff]  }
 0x64f   : > { %v5156_v22 = vsel %vm616_vm10, %v10625_v42, %v10639_v33  ;;  %v5157_v49 = vsel %vm616_vm10, %v10639_v33, %v10640_v51  ;;  %v11129_v42 = vld [vmem:[#allocation12 + $0x828] ss:$16 sps:$4 sm:$0xff]   ;;  %v11164_v33 = vld [vmem:[#allocation12 + $0x8e4] ss:$16 sps:$4 sm:$0xff]  }
 0x650   : > { %v5212_v0 = vpack.c.bf16 %v5156_v22, %v5152_v40  ;;  %v5213_v14 = vpack.c.bf16 %v5157_v49, %v5153_v29  ;;  %v11167_v40 = vld [vmem:[#allocation12 + $0x8ec] ss:$16 sps:$4 sm:$0xff]   ;;  %v11162_v22 = vld [vmem:[#allocation12 + $0x8e0] ss:$16 sps:$4 sm:$0xff]   ;;  %v11165_v29 = vld [vmem:[#allocation12 + $0x8e8] ss:$16 sps:$4 sm:$0xff]  }
 0x651   : > { %v11170_v49 = vld [vmem:[#allocation12 + $0x904] ss:$16 sps:$4 sm:$0xff]  }
 0x652   : > { %8457 = vmatprep.mubr.bf16.mxu0 %v5213_v14  ;;  %8758 = vmatprep.mubr.bf16.mxu1 %v5213_v14  ;;  %v11168_v14 = vld [vmem:[#allocation12 + $0x900] ss:$16 sps:$4 sm:$0xff]  }
 0x653   : > { %8458 = vmatmul.mubr.bf16.vlgmr.msra.gmra.mrb[8].mxu0 %v5212_v0  ;;  %8759 = vmatmul.mubr.bf16.vlgmr.msra.gmra.mrb[8].mxu1 %v5212_v0  ;;  %v11173_v0 = vld [vmem:[#allocation12 + $0x90c] ss:$16 sps:$4 sm:$0xff]  }
 0x654   : > { %8469 = vmatpush1.bf16.msra.mxu0 %v11120_v8  ;;  %8770 = vmatpush1.bf16.msra.mxu1 %v11123_v21  ;;  %v11171_v8 = vld [vmem:[#allocation12 + $0x908] ss:$16 sps:$4 sm:$0xff]   ;;  %v11176_v21 = vld [vmem:[#allocation12 + $0x924] ss:$16 sps:$4 sm:$0xff]  }
 0x655   : > { %8500 = vmatprep.mubr.bf16.mxu0 %v12769_v56  ;;  %8801 = vmatprep.mubr.bf16.mxu1 %v12769_v56  ;;  %v11149_v56 = vld [vmem:[#allocation12 + $0x88c] ss:$16 sps:$4 sm:$0xff]  }
 0x656   : > { %8470 = vmatprep.subr.bf16.mxu0 %v11128_v55  ;;  %8771 = vmatprep.subr.bf16.mxu1 %v11131_v17  ;;  %v11179_v55 = vld [vmem:[#allocation12 + $0x92c] ss:$16 sps:$4 sm:$0xff]   ;;  %v11174_v17 = vld [vmem:[#allocation12 + $0x920] ss:$16 sps:$4 sm:$0xff]  }
 0x658   : > { %8471 = vmatpush1.bf16.msra.mxu0 %v11126_v47  ;;  %8772 = vmatpush1.bf16.msra.mxu1 %v11129_v42  ;;  %v11177_v47 = vld [vmem:[#allocation12 + $0x928] ss:$16 sps:$4 sm:$0xff]   ;;  %v11182_v42 = vld [vmem:[#allocation12 + $0x944] ss:$16 sps:$4 sm:$0xff]  }
 0x659   : > { %8472 = vmatprep.subr.bf16.mxu0 %v11134_v6  ;;  %8773 = vmatprep.subr.bf16.mxu1 %v11137_v32  ;;  %v11185_v6 = vld [vmem:[#allocation12 + $0x94c] ss:$16 sps:$4 sm:$0xff]   ;;  %v11180_v32 = vld [vmem:[#allocation12 + $0x940] ss:$16 sps:$4 sm:$0xff]  }
 0x65c   : > { %8473 = vmatpush1.bf16.msra.mxu0 %v11132_v25  ;;  %8774 = vmatpush1.bf16.msra.mxu1 %v11135_v52  ;;  %v11183_v25 = vld [vmem:[#allocation12 + $0x948] ss:$16 sps:$4 sm:$0xff]   ;;  %v11188_v52 = vld [vmem:[#allocation12 + $0x964] ss:$16 sps:$4 sm:$0xff]  }
 0x65d   : > { %8474 = vmatprep.subr.bf16.mxu0 %v11140_v58  ;;  %8775 = vmatprep.subr.bf16.mxu1 %v11143_v44  ;;  %v11191_v58 = vld [vmem:[#allocation12 + $0x96c] ss:$16 sps:$4 sm:$0xff]   ;;  %v11186_v44 = vld [vmem:[#allocation12 + $0x960] ss:$16 sps:$4 sm:$0xff]  }
 0x660   : > { %8475 = vmatpush1.bf16.msra.mxu0 %v11138_v27  ;;  %8776 = vmatpush1.bf16.msra.mxu1 %v11141_v4  ;;  %v11189_v27 = vld [vmem:[#allocation12 + $0x968] ss:$16 sps:$4 sm:$0xff]   ;;  %v11194_v4 = vld [vmem:[#allocation12 + $0x984] ss:$16 sps:$4 sm:$0xff]  }
 0x661   : > { %8476 = vmatprep.subr.bf16.mxu0 %v11146_v24  ;;  %8777 = vmatprep.subr.bf16.mxu1 %v11149_v56  ;;  %v11197_v24 = vld [vmem:[#allocation12 + $0x98c] ss:$16 sps:$4 sm:$0xff]   ;;  %v11192_v56 = vld [vmem:[#allocation12 + $0x980] ss:$16 sps:$4 sm:$0xff]  }
 0x664   : > { %8477 = vmatpush1.bf16.msra.mxu0 %v11144_v18  ;;  %8778 = vmatpush1.bf16.msra.mxu1 %v11147_v34  ;;  %v11195_v18 = vld [vmem:[#allocation12 + $0x988] ss:$16 sps:$4 sm:$0xff]   ;;  %v11200_v34 = vld [vmem:[#allocation12 + $0x9a4] ss:$16 sps:$4 sm:$0xff]  }
 0x665   : > { %8478 = vmatprep.subr.bf16.mxu0 %v11152_v35  ;;  %8779 = vmatprep.subr.bf16.mxu1 %v11155_v9  ;;  %v11203_v35 = vld [vmem:[#allocation12 + $0x9ac] ss:$16 sps:$4 sm:$0xff]   ;;  %v11198_v9 = vld [vmem:[#allocation12 + $0x9a0] ss:$16 sps:$4 sm:$0xff]  }
 0x668   : > { %8479 = vmatpush1.bf16.msra.mxu0 %v11150_v15  ;;  %8780 = vmatpush1.bf16.msra.mxu1 %v11153_v48  ;;  %v11201_v15 = vld [vmem:[#allocation12 + $0x9a8] ss:$16 sps:$4 sm:$0xff]   ;;  %v11206_v48 = vld [vmem:[#allocation12 + $0x9c4] ss:$16 sps:$4 sm:$0xff]  }
 0x669   : > { %8480 = vmatprep.subr.bf16.mxu0 %v11158_v19  ;;  %8781 = vmatprep.subr.bf16.mxu1 %v11161_v41  ;;  %v11209_v19 = vld [vmem:[#allocation12 + $0x9cc] ss:$16 sps:$4 sm:$0xff]   ;;  %v10643_v41 = vpop.permute.xlu0 %10642 }
 0x66c   : > { %8481 = vmatpush1.bf16.msra.mxu0 %v11156_v31  ;;  %8782 = vmatpush1.bf16.msra.mxu1 %v11159_v36  ;;  %v11204_v31 = vld [vmem:[#allocation12 + $0x9c0] ss:$16 sps:$4 sm:$0xff]   ;;  %v11207_v36 = vld [vmem:[#allocation12 + $0x9c8] ss:$16 sps:$4 sm:$0xff]  }
 0x66d   : > { %8482 = vmatprep.subr.bf16.mxu0 %v11164_v33  ;;  %8783 = vmatprep.subr.bf16.mxu1 %v11167_v40  ;;  %v11212_v33 = vld [vmem:[#allocation12 + $0x9e4] ss:$16 sps:$4 sm:$0xff]   ;;  %v11215_v40 = vld [vmem:[#allocation12 + $0x9ec] ss:$16 sps:$4 sm:$0xff]  }
 0x670   : > { %8483 = vmatpush1.bf16.msra.mxu0 %v11162_v22  ;;  %8784 = vmatpush1.bf16.msra.mxu1 %v11165_v29  ;;  %v10645_v22 = vunpack.i.h.bf16 %v10643_v41  ;;  %v10644_v29 = vunpack.i.l.bf16 %v10643_v41  ;;  %v11252_v41 = vld [vmem:[#allocation12 + $0xac0] ss:$16 sps:$4 sm:$0xff]  }
 0x671   : > { %8484 = vmatprep.subr.bf16.mxu0 %v11170_v49  ;;  %8785 = vmatprep.subr.bf16.mxu1 %v11173_v0  ;;  %v11210_v49 = vld [vmem:[#allocation12 + $0x9e0] ss:$16 sps:$4 sm:$0xff]   ;;  %v11213_v0 = vld [vmem:[#allocation12 + $0x9e8] ss:$16 sps:$4 sm:$0xff]  }
 0x674   : > { %8485 = vmatpush1.bf16.msra.mxu0 %v11168_v14  ;;  %8786 = vmatpush1.bf16.msra.mxu1 %v11171_v8  ;;  %v11218_v14 = vld [vmem:[#allocation12 + $0xa04] ss:$16 sps:$4 sm:$0xff]   ;;  %v11221_v8 = vld [vmem:[#allocation12 + $0xa0c] ss:$16 sps:$4 sm:$0xff]  }
 0x675   : > { %8486 = vmatprep.subr.bf16.mxu0 %v11176_v21  ;;  %8787 = vmatprep.subr.bf16.mxu1 %v11179_v55  ;;  %v5154_v21 = vsel %vm616_vm10, %v10635_v12, %v10644_v29  ;;  %v5158_v55 = vsel %vm616_vm10, %v10640_v51, %v10645_v22  ;;  %v11225_v12 = vld [vmem:[#allocation12 + $0xa28] ss:$16 sps:$4 sm:$0xff]   ;;  %v11233_v51 = vld [vmem:[#allocation12 + $0xa4c] ss:$16 sps:$4 sm:$0xff]   ;;  %v11266_v29 = vld [vmem:[#allocation12 + $0xb04] ss:$16 sps:$4 sm:$0xff]  }
 0x676   : > { %v11261_v22 = vld [vmem:[#allocation12 + $0xae8] ss:$16 sps:$4 sm:$0xff]  }
 0x678   : > { %8487 = vmatpush1.bf16.msra.mxu0 %v11174_v17  ;;  %8788 = vmatpush1.bf16.msra.mxu1 %v11177_v47  ;;  %v11216_v17 = vld [vmem:[#allocation12 + $0xa00] ss:$16 sps:$4 sm:$0xff]   ;;  %v5214_v47 = vpack.c.bf16 %v5158_v55, %v5154_v21  ;;  %v11275_v21 = vld [vmem:[#allocation12 + $0xb2c] ss:$16 sps:$4 sm:$0xff]  }
 0x679   : > { %8488 = vmatprep.subr.bf16.mxu0 %v11182_v42  ;;  %8789 = vmatprep.subr.bf16.mxu1 %v11185_v6  ;;  %v11219_v42 = vld [vmem:[#allocation12 + $0xa08] ss:$16 sps:$4 sm:$0xff]   ;;  %v11224_v6 = vld [vmem:[#allocation12 + $0xa24] ss:$16 sps:$4 sm:$0xff]   ;;  %v11270_v55 = vld [vmem:[#allocation12 + $0xb20] ss:$16 sps:$4 sm:$0xff]  }
 0x67c   : > { %8489 = vmatpush1.bf16.msra.mxu0 %v11180_v32  ;;  %8790 = vmatpush1.bf16.msra.mxu1 %v11183_v25  ;;  %v11227_v32 = vld [vmem:[#allocation12 + $0xa2c] ss:$16 sps:$4 sm:$0xff]   ;;  %v11228_v25 = vld [vmem:[#allocation12 + $0xa40] ss:$16 sps:$4 sm:$0xff]  }
 0x67d   : > { %8490 = vmatprep.subr.bf16.mxu0 %v11188_v52  ;;  %8791 = vmatprep.subr.bf16.mxu1 %v11191_v58  ;;  %v11231_v52 = vld [vmem:[#allocation12 + $0xa48] ss:$16 sps:$4 sm:$0xff]   ;;  %v11236_v58 = vld [vmem:[#allocation12 + $0xa64] ss:$16 sps:$4 sm:$0xff]  }
 0x680   : > { %8491 = vmatpush1.bf16.msra.mxu0 %v11186_v44  ;;  %8792 = vmatpush1.bf16.msra.mxu1 %v11189_v27  ;;  %v11239_v44 = vld [vmem:[#allocation12 + $0xa6c] ss:$16 sps:$4 sm:$0xff]   ;;  %v11234_v27 = vld [vmem:[#allocation12 + $0xa60] ss:$16 sps:$4 sm:$0xff]  }
 0x681   : > { %8492 = vmatprep.subr.bf16.mxu0 %v11194_v4  ;;  %8793 = vmatprep.subr.bf16.mxu1 %v11197_v24  ;;  %v11237_v4 = vld [vmem:[#allocation12 + $0xa68] ss:$16 sps:$4 sm:$0xff]   ;;  %v11242_v24 = vld [vmem:[#allocation12 + $0xa84] ss:$16 sps:$4 sm:$0xff]  }
 0x684   : > { %8493 = vmatpush1.bf16.msra.mxu0 %v11192_v56  ;;  %8794 = vmatpush1.bf16.msra.mxu1 %v11195_v18  ;;  %v11240_v56 = vld [vmem:[#allocation12 + $0xa80] ss:$16 sps:$4 sm:$0xff]   ;;  %v11243_v18 = vld [vmem:[#allocation12 + $0xa88] ss:$16 sps:$4 sm:$0xff]  }
 0x685   : > { %8494 = vmatprep.subr.bf16.mxu0 %v11200_v34  ;;  %8795 = vmatprep.subr.bf16.mxu1 %v11203_v35  ;;  %v11248_v34 = vld [vmem:[#allocation12 + $0xaa4] ss:$16 sps:$4 sm:$0xff]   ;;  %v11251_v35 = vld [vmem:[#allocation12 + $0xaac] ss:$16 sps:$4 sm:$0xff]  }
 0x688   : > { %8495 = vmatpush1.bf16.msra.mxu0 %v11198_v9  ;;  %8796 = vmatpush1.bf16.msra.mxu1 %v11201_v15  ;;  %v11246_v9 = vld [vmem:[#allocation12 + $0xaa0] ss:$16 sps:$4 sm:$0xff]   ;;  %v11249_v15 = vld [vmem:[#allocation12 + $0xaa8] ss:$16 sps:$4 sm:$0xff]  }
 0x689   : > { %8496 = vmatprep.subr.bf16.mxu0 %v11206_v48  ;;  %8797 = vmatprep.subr.bf16.mxu1 %v11209_v19  ;;  %v11254_v48 = vld [vmem:[#allocation12 + $0xac4] ss:$16 sps:$4 sm:$0xff]   ;;  %v11257_v19 = vld [vmem:[#allocation12 + $0xacc] ss:$16 sps:$4 sm:$0xff]  }
 0x68c   : > { %8497 = vmatpush1.bf16.msra.mxu0 %v11204_v31  ;;  %8798 = vmatpush1.bf16.msra.mxu1 %v11207_v36  ;;  %v11255_v31 = vld [vmem:[#allocation12 + $0xac8] ss:$16 sps:$4 sm:$0xff]   ;;  %v11260_v36 = vld [vmem:[#allocation12 + $0xae4] ss:$16 sps:$4 sm:$0xff]  }
 0x68d   : > { %8498 = vmatprep.subr.bf16.mxu0 %v11212_v33  ;;  %8799 = vmatprep.subr.bf16.mxu1 %v11215_v40  ;;  %v11263_v33 = vld [vmem:[#allocation12 + $0xaec] ss:$16 sps:$4 sm:$0xff]   ;;  %v11258_v40 = vld [vmem:[#allocation12 + $0xae0] ss:$16 sps:$4 sm:$0xff]  }
 0x690   : > { %8499 = vmatpush1.bf16.msra.mxu0 %v11210_v49  ;;  %8800 = vmatpush1.bf16.msra.mxu1 %v11213_v0  ;;  %v11269_v49 = vld [vmem:[#allocation12 + $0xb0c] ss:$16 sps:$4 sm:$0xff]   ;;  %v11264_v0 = vld [vmem:[#allocation12 + $0xb00] ss:$16 sps:$4 sm:$0xff]  }
 0x691   : > { %8511 = vmatprep.subr.bf16.mxu0 %v11218_v14  ;;  %8812 = vmatprep.subr.bf16.mxu1 %v11221_v8  ;;  %v11267_v14 = vld [vmem:[#allocation12 + $0xb08] ss:$16 sps:$4 sm:$0xff]   ;;  %v11272_v8 = vld [vmem:[#allocation12 + $0xb24] ss:$16 sps:$4 sm:$0xff]  }
 0x693   : > { %8501 = vmatmul.mubr.bf16.vlgmr.msra.gmra.mrb[8].mxu0 %v5214_v47  ;;  %8802 = vmatmul.mubr.bf16.vlgmr.msra.gmra.mrb[8].mxu1 %v5214_v47  ;;  %v11278_v47 = vld [vmem:[#allocation12 + $0xb44] ss:$16 sps:$4 sm:$0xff]  }
 0x694   : > { %8512 = vmatpush1.bf16.msra.mxu0 %v11216_v17  ;;  %8543 = vmatprep.mubr.bf16.mxu0 %v12842_v20  ;;  %v11273_v17 = vld [vmem:[#allocation12 + $0xb28] ss:$16 sps:$4 sm:$0xff]  }
 0x695   : > { %8813 = vmatpush1.bf16.msra.mxu1 %v11219_v42  ;;  %8844 = vmatprep.mubr.bf16.mxu1 %v12842_v20  ;;  %v11245_v20 = vld [vmem:[#allocation12 + $0xa8c] ss:$16 sps:$4 sm:$0xff]  }
 0x696   : > { %8513 = vmatprep.subr.bf16.mxu0 %v11224_v6  ;;  %8814 = vmatprep.subr.bf16.mxu1 %v11227_v32  ;;  %v11281_v42 = vld [vmem:[#allocation12 + $0xb4c] ss:$16 sps:$4 sm:$0xff]   ;;  %v11276_v6 = vld [vmem:[#allocation12 + $0xb40] ss:$16 sps:$4 sm:$0xff]   ;;  %v11279_v32 = vld [vmem:[#allocation12 + $0xb48] ss:$16 sps:$4 sm:$0xff]  }
 0x698   : > { %8514 = vmatpush1.bf16.msra.mxu0 %v11222_v39  ;;  %v11284_v39 = vld [vmem:[#allocation12 + $0xb64] ss:$16 sps:$4 sm:$0xff]  }
 0x699   : > { %8815 = vmatpush1.bf16.msra.mxu1 %v11225_v12  ;;  %8515 = vmatprep.subr.bf16.mxu0 %v11230_v37  ;;  %v11287_v12 = vld [vmem:[#allocation12 + $0xb6c] ss:$16 sps:$4 sm:$0xff]   ;;  %v11282_v37 = vld [vmem:[#allocation12 + $0xb60] ss:$16 sps:$4 sm:$0xff]  }
 0x69a   : > { %8816 = vmatprep.subr.bf16.mxu1 %v11233_v51  ;;  %v11285_v51 = vld [vmem:[#allocation12 + $0xb68] ss:$16 sps:$4 sm:$0xff]  }
 0x69c   : > { %8516 = vmatpush1.bf16.msra.mxu0 %v11228_v25  ;;  %v11290_v25 = vld [vmem:[#allocation12 + $0xb84] ss:$16 sps:$4 sm:$0xff]  }
 0x69d   : > { %8817 = vmatpush1.bf16.msra.mxu1 %v11231_v52  ;;  %8517 = vmatprep.subr.bf16.mxu0 %v11236_v58  ;;  %v11293_v52 = vld [vmem:[#allocation12 + $0xb8c] ss:$16 sps:$4 sm:$0xff]   ;;  %v11288_v58 = vld [vmem:[#allocation12 + $0xb80] ss:$16 sps:$4 sm:$0xff]  }
 0x69e   : > { %8818 = vmatprep.subr.bf16.mxu1 %v11239_v44  ;;  %v11291_v44 = vld [vmem:[#allocation12 + $0xb88] ss:$16 sps:$4 sm:$0xff]  }
 0x6a0   : > { %8518 = vmatpush1.bf16.msra.mxu0 %v11234_v27  ;;  %v11296_v27 = vld [vmem:[#allocation12 + $0xba4] ss:$16 sps:$4 sm:$0xff]  }
 0x6a1   : > { %8819 = vmatpush1.bf16.msra.mxu1 %v11237_v4  ;;  %8519 = vmatprep.subr.bf16.mxu0 %v11242_v24  ;;  %v11299_v4 = vld [vmem:[#allocation12 + $0xbac] ss:$16 sps:$4 sm:$0xff]   ;;  %v11294_v24 = vld [vmem:[#allocation12 + $0xba0] ss:$16 sps:$4 sm:$0xff]  }
 0x6a2   : > { %8820 = vmatprep.subr.bf16.mxu1 %v11245_v20  ;;  %v11297_v20 = vld [vmem:[#allocation12 + $0xba8] ss:$16 sps:$4 sm:$0xff]  }
 0x6a4   : > { %8520 = vmatpush1.bf16.msra.mxu0 %v11240_v56  ;;  %v11302_v56 = vld [vmem:[#allocation12 + $0xbc4] ss:$16 sps:$4 sm:$0xff]  }
 0x6a5   : > { %8821 = vmatpush1.bf16.msra.mxu1 %v11243_v18  ;;  %8521 = vmatprep.subr.bf16.mxu0 %v11248_v34  ;;  %v11305_v18 = vld [vmem:[#allocation12 + $0xbcc] ss:$16 sps:$4 sm:$0xff]   ;;  %v11300_v34 = vld [vmem:[#allocation12 + $0xbc0] ss:$16 sps:$4 sm:$0xff]  }
 0x6a6   : > { %8822 = vmatprep.subr.bf16.mxu1 %v11251_v35  ;;  %v11303_v35 = vld [vmem:[#allocation12 + $0xbc8] ss:$16 sps:$4 sm:$0xff]  }
 0x6a8   : > { %8522 = vmatpush1.bf16.msra.mxu0 %v11246_v9  ;;  %v11308_v9 = vld [vmem:[#allocation12 + $0xbe4] ss:$16 sps:$4 sm:$0xff]  }
 0x6a9   : > { %8823 = vmatpush1.bf16.msra.mxu1 %v11249_v15  ;;  %8523 = vmatprep.subr.bf16.mxu0 %v11254_v48  ;;  %v11311_v15 = vld [vmem:[#allocation12 + $0xbec] ss:$16 sps:$4 sm:$0xff]   ;;  %v5192_v48 = vrot.slane %v12818_v1, 2 }
 0x6aa   : > { %8824 = vmatprep.subr.bf16.mxu1 %v11257_v19  ;;  %v11306_v19 = vld [vmem:[#allocation12 + $0xbe0] ss:$16 sps:$4 sm:$0xff]  }
 0x6ac   : > { %8524 = vmatpush1.bf16.msra.mxu0 %v11252_v41  ;;  %v11309_v41 = vld [vmem:[#allocation12 + $0xbe8] ss:$16 sps:$4 sm:$0xff]  }
 0x6ad   : > { %8825 = vmatpush1.bf16.msra.mxu1 %v11255_v31  ;;  %8525 = vmatprep.subr.bf16.mxu0 %v11260_v36  ;;  %v11314_v31 = vld [vmem:[#allocation12 + $0xc04] ss:$16 sps:$4 sm:$0xff]   ;;  %v5182_v36 = vrot.slane %v12792_v2, 2  ;;  %v11318_v2 = vld [vmem:[#allocation12 + $0xc20] ss:$16 sps:$4 sm:$0xff]  }
 0x6ae   : > { %8826 = vmatprep.subr.bf16.mxu1 %v11263_v33  ;;  %v11317_v33 = vld [vmem:[#allocation12 + $0xc0c] ss:$16 sps:$4 sm:$0xff]  }
 0x6b0   : > { %8526 = vmatpush1.bf16.msra.mxu0 %v11258_v40  ;;  %v5181_v40 = vrot.slane %v12801_v13, 2  ;;  %v11321_v13 = vld [vmem:[#allocation12 + $0xc28] ss:$16 sps:$4 sm:$0xff]  }
 0x6b1   : > { %8827 = vmatpush1.bf16.msra.mxu1 %v11261_v22  ;;  %8527 = vmatprep.subr.bf16.mxu0 %v11266_v29  ;;  %v11312_v22 = vld [vmem:[#allocation12 + $0xc00] ss:$16 sps:$4 sm:$0xff]   ;;  %v5193_v29 = vsel %vm518_vm6, %v5182_v36, %v5192_v48 }
 0x6b2   : > { %8828 = vmatprep.subr.bf16.mxu1 %v11269_v49  ;;  %v11315_v49 = vld [vmem:[#allocation12 + $0xc08] ss:$16 sps:$4 sm:$0xff]   ;;  %v5183_v1 = vsel %vm518_vm6, %v5181_v40, %v5182_v36  ;;  %v11360_v48 = vld [vmem:[#allocation12 + $0xd00] ss:$16 sps:$4 sm:$0xff]   ;;  %v11374_v40 = vld [vmem:[#allocation12 + $0xd44] ss:$16 sps:$4 sm:$0xff]  }
 0x6b3   : > { %v11366_v36 = vld [vmem:[#allocation12 + $0xd20] ss:$16 sps:$4 sm:$0xff]  }
 0x6b4   : > { %8528 = vmatpush1.bf16.msra.mxu0 %v11264_v0  ;;  %v11320_v0 = vld [vmem:[#allocation12 + $0xc24] ss:$16 sps:$4 sm:$0xff]  }
 0x6b5   : > { %8829 = vmatpush1.bf16.msra.mxu1 %v11267_v14  ;;  %8529 = vmatprep.subr.bf16.mxu0 %v11272_v8  ;;  %v5219_v14 = vpack.c.bf16 %v5193_v29, %v5183_v1  ;;  %v11323_v8 = vld [vmem:[#allocation12 + $0xc2c] ss:$16 sps:$4 sm:$0xff]   ;;  %v11372_v29 = vld [vmem:[#allocation12 + $0xd40] ss:$16 sps:$4 sm:$0xff]   ;;  %v11380_v1 = vld [vmem:[#allocation12 + $0xd64] ss:$16 sps:$4 sm:$0xff]  }
 0x6b6   : > { %8830 = vmatprep.subr.bf16.mxu1 %v11275_v21  ;;  %v11326_v21 = vld [vmem:[#allocation12 + $0xc44] ss:$16 sps:$4 sm:$0xff]  }
 0x6b8   : > { %8530 = vmatpush1.bf16.msra.mxu0 %v11270_v55  ;;  %v11329_v55 = vld [vmem:[#allocation12 + $0xc4c] ss:$16 sps:$4 sm:$0xff]  }
 0x6b9   : > { %8831 = vmatpush1.bf16.msra.mxu1 %v11273_v17  ;;  %8531 = vmatprep.subr.bf16.mxu0 %v11278_v47  ;;  %v11324_v17 = vld [vmem:[#allocation12 + $0xc40] ss:$16 sps:$4 sm:$0xff]   ;;  %v11327_v47 = vld [vmem:[#allocation12 + $0xc48] ss:$16 sps:$4 sm:$0xff]  }
 0x6ba   : > { %8832 = vmatprep.subr.bf16.mxu1 %v11281_v42  ;;  %v11332_v42 = vld [vmem:[#allocation12 + $0xc64] ss:$16 sps:$4 sm:$0xff]  }
 0x6bc   : > { %8532 = vmatpush1.bf16.msra.mxu0 %v11276_v6  ;;  %v11330_v6 = vld [vmem:[#allocation12 + $0xc60] ss:$16 sps:$4 sm:$0xff]  }
 0x6bd   : > { %8833 = vmatpush1.bf16.msra.mxu1 %v11279_v32  ;;  %8533 = vmatprep.subr.bf16.mxu0 %v11284_v39  ;;  %v11333_v32 = vld [vmem:[#allocation12 + $0xc68] ss:$16 sps:$4 sm:$0xff]   ;;  %v11338_v39 = vld [vmem:[#allocation12 + $0xc84] ss:$16 sps:$4 sm:$0xff]  }
 0x6be   : > { %8834 = vmatprep.subr.bf16.mxu1 %v11287_v12  ;;  %v11341_v12 = vld [vmem:[#allocation12 + $0xc8c] ss:$16 sps:$4 sm:$0xff]  }
 0x6c0   : > { %8534 = vmatpush1.bf16.msra.mxu0 %v11282_v37  ;;  %v11336_v37 = vld [vmem:[#allocation12 + $0xc80] ss:$16 sps:$4 sm:$0xff]  }
 0x6c1   : > { %8835 = vmatpush1.bf16.msra.mxu1 %v11285_v51  ;;  %8535 = vmatprep.subr.bf16.mxu0 %v11290_v25  ;;  %v11339_v51 = vld [vmem:[#allocation12 + $0xc88] ss:$16 sps:$4 sm:$0xff]   ;;  %v11344_v25 = vld [vmem:[#allocation12 + $0xca4] ss:$16 sps:$4 sm:$0xff]  }
 0x6c2   : > { %8836 = vmatprep.subr.bf16.mxu1 %v11293_v52  ;;  %v11347_v52 = vld [vmem:[#allocation12 + $0xcac] ss:$16 sps:$4 sm:$0xff]  }
 0x6c4   : > { %8536 = vmatpush1.bf16.msra.mxu0 %v11288_v58  ;;  %v11342_v58 = vld [vmem:[#allocation12 + $0xca0] ss:$16 sps:$4 sm:$0xff]  }
 0x6c5   : > { %8837 = vmatpush1.bf16.msra.mxu1 %v11291_v44  ;;  %8537 = vmatprep.subr.bf16.mxu0 %v11296_v27  ;;  %v11345_v44 = vld [vmem:[#allocation12 + $0xca8] ss:$16 sps:$4 sm:$0xff]   ;;  %v11350_v27 = vld [vmem:[#allocation12 + $0xcc4] ss:$16 sps:$4 sm:$0xff]  }
 0x6c6   : > { %8838 = vmatprep.subr.bf16.mxu1 %v11299_v4  ;;  %v11353_v4 = vld [vmem:[#allocation12 + $0xccc] ss:$16 sps:$4 sm:$0xff]  }
 0x6c8   : > { %8538 = vmatpush1.bf16.msra.mxu0 %v11294_v24  ;;  %v11348_v24 = vld [vmem:[#allocation12 + $0xcc0] ss:$16 sps:$4 sm:$0xff]  }
 0x6c9   : > { %8839 = vmatpush1.bf16.msra.mxu1 %v11297_v20  ;;  %8539 = vmatprep.subr.bf16.mxu0 %v11302_v56  ;;  %v11351_v20 = vld [vmem:[#allocation12 + $0xcc8] ss:$16 sps:$4 sm:$0xff]   ;;  %v11356_v56 = vld [vmem:[#allocation12 + $0xce4] ss:$16 sps:$4 sm:$0xff]  }
 0x6ca   : > { %8840 = vmatprep.subr.bf16.mxu1 %v11305_v18  ;;  %v11359_v18 = vld [vmem:[#allocation12 + $0xcec] ss:$16 sps:$4 sm:$0xff]  }
 0x6cc   : > { %8540 = vmatpush1.bf16.msra.mxu0 %v11300_v34  ;;  %v11354_v34 = vld [vmem:[#allocation12 + $0xce0] ss:$16 sps:$4 sm:$0xff]  }
 0x6cd   : > { %8841 = vmatpush1.bf16.msra.mxu1 %v11303_v35  ;;  %8541 = vmatprep.subr.bf16.mxu0 %v11308_v9  ;;  %v11357_v35 = vld [vmem:[#allocation12 + $0xce8] ss:$16 sps:$4 sm:$0xff]   ;;  %v11362_v9 = vld [vmem:[#allocation12 + $0xd04] ss:$16 sps:$4 sm:$0xff]  }
 0x6ce   : > { %8842 = vmatprep.subr.bf16.mxu1 %v11311_v15  ;;  %v11365_v15 = vld [vmem:[#allocation12 + $0xd0c] ss:$16 sps:$4 sm:$0xff]  }
 0x6d0   : > { %8542 = vmatpush1.bf16.msra.mxu0 %v11306_v19  ;;  %v11363_v19 = vld [vmem:[#allocation12 + $0xd08] ss:$16 sps:$4 sm:$0xff]  }
 0x6d1   : > { %8843 = vmatpush1.bf16.msra.mxu1 %v11309_v41  ;;  %8554 = vmatprep.subr.bf16.mxu0 %v11314_v31  ;;  %v11368_v41 = vld [vmem:[#allocation12 + $0xd24] ss:$16 sps:$4 sm:$0xff]   ;;  %v11371_v31 = vld [vmem:[#allocation12 + $0xd2c] ss:$16 sps:$4 sm:$0xff]  }
 0x6d2   : > { %8855 = vmatprep.subr.bf16.mxu1 %v11317_v33  ;;  %v11369_v33 = vld [vmem:[#allocation12 + $0xd28] ss:$16 sps:$4 sm:$0xff]  }
 0x6d3   : > { %8544 = vmatmul.mubr.bf16.vlgmr.msra.gmra.mrb[8].mxu0 %v12777_v28 }
 0x6d4   : > { %8845 = vmatmul.mubr.bf16.vlgmr.msra.gmra.mrb[8].mxu1 %v12777_v28  ;;  %8555 = vmatpush1.bf16.msra.mxu0 %v11312_v22  ;;  %v11335_v28 = vld [vmem:[#allocation12 + $0xc6c] ss:$16 sps:$4 sm:$0xff]  }
 0x6d5   : > { %10217 = vmatprep.mubr.msk.bf16.mxu0 %vm616_vm10, %v5219_v14  ;;  %8856 = vmatpush1.bf16.msra.mxu1 %v11315_v49  ;;  %v11377_v22 = vld [vmem:[#allocation12 + $0xd4c] ss:$16 sps:$4 sm:$0xff]   ;;  %v11375_v49 = vld [vmem:[#allocation12 + $0xd48] ss:$16 sps:$4 sm:$0xff]  }
 0x6d6   : > { %10223 = vmatprep.mubr.msk.bf16.mxu1 %vm616_vm10, %v5219_v14  ;;  %8556 = vmatprep.subr.bf16.mxu0 %v11320_v0  ;;  %v11383_v0 = vld [vmem:[#allocation12 + $0xd6c] ss:$16 sps:$4 sm:$0xff]   ;;  %v11378_v14 = vld [vmem:[#allocation12 + $0xd60] ss:$16 sps:$4 sm:$0xff]  }
 0x6d7   : > { %8857 = vmatprep.subr.bf16.mxu1 %v11323_v8  ;;  %v11381_v8 = vld [vmem:[#allocation12 + $0xd68] ss:$16 sps:$4 sm:$0xff]  }
 0x6d8   : > { %8557 = vmatpush1.bf16.msra.mxu0 %v11318_v2  ;;  %v8898_v2 = vld [vmem:[#allocation15] sm:$0xf] }
 0x6d9   : > { %8858 = vmatpush1.bf16.msra.mxu1 %v11321_v13  ;;  %8558 = vmatprep.subr.bf16.mxu0 %v11326_v21  ;;  %v8903_v13 = vrot.slane %v8898_v2, %v4879_v61  ;;  %v8911_v21 = vrot.slane %v8898_v2, %v4887_v45 }
 0x6da   : > { %8859 = vmatprep.subr.bf16.mxu1 %v11329_v55  ;;  %v8907_v55 = vrot.slane %v8898_v2, %v4883_v63 }
 0x6dc   : > { %8559 = vmatpush1.bf16.msra.mxu0 %v11324_v17  ;;  %v8915_v17 = vrot.slane %v8898_v2, %v4891_v46 }
 0x6dd   : > { %8860 = vmatpush1.bf16.msra.mxu1 %v11327_v47  ;;  %8560 = vmatprep.subr.bf16.mxu0 %v11332_v42 }
 0x6de   : > { %8861 = vmatprep.subr.bf16.mxu1 %v11335_v28 }
 0x6e0   : > { %8561 = vmatpush1.bf16.msra.mxu0 %v11330_v6 }
 0x6e1   : > { %8862 = vmatpush1.bf16.msra.mxu1 %v11333_v32  ;;  %8562 = vmatprep.subr.bf16.mxu0 %v11338_v39 }
 0x6e2   : > { %8863 = vmatprep.subr.bf16.mxu1 %v11341_v12 }
 0x6e4   : > { %8563 = vmatpush1.bf16.msra.mxu0 %v11336_v37 }
 0x6e5   : > { %8864 = vmatpush1.bf16.msra.mxu1 %v11339_v51  ;;  %8564 = vmatprep.subr.bf16.mxu0 %v11344_v25 }
 0x6e6   : > { %8865 = vmatprep.subr.bf16.mxu1 %v11347_v52 }
 0x6e8   : > { %8565 = vmatpush1.bf16.msra.mxu0 %v11342_v58 }
 0x6e9   : > { %8866 = vmatpush1.bf16.msra.mxu1 %v11345_v44  ;;  %8566 = vmatprep.subr.bf16.mxu0 %v11350_v27 }
 0x6ea   : > { %8867 = vmatprep.subr.bf16.mxu1 %v11353_v4 }
 0x6ec   : > { %8567 = vmatpush1.bf16.msra.mxu0 %v11348_v24 }
 0x6ed   : > { %8868 = vmatpush1.bf16.msra.mxu1 %v11351_v20  ;;  %8568 = vmatprep.subr.bf16.mxu0 %v11356_v56 }
 0x6ee   : > { %8869 = vmatprep.subr.bf16.mxu1 %v11359_v18 }
 0x6f0   : > { %8569 = vmatpush1.bf16.msra.mxu0 %v11354_v34 }
 0x6f1   : > { %8870 = vmatpush1.bf16.msra.mxu1 %v11357_v35  ;;  %8570 = vmatprep.subr.bf16.mxu0 %v11362_v9 }
 0x6f2   : > { %8871 = vmatprep.subr.bf16.mxu1 %v11365_v15 }
 0x6f4   : > { %8571 = vmatpush1.bf16.msra.mxu0 %v11360_v48 }
 0x6f5   : > { %8872 = vmatpush1.bf16.msra.mxu1 %v11363_v19  ;;  %8572 = vmatprep.subr.bf16.mxu0 %v11368_v41 }
 0x6f6   : > { %8873 = vmatprep.subr.bf16.mxu1 %v11371_v31 }
 0x6f8   : > { %8573 = vmatpush1.bf16.msra.mxu0 %v11366_v36 }
 0x6f9   : > { %8874 = vmatpush1.bf16.msra.mxu1 %v11369_v33  ;;  %8574 = vmatprep.subr.bf16.mxu0 %v11374_v40 }
 0x6fa   : > { %8875 = vmatprep.subr.bf16.mxu1 %v11377_v22 }
 0x6fc   : > { %8575 = vmatpush1.bf16.msra.mxu0 %v11372_v29 }
 0x6fd   : > { %8876 = vmatpush1.bf16.msra.mxu1 %v11375_v49  ;;  %8576 = vmatprep.subr.bf16.mxu0 %v11380_v1 }
 0x6fe   : > { %8877 = vmatprep.subr.bf16.mxu1 %v11383_v0 }
 0x700   : > { %8577 = vmatpush1.bf16.msra.mxu0 %v11378_v14 }
 0x701   : > { %8878 = vmatpush1.bf16.msra.mxu1 %v11381_v8 }
 0x703   : > { %8587 = vmatmul.mubr.bf16.vlgmr.msra.gmra.mrb[8].mxu0 %v12845_v38 }
 0x704   : > { %8888 = vmatmul.mubr.bf16.vlgmr.msra.gmra.mrb[8].mxu1 %v12845_v38 }
 0x7d6   : > { %v8588_v47 = vpop.f32.mrb[8].mxu0 }
 0x7d7   : > { %v8920_v42 = vadd.f32 %v8903_v13, %v8588_v47  ;;  %v8889_v28 = vpop.f32.mrb[8].mxu1  ;;  %v8590_v6 = vpop.f32.mrb[9].mxu0 }
 0x7d8   : > { %v8922_v32 = vadd.f32 %v8911_v21, %v8889_v28  ;;  %v8921_v39 = vadd.f32 %v8907_v55, %v8590_v6  ;;  %v8891_v38 = vpop.f32.mrb[9].mxu1  ;;  %v8592_v12 = vpop.f32.mrb[10].mxu0 }
 0x7d9   : > { %11416 = vtanh.f32 %v8920_v42  ;;  %v8923_v61 = vadd.f32 %v8915_v17, %v8891_v38  ;;  %v8924_v37 = vadd.f32 %v8903_v13, %v8592_v12  ;;  %v8893_v51 = vpop.f32.mrb[10].mxu1  ;;  %v8594_v45 = vpop.f32.mrb[11].mxu0 }
 0x7da   : > { %11418 = vtanh.f32 %v8922_v32  ;;  %v8926_v25 = vadd.f32 %v8911_v21, %v8893_v51  ;;  %v8925_v63 = vadd.f32 %v8907_v55, %v8594_v45  ;;  %v8895_v52 = vpop.f32.mrb[11].mxu1 }
 0x7db   : > { %11420 = vtanh.f32 %v8921_v39  ;;  %v8927_v59 = vadd.f32 %v8915_v17, %v8895_v52 }
 0x7dc   : > { %11422 = vtanh.f32 %v8923_v61 }
 0x7dd   : > { %11424 = vtanh.f32 %v8924_v37 }
 0x7de   : > { %11426 = vtanh.f32 %v8926_v25 }
 0x7df   : > { %11428 = vtanh.f32 %v8925_v63 }
 0x7e0   : > { %11430 = vtanh.f32 %v8927_v59 }
 0x7e3   : > { %v11417_v46 = vpop.eup %11416 }
 0x7e4   : > { %v11419_v58 = vpop.eup %11418  ;;  %v8952_v44 = vmul.f32 %v11417_v46, %v12570_v50 }
 0x7e5   : > { %v11421_v27 = vpop.eup %11420  ;;  %v8954_v4 = vmul.f32 %v11419_v58, %v12572_v57 }
 0x7e6   : > { %v11423_v24 = vpop.eup %11422  ;;  %v8960_v20 = vadd.f32 %v8952_v44, %v12590_v16  ;;  %v8953_v56 = vmul.f32 %v11421_v27, %v12577_v43 }
 0x7e7   : > { %v11425_v18 = vpop.eup %11424  ;;  %v8962_v34 = vadd.f32 %v8954_v4, %v12598_v53  ;;  %v8955_v35 = vmul.f32 %v11423_v24, %v12582_v3 }
 0x7e8   : > { %v11427_v9 = vpop.eup %11426  ;;  %8968 = vst [vmem:[%s460_s24] sm:$0xff] %v8960_v20  ;;  %v8961_v15 = vadd.f32 %v8953_v56, %v12606_v23  ;;  %v8956_v50 = vmul.f32 %v11425_v18, %v12587_v11 }
 0x7e9   : > { %v11429_v48 = vpop.eup %11428  ;;  %8970 = vst [vmem:[%s460_s24 + $0x10] sm:$0xff] %v8962_v34  ;;  %v8963_v57 = vadd.f32 %v8955_v35, %v12614_v62  ;;  %v8958_v16 = vmul.f32 %v11427_v9, %v12595_v10 }
 0x7ea   : > { %v11431_v43 = vpop.eup %11430  ;;  %8969 = vst [vmem:[%s460_s24 + $0x8] sm:$0xff] %v8961_v15  ;;  %v8964_v53 = vadd.f32 %v8956_v50, %v12620_v60  ;;  %v8957_v3 = vmul.f32 %v11429_v48, %v12603_v7 }
 0x7eb   : > { %8971 = vst [vmem:[%s460_s24 + $0x18] sm:$0xff] %v8963_v57  ;;  %v8966_v23 = vadd.f32 %v8958_v16, %v12626_v30  ;;  %v8959_v11 = vmul.f32 %v11431_v43, %v12611_v26 }
 0x7ec   : > { %8972 = vst [vmem:[%s460_s24 + $0x20] sm:$0xff] %v8964_v53  ;;  %v8965_v62 = vadd.f32 %v8957_v3, %v12629_v5 }
 0x7ed   : > { %8974 = vst [vmem:[%s460_s24 + $0x30] sm:$0xff] %v8966_v23  ;;  %v8967_v10 = vadd.f32 %v8959_v11, %v12632_v54 }
 0x7ee   : > { %8973 = vst [vmem:[%s460_s24 + $0x28] sm:$0xff] %v8965_v62 }
 0x7ef   : > { %8975 = vst [vmem:[%s460_s24 + $0x38] sm:$0xff] %v8967_v10 }
 0x7f0   : > { %11701 = shalt.err (!%p11698_p2)
}
 0x7f1   : > { %s11702_s24 = scalar_lea.hbm %s12916_s26, 1024  ;;  %s11706_s23 = scalar_lea.hbm %s13013_s15, 2048 }
 0x7f2   : > { %p11703_p5 = scmp.ne.s32.totalorder %s12916_s26, %s11702_s24  ;;  %p11707_p11 = scmp.lt.u32.totalorder %s12916_s26, %s13013_s15 }
 0x7f3   : > { %p11708_p6 = scmp.lt.u32.totalorder %s11706_s23, %s11702_s24  ;;  %p11710_p13 = scmp.lt.u32.totalorder %s11702_s24, %s12916_s26 }
 0x7f4   : > { %p11704_p10 = pnand %p11703_p5, %p13014_p8 }
 0x7f5   : > { %p11709_p12 = por %p11708_p6, %p11707_p11 }
 0x7f6   : > { %p11705_p1 = pneg %p11704_p10 }
 0x7f7   : > { %p11711_p3 = por %p11710_p13, %p11709_p12 }
 0x7f9   : > { %p11712_p0 = pnand %p11711_p3, %p11705_p1 }
 0x7fb   : > { %11715 = shalt.err (!%p11712_p0)
}
 0x7fc   : > { %s11807_s13 = smov 512  }
 0x7fd   : > { %10385 = dma.vmem_to_hbm [thread:$0]  (%p13014_p8), %s12919_s19, 1024, %s12916_s26, %s8977_s17, %s11807_s13, %s11807_s13, %s11798_s28  }
 0x7fe PF: > { %s9005_s22 = sand.u32 1, %s11766_s30   ;;  %p13015_p7 = scmp.ne.s32.totalorder %s12994_s25, 0 }
 0x7ff   : > { %p13016_p9 = scmp.ge.s32.totalorder %s11778_s12, 2  ;;  %s9006_s24 = scalar_lea.sflag [#allocation4], %s9005_s22 }
 0x801   : > { %p10417_p4 = pnand %p13016_p9, %p13015_p7 }
 0x803   : > { %11761 = dma.done.wait (!%p10417_p4), %s9006_s24, 1024  }
 0x804   : > { %11763 = vsyncadd (!%p10417_p4), %s9006_s24, 4294966272  ;;  %p24_p2 = scmp.ge.s32.totalorder %s12098_s27, 4   ;;  %s13017_s30 = smov %s11770_s10 }
 0x805   : > { %s13018_s10 = smov %s11774_s11  ;;  %s13019_s11 = smov %s12109_s29 }
 0x806   : > { %s13020_s12 = smov %s12098_s27  ;;  %26 = sbr.rel (!%p24_p2) target bundleno = 10 (0xa), region = 132 }
 0x80d   :  { %9011 = vsyncpa [#allocation3], 1 }
 0x80e   :  { %9013 = vsyncpa [#allocation3 + $0x1], 1 }
 0x80f   :  { %9014 = vsyncpa [#allocation6], 1 }
 0x810   :  { %9015 = vsyncpa [#allocation10], 1 }
 0x811   :  { %9016 = vsyncpa [#allocation13], 1 }
 0x812   :  { %9017 = vsyncpa [#allocation16], 1 }
 0x813   :  { %9018 = vsyncpa [#allocation4], 1 }
 0x814   :  { %9020 = vsyncpa [#allocation4 + $0x1], 1 }

</bundles_post_ra>
